<compile_context>
chip_gen: v6e
topology: v6e:2x2x1
jax: 0.10.0
libtpu: 0.0.40
codegen_flags: <defaults>
</compile_context>

<pallas_src>
import numpy as np
import jax
import jax.numpy as jnp
from jax.experimental import pallas as pl
from jax.experimental.pallas import tpu as pltpu


def _round_up(x, m):
    return -(-x // m) * m


class _LayerGeom:
    """Static geometry for one Conv2d(3x3, stride=2, pad=1) layer."""

    def __init__(self, N, H, W, Cin, Cout):
        assert H % 2 == 0 and W % 2 == 0, "parity-packed s2 kernel assumes even H, W"
        self.N, self.H, self.W, self.Cin, self.Cout = N, H, W, Cin, Cout
        self.Ho, self.Wo = H // 2, W // 2                 # conv output spatial dims
        self.Hp2, self.Wp2 = H // 2 + 1, W // 2 + 1       # padded half-grid (= Ho+1, Wo+1)
        self.Mb = N * self.Hp2 * self.Wp2                 # rows per parity block == acc rows
        # +Wp2+1 slack rows so tap (2,2) of the last parity block never reads OOB.
        self.xp_rows = _round_up(4 * self.Mb + self.Wp2 + 1, 8)


# ----------------------------------------------------------------------------
# Pallas kernel: fused chain of 9-tap conv + bias + ReLU layers.
# ----------------------------------------------------------------------------
def _build_chain_kernel(geoms):
    n_layers = len(geoms)

    def kernel(*refs):
        xp_in = refs[0]
        w_refs = refs[1:1 + n_layers]                      # (9*Cin, Cout) bf16 each
        b_refs = refs[1 + n_layers:1 + 2 * n_layers]       # (1, Cout) f32 each
        o_refs = refs[1 + 2 * n_layers:1 + 3 * n_layers]   # (Mb, Cout) f32 each
        xp_scratch = refs[1 + 3 * n_layers:]               # f32 parity scratch, layers 1..

        xp = xp_in
        for l, g in enumerate(geoms):
            # ---- conv l: 9-tap accumulation, f32 accumulator (vregs/VMEM) ----
            acc = jnp.zeros((g.Mb, g.Cout), jnp.float32)
            for i in range(3):
                for j in range(3):
                    s, da = i % 2, i // 2
                    t, db = j % 2, j // 2
                    base = (s * 2 + t) * g.Mb + da * g.Wp2 + db
                    lhs = xp[pl.ds(base, g.Mb), :].astype(jnp.bfloat16)   # (Mb, Cin)
                    k0 = (i * 3 + j) * g.Cin
                    acc = acc + jnp.dot(lhs, w_refs[l][k0:k0 + g.Cin, :],
                                        preferred_element_type=jnp.float32)
            acc = jnp.maximum(acc + b_refs[l][...], 0.0)   # f32 bias + ReLU (VPU)
            o_refs[l][...] = acc                           # f32 feature, incl. halo rows

            # ---- build the next layer's parity-packed padded input in VMEM ----
            if l + 1 < n_layers:
                gn = geoms[l + 1]
                nxt = xp_scratch[l]
                nxt[...] = jnp.zeros(nxt.shape, nxt.dtype)     # zero pad + slack
                cnt_b = gn.W // 2                              # valid cols per parity row
                for s in range(2):
                    for t in range(2):
                        b_lo = 1 - t                           # dest col-block start
                        q0 = 2 * b_lo + t - 1                  # first source column (0 or 1)
                        blk0 = (s * 2 + t) * gn.Mb
                        for n in range(g.N):
                            for a in range(gn.Hp2):
                                p = 2 * a + s - 1              # source output row
                                if p < 0 or p >= gn.H:
                                    continue                   # stays zero (spatial padding)
                                src = n * g.Hp2 * g.Wp2 + p * g.Wp2 + q0
                                dst = blk0 + n * gn.Hp2 * gn.Wp2 + a * gn.Wp2 + b_lo
                                rows = o_refs[l][pl.ds(src, cnt_b, stride=2), :]
                                nxt[pl.ds(dst, cnt_b), :] = rows
                xp = nxt

    return kernel


def _fused_feature_chain(xp1, w_mats, b_rows, geoms):
    n = len(geoms)
    out_shapes = tuple(jax.ShapeDtypeStruct((g.Mb, g.Cout), jnp.float32) for g in geoms)
    scratch = [pltpu.VMEM((gn.xp_rows, gn.Cin), jnp.float32) for gn in geoms[1:]]

    # Honest cost estimate: true conv FLOPs + actual operand bytes.
    flops = sum(2 * g.N * g.Ho * g.Wo * 9 * g.Cin * g.Cout for g in geoms)
    bytes_accessed = int(xp1.size) * xp1.dtype.itemsize
    for w, b, g in zip(w_mats, b_rows, geoms):
        bytes_accessed += int(w.size) * w.dtype.itemsize
        bytes_accessed += int(b.size) * b.dtype.itemsize
        bytes_accessed += g.Mb * g.Cout * 4

    return pl.pallas_call(
        _build_chain_kernel(geoms),
        out_shape=out_shapes,
        in_specs=[pl.BlockSpec(memory_space=pltpu.MemorySpace.VMEM)
                  for _ in range(1 + 2 * n)],
        out_specs=tuple(pl.BlockSpec(memory_space=pltpu.MemorySpace.VMEM)
                        for _ in range(n)),
        scratch_shapes=scratch,
        cost_estimate=pl.CostEstimate(flops=flops, transcendentals=0,
                                      bytes_accessed=int(bytes_accessed)),
    )(xp1, *w_mats, *b_rows)


# ----------------------------------------------------------------------------
# FeatureExtractorByLayers: apply layers sequentially, return every feature.
# ----------------------------------------------------------------------------
class FeatureExtractorByLayers:
    """JAX/Pallas port of the PyTorch wrapper, instantiated with
    Conv2d(3x3, stride=2, pad=1) + ReLU blocks.  Weight reshuffling ((Cout,Cin,3,3)
    -> (9*Cin, Cout) bf16) happens once at init; the per-call layout plumbing
    (NCHW -> parity-packed padded pixel matrix, halo slice-off, back to NCHW)
    lives in the jitted wrapper."""
    # TODO(synk): only the Conv3x3(s=2,p=1)+ReLU instantiation is implemented; the
    # PyTorch class is generic over arbitrary nn layers.

    def __init__(self, layer_params, input_hw, stride=2, pad=1):
        assert stride == 2 and pad == 1
        self._input_hw = tuple(int(v) for v in input_hw)
        self._w_mats, self._b_rows, self._layer_meta = [], [], []
        for (w, b) in layer_params:
            w_np = np.asarray(w, np.float32)               # (Cout, Cin, 3, 3)
            b_np = np.asarray(b, np.float32)
            Cout, Cin, KH, KW = w_np.shape
            assert KH == 3 and KW == 3
            # Row = (i*3 + j)*Cin + ch, col = co.  True conv weights, no zero inflation.
            w_mat = np.transpose(w_np, (2, 3, 1, 0)).reshape(KH * KW * Cin, Cout)
            self._w_mats.append(jnp.asarray(w_mat, jnp.bfloat16))
            self._b_rows.append(jnp.asarray(b_np, jnp.float32)[None, :])
            self._layer_meta.append((Cin, Cout))
        self._forward = jax.jit(self._forward_impl)

    def _forward_impl(self, x_nchw):
        N = int(x_nchw.shape[0])
        H, W = self._input_hw
        geoms = []
        h, w_ = H, W
        for (Cin, Cout) in self._layer_meta:
            g = _LayerGeom(N, h, w_, Cin, Cout)
            geoms.append(g)
            h, w_ = g.Ho, g.Wo

        # Layer-0 parity-packed, zero-padded input (layout plumbing only, in XLA).
        g0 = geoms[0]
        x_nhwc = jnp.transpose(x_nchw, (0, 2, 3, 1)).astype(jnp.bfloat16)
        xpad = jnp.pad(x_nhwc, ((0, 0), (1, 1), (1, 1), (0, 0)))
        blocks = [xpad[:, s::2, t::2, :].reshape(N * g0.Hp2 * g0.Wp2, g0.Cin)
                  for s in range(2) for t in range(2)]
        xp1 = jnp.concatenate(blocks, axis=0)
        xp1 = jnp.pad(xp1, ((0, g0.xp_rows - 4 * g0.Mb), (0, 0)))

        outs = _fused_feature_chain(xp1, self._w_mats, self._b_rows, geoms)

        feats = []
        for o, g in zip(outs, geoms):
            f = o.reshape(N, g.Hp2, g.Wp2, g.Cout)[:, :g.Ho, :g.Wo, :]   # drop halo rows
            feats.append(jnp.transpose(f, (0, 3, 1, 2)))                 # f32 NCHW
        return feats

    def __call__(self, x):
        return list(self._forward(x))


# ----------------------------------------------------------------------------
# Test harness.
# ----------------------------------------------------------------------------
def _init_layers(key, channels):
    params = []
    for cin, cout in zip(channels[:-1], channels[1:]):
        key, kw_, kb_ = jax.random.split(key, 3)
        fan_in = cin * 3 * 3
        w = jax.random.normal(kw_, (cout, cin, 3, 3), jnp.float32) / np.sqrt(fan_in)
        b = 0.01 * jax.random.normal(kb_, (cout,), jnp.float32)
        params.append((w, b))
    return params


def _reference_forward(x, layer_params):
    """Pure-JAX reference (lax.conv).  Operands rounded to bf16 per layer exactly
    like the kernel (bf16 MXU operands, f32 accumulation)."""
    feats = []
    h = x
    for (w, b) in layer_params:
        h_b = h.astype(jnp.bfloat16).astype(jnp.float32)
        w_b = w.astype(jnp.bfloat16).astype(jnp.float32)
        y = jax.lax.conv_general_dilated(
            h_b, w_b, window_strides=(2, 2), padding=((1, 1), (1, 1)),
            dimension_numbers=("NCHW", "OIHW", "NCHW"))
        y = jnp.maximum(y + b[None, :, None, None], 0.0)
        feats.append(y)
        h = y
    return feats


if __name__ == "__main__":
    key = jax.random.PRNGKey(0)
    k_x, k_p = jax.random.split(key)

    # Small NCHW input, consistent with a conv feature extractor.
    x = jax.random.normal(k_x, (2, 4, 16, 16), jnp.float32)

    # Three conv blocks: 4 -> 8 -> 16 -> 32 channels, spatial 16 -> 8 -> 4 -> 2.
    layer_params = _init_layers(k_p, channels=[4, 8, 16, 32])
    model = FeatureExtractorByLayers(layer_params, input_hw=(16, 16))

    feats = model(x)
    feats = [jax.block_until_ready(f) for f in feats]

    ref_feats = _reference_forward(x, layer_params)
    for f, r in zip(feats, ref_feats):
        assert f.shape == r.shape and f.dtype == r.dtype
        np.testing.assert_allclose(np.asarray(f), np.asarray(r), rtol=2e-3, atol=2e-3)

    print("KERNEL_OK")
</pallas_src>

<mosaic_0001>
module attributes {stable_mosaic.version = 11 : i64} {
  func.func @kernel(%arg0: memref<664x4xbf16, #tpu.memory_space<vmem>>, %arg1: memref<36x8xbf16, #tpu.memory_space<vmem>>, %arg2: memref<72x16xbf16, #tpu.memory_space<vmem>>, %arg3: memref<144x32xbf16, #tpu.memory_space<vmem>>, %arg4: memref<1x8xf32, #tpu.memory_space<vmem>>, %arg5: memref<1x16xf32, #tpu.memory_space<vmem>>, %arg6: memref<1x32xf32, #tpu.memory_space<vmem>>, %arg7: memref<162x8xf32, #tpu.memory_space<vmem>>, %arg8: memref<50x16xf32, #tpu.memory_space<vmem>>, %arg9: memref<18x32xf32, #tpu.memory_space<vmem>>, %arg10: memref<208x8xf32, #tpu.memory_space<vmem>>, %arg11: memref<80x16xf32, #tpu.memory_space<vmem>>) attributes {dimension_semantics = [], scalar_prefetch = 0 : i64, scratch_operands = 2 : i64, tpu.core_type = #tpu.core_type<tc>} {
    %cst = arith.constant 0.000000e+00 : f32
    %0 = vector.broadcast %cst : f32 to vector<162x8xf32>
    %c0 = arith.constant 0 : index
    %c0_0 = arith.constant 0 : index
    %1 = vector.load %arg0[%c0, %c0_0] : memref<664x4xbf16, #tpu.memory_space<vmem>>, vector<162x4xbf16>
    %c0_1 = arith.constant 0 : index
    %c0_2 = arith.constant 0 : index
    %2 = vector.load %arg1[%c0_1, %c0_2] : memref<36x8xbf16, #tpu.memory_space<vmem>>, vector<4x8xbf16>
    %cst_3 = arith.constant dense<0.000000e+00> : vector<162x8xf32>
    %3 = tpu.matmul %1, %2, %cst_3 {dimension_numbers = #tpu.dot_dimension_numbers<[1], [0], [0], [1], [0, 0, 1, 1], [], []>} : vector<162x4xbf16>, vector<4x8xbf16>, vector<162x8xf32> -> vector<162x8xf32>
    %4 = arith.addf %0, %3 : vector<162x8xf32>
    %c162 = arith.constant 162 : index
    %c0_4 = arith.constant 0 : index
    %5 = vector.load %arg0[%c162, %c0_4] : memref<664x4xbf16, #tpu.memory_space<vmem>>, vector<162x4xbf16>
    %c4 = arith.constant 4 : index
    %c0_5 = arith.constant 0 : index
    %6 = vector.load %arg1[%c4, %c0_5] : memref<36x8xbf16, #tpu.memory_space<vmem>>, vector<4x8xbf16>
    %cst_6 = arith.constant dense<0.000000e+00> : vector<162x8xf32>
    %7 = tpu.matmul %5, %6, %cst_6 {dimension_numbers = #tpu.dot_dimension_numbers<[1], [0], [0], [1], [0, 0, 1, 1], [], []>} : vector<162x4xbf16>, vector<4x8xbf16>, vector<162x8xf32> -> vector<162x8xf32>
    %8 = arith.addf %4, %7 : vector<162x8xf32>
    %c1 = arith.constant 1 : index
    %c0_7 = arith.constant 0 : index
    %9 = vector.load %arg0[%c1, %c0_7] : memref<664x4xbf16, #tpu.memory_space<vmem>>, vector<162x4xbf16>
    %c8 = arith.constant 8 : index
    %c0_8 = arith.constant 0 : index
    %10 = vector.load %arg1[%c8, %c0_8] : memref<36x8xbf16, #tpu.memory_space<vmem>>, vector<4x8xbf16>
    %cst_9 = arith.constant dense<0.000000e+00> : vector<162x8xf32>
    %11 = tpu.matmul %9, %10, %cst_9 {dimension_numbers = #tpu.dot_dimension_numbers<[1], [0], [0], [1], [0, 0, 1, 1], [], []>} : vector<162x4xbf16>, vector<4x8xbf16>, vector<162x8xf32> -> vector<162x8xf32>
    %12 = arith.addf %8, %11 : vector<162x8xf32>
    %c324 = arith.constant 324 : index
    %c0_10 = arith.constant 0 : index
    %13 = vector.load %arg0[%c324, %c0_10] : memref<664x4xbf16, #tpu.memory_space<vmem>>, vector<162x4xbf16>
    %c12 = arith.constant 12 : index
    %c0_11 = arith.constant 0 : index
    %14 = vector.load %arg1[%c12, %c0_11] : memref<36x8xbf16, #tpu.memory_space<vmem>>, vector<4x8xbf16>
    %cst_12 = arith.constant dense<0.000000e+00> : vector<162x8xf32>
    %15 = tpu.matmul %13, %14, %cst_12 {dimension_numbers = #tpu.dot_dimension_numbers<[1], [0], [0], [1], [0, 0, 1, 1], [], []>} : vector<162x4xbf16>, vector<4x8xbf16>, vector<162x8xf32> -> vector<162x8xf32>
    %16 = arith.addf %12, %15 : vector<162x8xf32>
    %c486 = arith.constant 486 : index
    %c0_13 = arith.constant 0 : index
    %17 = vector.load %arg0[%c486, %c0_13] : memref<664x4xbf16, #tpu.memory_space<vmem>>, vector<162x4xbf16>
    %c16 = arith.constant 16 : index
    %c0_14 = arith.constant 0 : index
    %18 = vector.load %arg1[%c16, %c0_14] : memref<36x8xbf16, #tpu.memory_space<vmem>>, vector<4x8xbf16>
    %cst_15 = arith.constant dense<0.000000e+00> : vector<162x8xf32>
    %19 = tpu.matmul %17, %18, %cst_15 {dimension_numbers = #tpu.dot_dimension_numbers<[1], [0], [0], [1], [0, 0, 1, 1], [], []>} : vector<162x4xbf16>, vector<4x8xbf16>, vector<162x8xf32> -> vector<162x8xf32>
    %20 = arith.addf %16, %19 : vector<162x8xf32>
    %c325 = arith.constant 325 : index
    %c0_16 = arith.constant 0 : index
    %21 = vector.load %arg0[%c325, %c0_16] : memref<664x4xbf16, #tpu.memory_space<vmem>>, vector<162x4xbf16>
    %c20 = arith.constant 20 : index
    %c0_17 = arith.constant 0 : index
    %22 = vector.load %arg1[%c20, %c0_17] : memref<36x8xbf16, #tpu.memory_space<vmem>>, vector<4x8xbf16>
    %cst_18 = arith.constant dense<0.000000e+00> : vector<162x8xf32>
    %23 = tpu.matmul %21, %22, %cst_18 {dimension_numbers = #tpu.dot_dimension_numbers<[1], [0], [0], [1], [0, 0, 1, 1], [], []>} : vector<162x4xbf16>, vector<4x8xbf16>, vector<162x8xf32> -> vector<162x8xf32>
    %24 = arith.addf %20, %23 : vector<162x8xf32>
    %c9 = arith.constant 9 : index
    %c0_19 = arith.constant 0 : index
    %25 = vector.load %arg0[%c9, %c0_19] : memref<664x4xbf16, #tpu.memory_space<vmem>>, vector<162x4xbf16>
    %c24 = arith.constant 24 : index
    %c0_20 = arith.constant 0 : index
    %26 = vector.load %arg1[%c24, %c0_20] : memref<36x8xbf16, #tpu.memory_space<vmem>>, vector<4x8xbf16>
    %cst_21 = arith.constant dense<0.000000e+00> : vector<162x8xf32>
    %27 = tpu.matmul %25, %26, %cst_21 {dimension_numbers = #tpu.dot_dimension_numbers<[1], [0], [0], [1], [0, 0, 1, 1], [], []>} : vector<162x4xbf16>, vector<4x8xbf16>, vector<162x8xf32> -> vector<162x8xf32>
    %28 = arith.addf %24, %27 : vector<162x8xf32>
    %c171 = arith.constant 171 : index
    %c0_22 = arith.constant 0 : index
    %29 = vector.load %arg0[%c171, %c0_22] : memref<664x4xbf16, #tpu.memory_space<vmem>>, vector<162x4xbf16>
    %c28 = arith.constant 28 : index
    %c0_23 = arith.constant 0 : index
    %30 = vector.load %arg1[%c28, %c0_23] : memref<36x8xbf16, #tpu.memory_space<vmem>>, vector<4x8xbf16>
    %cst_24 = arith.constant dense<0.000000e+00> : vector<162x8xf32>
    %31 = tpu.matmul %29, %30, %cst_24 {dimension_numbers = #tpu.dot_dimension_numbers<[1], [0], [0], [1], [0, 0, 1, 1], [], []>} : vector<162x4xbf16>, vector<4x8xbf16>, vector<162x8xf32> -> vector<162x8xf32>
    %32 = arith.addf %28, %31 : vector<162x8xf32>
    %c10 = arith.constant 10 : index
    %c0_25 = arith.constant 0 : index
    %33 = vector.load %arg0[%c10, %c0_25] : memref<664x4xbf16, #tpu.memory_space<vmem>>, vector<162x4xbf16>
    %c32 = arith.constant 32 : index
    %c0_26 = arith.constant 0 : index
    %34 = vector.load %arg1[%c32, %c0_26] : memref<36x8xbf16, #tpu.memory_space<vmem>>, vector<4x8xbf16>
    %cst_27 = arith.constant dense<0.000000e+00> : vector<162x8xf32>
    %35 = tpu.matmul %33, %34, %cst_27 {dimension_numbers = #tpu.dot_dimension_numbers<[1], [0], [0], [1], [0, 0, 1, 1], [], []>} : vector<162x4xbf16>, vector<4x8xbf16>, vector<162x8xf32> -> vector<162x8xf32>
    %36 = arith.addf %32, %35 : vector<162x8xf32>
    %c0_28 = arith.constant 0 : index
    %c0_29 = arith.constant 0 : index
    %37 = vector.load %arg4[%c0_28, %c0_29] : memref<1x8xf32, #tpu.memory_space<vmem>>, vector<1x8xf32>
    %38 = vector.broadcast %37 : vector<1x8xf32> to vector<162x8xf32>
    %39 = arith.addf %36, %38 : vector<162x8xf32>
    %cst_30 = arith.constant 0.000000e+00 : f32
    %40 = vector.broadcast %cst_30 : f32 to vector<162x8xf32>
    %41 = arith.maximumf %39, %40 : vector<162x8xf32>
    %c0_31 = arith.constant 0 : index
    %c0_32 = arith.constant 0 : index
    %42 = vector.load %arg7[%c0_31, %c0_32] : memref<162x8xf32, #tpu.memory_space<vmem>>, vector<162x8xf32>
    tpu.vector_store %arg7[%c0_31, %c0_32], %41 {strides = array<i32>} : memref<162x8xf32, #tpu.memory_space<vmem>>, vector<162x8xf32>,
    %cst_33 = arith.constant 0.000000e+00 : f32
    %43 = vector.broadcast %cst_33 : f32 to vector<208x8xf32>
    %c0_34 = arith.constant 0 : index
    %c0_35 = arith.constant 0 : index
    %44 = vector.load %arg10[%c0_34, %c0_35] : memref<208x8xf32, #tpu.memory_space<vmem>>, vector<208x8xf32>
    tpu.vector_store %arg10[%c0_34, %c0_35], %43 {strides = array<i32>} : memref<208x8xf32, #tpu.memory_space<vmem>>, vector<208x8xf32>,
    %c10_36 = arith.constant 10 : index
    %c0_37 = arith.constant 0 : index
    %45 = tpu.strided_load %arg7[%c10_36, %c0_37] {strides = array<i32: 2, 1>} : memref<162x8xf32, #tpu.memory_space<vmem>>, vector<4x8xf32>
    %c6 = arith.constant 6 : index
    %c0_38 = arith.constant 0 : index
    %46 = vector.load %arg10[%c6, %c0_38] : memref<208x8xf32, #tpu.memory_space<vmem>>, vector<4x8xf32>
    tpu.vector_store %arg10[%c6, %c0_38], %45 {strides = array<i32>} : memref<208x8xf32, #tpu.memory_space<vmem>>, vector<4x8xf32>,
    %c28_39 = arith.constant 28 : index
    %c0_40 = arith.constant 0 : index
    %47 = tpu.strided_load %arg7[%c28_39, %c0_40] {strides = array<i32: 2, 1>} : memref<162x8xf32, #tpu.memory_space<vmem>>, vector<4x8xf32>
    %c11 = arith.constant 11 : index
    %c0_41 = arith.constant 0 : index
    %48 = vector.load %arg10[%c11, %c0_41] : memref<208x8xf32, #tpu.memory_space<vmem>>, vector<4x8xf32>
    tpu.vector_store %arg10[%c11, %c0_41], %47 {strides = array<i32>} : memref<208x8xf32, #tpu.memory_space<vmem>>, vector<4x8xf32>,
    %c46 = arith.constant 46 : index
    %c0_42 = arith.constant 0 : index
    %49 = tpu.strided_load %arg7[%c46, %c0_42] {strides = array<i32: 2, 1>} : memref<162x8xf32, #tpu.memory_space<vmem>>, vector<4x8xf32>
    %c16_43 = arith.constant 16 : index
    %c0_44 = arith.constant 0 : index
    %50 = vector.load %arg10[%c16_43, %c0_44] : memref<208x8xf32, #tpu.memory_space<vmem>>, vector<4x8xf32>
    tpu.vector_store %arg10[%c16_43, %c0_44], %49 {strides = array<i32>} : memref<208x8xf32, #tpu.memory_space<vmem>>, vector<4x8xf32>,
    %c64 = arith.constant 64 : index
    %c0_45 = arith.constant 0 : index
    %51 = tpu.strided_load %arg7[%c64, %c0_45] {strides = array<i32: 2, 1>} : memref<162x8xf32, #tpu.memory_space<vmem>>, vector<4x8xf32>
    %c21 = arith.constant 21 : index
    %c0_46 = arith.constant 0 : index
    %52 = vector.load %arg10[%c21, %c0_46] : memref<208x8xf32, #tpu.memory_space<vmem>>, vector<4x8xf32>
    tpu.vector_store %arg10[%c21, %c0_46], %51 {strides = array<i32>} : memref<208x8xf32, #tpu.memory_space<vmem>>, vector<4x8xf32>,
    %c91 = arith.constant 91 : index
    %c0_47 = arith.constant 0 : index
    %53 = tpu.strided_load %arg7[%c91, %c0_47] {strides = array<i32: 2, 1>} : memref<162x8xf32, #tpu.memory_space<vmem>>, vector<4x8xf32>
    %c31 = arith.constant 31 : index
    %c0_48 = arith.constant 0 : index
    %54 = vector.load %arg10[%c31, %c0_48] : memref<208x8xf32, #tpu.memory_space<vmem>>, vector<4x8xf32>
    tpu.vector_store %arg10[%c31, %c0_48], %53 {strides = array<i32>} : memref<208x8xf32, #tpu.memory_space<vmem>>, vector<4x8xf32>,
    %c109 = arith.constant 109 : index
    %c0_49 = arith.constant 0 : index
    %55 = tpu.strided_load %arg7[%c109, %c0_49] {strides = array<i32: 2, 1>} : memref<162x8xf32, #tpu.memory_space<vmem>>, vector<4x8xf32>
    %c36 = arith.constant 36 : index
    %c0_50 = arith.constant 0 : index
    %56 = vector.load %arg10[%c36, %c0_50] : memref<208x8xf32, #tpu.memory_space<vmem>>, vector<4x8xf32>
    tpu.vector_store %arg10[%c36, %c0_50], %55 {strides = array<i32>} : memref<208x8xf32, #tpu.memory_space<vmem>>, vector<4x8xf32>,
    %c127 = arith.constant 127 : index
    %c0_51 = arith.constant 0 : index
    %57 = tpu.strided_load %arg7[%c127, %c0_51] {strides = array<i32: 2, 1>} : memref<162x8xf32, #tpu.memory_space<vmem>>, vector<4x8xf32>
    %c41 = arith.constant 41 : index
    %c0_52 = arith.constant 0 : index
    %58 = vector.load %arg10[%c41, %c0_52] : memref<208x8xf32, #tpu.memory_space<vmem>>, vector<4x8xf32>
    tpu.vector_store %arg10[%c41, %c0_52], %57 {strides = array<i32>} : memref<208x8xf32, #tpu.memory_space<vmem>>, vector<4x8xf32>,
    %c145 = arith.constant 145 : index
    %c0_53 = arith.constant 0 : index
    %59 = tpu.strided_load %arg7[%c145, %c0_53] {strides = array<i32: 2, 1>} : memref<162x8xf32, #tpu.memory_space<vmem>>, vector<4x8xf32>
    %c46_54 = arith.constant 46 : index
    %c0_55 = arith.constant 0 : index
    %60 = vector.load %arg10[%c46_54, %c0_55] : memref<208x8xf32, #tpu.memory_space<vmem>>, vector<4x8xf32>
    tpu.vector_store %arg10[%c46_54, %c0_55], %59 {strides = array<i32>} : memref<208x8xf32, #tpu.memory_space<vmem>>, vector<4x8xf32>,
    %c9_56 = arith.constant 9 : index
    %c0_57 = arith.constant 0 : index
    %61 = tpu.strided_load %arg7[%c9_56, %c0_57] {strides = array<i32: 2, 1>} : memref<162x8xf32, #tpu.memory_space<vmem>>, vector<4x8xf32>
    %c55 = arith.constant 55 : index
    %c0_58 = arith.constant 0 : index
    %62 = vector.load %arg10[%c55, %c0_58] : memref<208x8xf32, #tpu.memory_space<vmem>>, vector<4x8xf32>
    tpu.vector_store %arg10[%c55, %c0_58], %61 {strides = array<i32>} : memref<208x8xf32, #tpu.memory_space<vmem>>, vector<4x8xf32>,
    %c27 = arith.constant 27 : index
    %c0_59 = arith.constant 0 : index
    %63 = tpu.strided_load %arg7[%c27, %c0_59] {strides = array<i32: 2, 1>} : memref<162x8xf32, #tpu.memory_space<vmem>>, vector<4x8xf32>
    %c60 = arith.constant 60 : index
    %c0_60 = arith.constant 0 : index
    %64 = vector.load %arg10[%c60, %c0_60] : memref<208x8xf32, #tpu.memory_space<vmem>>, vector<4x8xf32>
    tpu.vector_store %arg10[%c60, %c0_60], %63 {strides = array<i32>} : memref<208x8xf32, #tpu.memory_space<vmem>>, vector<4x8xf32>,
    %c45 = arith.constant 45 : index
    %c0_61 = arith.constant 0 : index
    %65 = tpu.strided_load %arg7[%c45, %c0_61] {strides = array<i32: 2, 1>} : memref<162x8xf32, #tpu.memory_space<vmem>>, vector<4x8xf32>
    %c65 = arith.constant 65 : index
    %c0_62 = arith.constant 0 : index
    %66 = vector.load %arg10[%c65, %c0_62] : memref<208x8xf32, #tpu.memory_space<vmem>>, vector<4x8xf32>
    tpu.vector_store %arg10[%c65, %c0_62], %65 {strides = array<i32>} : memref<208x8xf32, #tpu.memory_space<vmem>>, vector<4x8xf32>,
    %c63 = arith.constant 63 : index
    %c0_63 = arith.constant 0 : index
    %67 = tpu.strided_load %arg7[%c63, %c0_63] {strides = array<i32: 2, 1>} : memref<162x8xf32, #tpu.memory_space<vmem>>, vector<4x8xf32>
    %c70 = arith.constant 70 : index
    %c0_64 = arith.constant 0 : index
    %68 = vector.load %arg10[%c70, %c0_64] : memref<208x8xf32, #tpu.memory_space<vmem>>, vector<4x8xf32>
    tpu.vector_store %arg10[%c70, %c0_64], %67 {strides = array<i32>} : memref<208x8xf32, #tpu.memory_space<vmem>>, vector<4x8xf32>,
    %c90 = arith.constant 90 : index
    %c0_65 = arith.constant 0 : index
    %69 = tpu.strided_load %arg7[%c90, %c0_65] {strides = array<i32: 2, 1>} : memref<162x8xf32, #tpu.memory_space<vmem>>, vector<4x8xf32>
    %c80 = arith.constant 80 : index
    %c0_66 = arith.constant 0 : index
    %70 = vector.load %arg10[%c80, %c0_66] : memref<208x8xf32, #tpu.memory_space<vmem>>, vector<4x8xf32>
    tpu.vector_store %arg10[%c80, %c0_66], %69 {strides = array<i32>} : memref<208x8xf32, #tpu.memory_space<vmem>>, vector<4x8xf32>,
    %c108 = arith.constant 108 : index
    %c0_67 = arith.constant 0 : index
    %71 = tpu.strided_load %arg7[%c108, %c0_67] {strides = array<i32: 2, 1>} : memref<162x8xf32, #tpu.memory_space<vmem>>, vector<4x8xf32>
    %c85 = arith.constant 85 : index
    %c0_68 = arith.constant 0 : index
    %72 = vector.load %arg10[%c85, %c0_68] : memref<208x8xf32, #tpu.memory_space<vmem>>, vector<4x8xf32>
    tpu.vector_store %arg10[%c85, %c0_68], %71 {strides = array<i32>} : memref<208x8xf32, #tpu.memory_space<vmem>>, vector<4x8xf32>,
    %c126 = arith.constant 126 : index
    %c0_69 = arith.constant 0 : index
    %73 = tpu.strided_load %arg7[%c126, %c0_69] {strides = array<i32: 2, 1>} : memref<162x8xf32, #tpu.memory_space<vmem>>, vector<4x8xf32>
    %c90_70 = arith.constant 90 : index
    %c0_71 = arith.constant 0 : index
    %74 = vector.load %arg10[%c90_70, %c0_71] : memref<208x8xf32, #tpu.memory_space<vmem>>, vector<4x8xf32>
    tpu.vector_store %arg10[%c90_70, %c0_71], %73 {strides = array<i32>} : memref<208x8xf32, #tpu.memory_space<vmem>>, vector<4x8xf32>,
    %c144 = arith.constant 144 : index
    %c0_72 = arith.constant 0 : index
    %75 = tpu.strided_load %arg7[%c144, %c0_72] {strides = array<i32: 2, 1>} : memref<162x8xf32, #tpu.memory_space<vmem>>, vector<4x8xf32>
    %c95 = arith.constant 95 : index
    %c0_73 = arith.constant 0 : index
    %76 = vector.load %arg10[%c95, %c0_73] : memref<208x8xf32, #tpu.memory_space<vmem>>, vector<4x8xf32>
    tpu.vector_store %arg10[%c95, %c0_73], %75 {strides = array<i32>} : memref<208x8xf32, #tpu.memory_space<vmem>>, vector<4x8xf32>,
    %c1_74 = arith.constant 1 : index
    %c0_75 = arith.constant 0 : index
    %77 = tpu.strided_load %arg7[%c1_74, %c0_75] {strides = array<i32: 2, 1>} : memref<162x8xf32, #tpu.memory_space<vmem>>, vector<4x8xf32>
    %c101 = arith.constant 101 : index
    %c0_76 = arith.constant 0 : index
    %78 = vector.load %arg10[%c101, %c0_76] : memref<208x8xf32, #tpu.memory_space<vmem>>, vector<4x8xf32>
    tpu.vector_store %arg10[%c101, %c0_76], %77 {strides = array<i32>} : memref<208x8xf32, #tpu.memory_space<vmem>>, vector<4x8xf32>,
    %c19 = arith.constant 19 : index
    %c0_77 = arith.constant 0 : index
    %79 = tpu.strided_load %arg7[%c19, %c0_77] {strides = array<i32: 2, 1>} : memref<162x8xf32, #tpu.memory_space<vmem>>, vector<4x8xf32>
    %c106 = arith.constant 106 : index
    %c0_78 = arith.constant 0 : index
    %80 = vector.load %arg10[%c106, %c0_78] : memref<208x8xf32, #tpu.memory_space<vmem>>, vector<4x8xf32>
    tpu.vector_store %arg10[%c106, %c0_78], %79 {strides = array<i32>} : memref<208x8xf32, #tpu.memory_space<vmem>>, vector<4x8xf32>,
    %c37 = arith.constant 37 : index
    %c0_79 = arith.constant 0 : index
    %81 = tpu.strided_load %arg7[%c37, %c0_79] {strides = array<i32: 2, 1>} : memref<162x8xf32, #tpu.memory_space<vmem>>, vector<4x8xf32>
    %c111 = arith.constant 111 : index
    %c0_80 = arith.constant 0 : index
    %82 = vector.load %arg10[%c111, %c0_80] : memref<208x8xf32, #tpu.memory_space<vmem>>, vector<4x8xf32>
    tpu.vector_store %arg10[%c111, %c0_80], %81 {strides = array<i32>} : memref<208x8xf32, #tpu.memory_space<vmem>>, vector<4x8xf32>,
    %c55_81 = arith.constant 55 : index
    %c0_82 = arith.constant 0 : index
    %83 = tpu.strided_load %arg7[%c55_81, %c0_82] {strides = array<i32: 2, 1>} : memref<162x8xf32, #tpu.memory_space<vmem>>, vector<4x8xf32>
    %c116 = arith.constant 116 : index
    %c0_83 = arith.constant 0 : index
    %84 = vector.load %arg10[%c116, %c0_83] : memref<208x8xf32, #tpu.memory_space<vmem>>, vector<4x8xf32>
    tpu.vector_store %arg10[%c116, %c0_83], %83 {strides = array<i32>} : memref<208x8xf32, #tpu.memory_space<vmem>>, vector<4x8xf32>,
    %c82 = arith.constant 82 : index
    %c0_84 = arith.constant 0 : index
    %85 = tpu.strided_load %arg7[%c82, %c0_84] {strides = array<i32: 2, 1>} : memref<162x8xf32, #tpu.memory_space<vmem>>, vector<4x8xf32>
    %c126_85 = arith.constant 126 : index
    %c0_86 = arith.constant 0 : index
    %86 = vector.load %arg10[%c126_85, %c0_86] : memref<208x8xf32, #tpu.memory_space<vmem>>, vector<4x8xf32>
    tpu.vector_store %arg10[%c126_85, %c0_86], %85 {strides = array<i32>} : memref<208x8xf32, #tpu.memory_space<vmem>>, vector<4x8xf32>,
    %c100 = arith.constant 100 : index
    %c0_87 = arith.constant 0 : index
    %87 = tpu.strided_load %arg7[%c100, %c0_87] {strides = array<i32: 2, 1>} : memref<162x8xf32, #tpu.memory_space<vmem>>, vector<4x8xf32>
    %c131 = arith.constant 131 : index
    %c0_88 = arith.constant 0 : index
    %88 = vector.load %arg10[%c131, %c0_88] : memref<208x8xf32, #tpu.memory_space<vmem>>, vector<4x8xf32>
    tpu.vector_store %arg10[%c131, %c0_88], %87 {strides = array<i32>} : memref<208x8xf32, #tpu.memory_space<vmem>>, vector<4x8xf32>,
    %c118 = arith.constant 118 : index
    %c0_89 = arith.constant 0 : index
    %89 = tpu.strided_load %arg7[%c118, %c0_89] {strides = array<i32: 2, 1>} : memref<162x8xf32, #tpu.memory_space<vmem>>, vector<4x8xf32>
    %c136 = arith.constant 136 : index
    %c0_90 = arith.constant 0 : index
    %90 = vector.load %arg10[%c136, %c0_90] : memref<208x8xf32, #tpu.memory_space<vmem>>, vector<4x8xf32>
    tpu.vector_store %arg10[%c136, %c0_90], %89 {strides = array<i32>} : memref<208x8xf32, #tpu.memory_space<vmem>>, vector<4x8xf32>,
    %c136_91 = arith.constant 136 : index
    %c0_92 = arith.constant 0 : index
    %91 = tpu.strided_load %arg7[%c136_91, %c0_92] {strides = array<i32: 2, 1>} : memref<162x8xf32, #tpu.memory_space<vmem>>, vector<4x8xf32>
    %c141 = arith.constant 141 : index
    %c0_93 = arith.constant 0 : index
    %92 = vector.load %arg10[%c141, %c0_93] : memref<208x8xf32, #tpu.memory_space<vmem>>, vector<4x8xf32>
    tpu.vector_store %arg10[%c141, %c0_93], %91 {strides = array<i32>} : memref<208x8xf32, #tpu.memory_space<vmem>>, vector<4x8xf32>,
    %c0_94 = arith.constant 0 : index
    %c0_95 = arith.constant 0 : index
    %93 = tpu.strided_load %arg7[%c0_94, %c0_95] {strides = array<i32: 2, 1>} : memref<162x8xf32, #tpu.memory_space<vmem>>, vector<4x8xf32>
    %c150 = arith.constant 150 : index
    %c0_96 = arith.constant 0 : index
    %94 = vector.load %arg10[%c150, %c0_96] : memref<208x8xf32, #tpu.memory_space<vmem>>, vector<4x8xf32>
    tpu.vector_store %arg10[%c150, %c0_96], %93 {strides = array<i32>} : memref<208x8xf32, #tpu.memory_space<vmem>>, vector<4x8xf32>,
    %c18 = arith.constant 18 : index
    %c0_97 = arith.constant 0 : index
    %95 = tpu.strided_load %arg7[%c18, %c0_97] {strides = array<i32: 2, 1>} : memref<162x8xf32, #tpu.memory_space<vmem>>, vector<4x8xf32>
    %c155 = arith.constant 155 : index
    %c0_98 = arith.constant 0 : index
    %96 = vector.load %arg10[%c155, %c0_98] : memref<208x8xf32, #tpu.memory_space<vmem>>, vector<4x8xf32>
    tpu.vector_store %arg10[%c155, %c0_98], %95 {strides = array<i32>} : memref<208x8xf32, #tpu.memory_space<vmem>>, vector<4x8xf32>,
    %c36_99 = arith.constant 36 : index
    %c0_100 = arith.constant 0 : index
    %97 = tpu.strided_load %arg7[%c36_99, %c0_100] {strides = array<i32: 2, 1>} : memref<162x8xf32, #tpu.memory_space<vmem>>, vector<4x8xf32>
    %c160 = arith.constant 160 : index
    %c0_101 = arith.constant 0 : index
    %98 = vector.load %arg10[%c160, %c0_101] : memref<208x8xf32, #tpu.memory_space<vmem>>, vector<4x8xf32>
    tpu.vector_store %arg10[%c160, %c0_101], %97 {strides = array<i32>} : memref<208x8xf32, #tpu.memory_space<vmem>>, vector<4x8xf32>,
    %c54 = arith.constant 54 : index
    %c0_102 = arith.constant 0 : index
    %99 = tpu.strided_load %arg7[%c54, %c0_102] {strides = array<i32: 2, 1>} : memref<162x8xf32, #tpu.memory_space<vmem>>, vector<4x8xf32>
    %c165 = arith.constant 165 : index
    %c0_103 = arith.constant 0 : index
    %100 = vector.load %arg10[%c165, %c0_103] : memref<208x8xf32, #tpu.memory_space<vmem>>, vector<4x8xf32>
    tpu.vector_store %arg10[%c165, %c0_103], %99 {strides = array<i32>} : memref<208x8xf32, #tpu.memory_space<vmem>>, vector<4x8xf32>,
    %c81 = arith.constant 81 : index
    %c0_104 = arith.constant 0 : index
    %101 = tpu.strided_load %arg7[%c81, %c0_104] {strides = array<i32: 2, 1>} : memref<162x8xf32, #tpu.memory_space<vmem>>, vector<4x8xf32>
    %c175 = arith.constant 175 : index
    %c0_105 = arith.constant 0 : index
    %102 = vector.load %arg10[%c175, %c0_105] : memref<208x8xf32, #tpu.memory_space<vmem>>, vector<4x8xf32>
    tpu.vector_store %arg10[%c175, %c0_105], %101 {strides = array<i32>} : memref<208x8xf32, #tpu.memory_space<vmem>>, vector<4x8xf32>,
    %c99 = arith.constant 99 : index
    %c0_106 = arith.constant 0 : index
    %103 = tpu.strided_load %arg7[%c99, %c0_106] {strides = array<i32: 2, 1>} : memref<162x8xf32, #tpu.memory_space<vmem>>, vector<4x8xf32>
    %c180 = arith.constant 180 : index
    %c0_107 = arith.constant 0 : index
    %104 = vector.load %arg10[%c180, %c0_107] : memref<208x8xf32, #tpu.memory_space<vmem>>, vector<4x8xf32>
    tpu.vector_store %arg10[%c180, %c0_107], %103 {strides = array<i32>} : memref<208x8xf32, #tpu.memory_space<vmem>>, vector<4x8xf32>,
    %c117 = arith.constant 117 : index
    %c0_108 = arith.constant 0 : index
    %105 = tpu.strided_load %arg7[%c117, %c0_108] {strides = array<i32: 2, 1>} : memref<162x8xf32, #tpu.memory_space<vmem>>, vector<4x8xf32>
    %c185 = arith.constant 185 : index
    %c0_109 = arith.constant 0 : index
    %106 = vector.load %arg10[%c185, %c0_109] : memref<208x8xf32, #tpu.memory_space<vmem>>, vector<4x8xf32>
    tpu.vector_store %arg10[%c185, %c0_109], %105 {strides = array<i32>} : memref<208x8xf32, #tpu.memory_space<vmem>>, vector<4x8xf32>,
    %c135 = arith.constant 135 : index
    %c0_110 = arith.constant 0 : index
    %107 = tpu.strided_load %arg7[%c135, %c0_110] {strides = array<i32: 2, 1>} : memref<162x8xf32, #tpu.memory_space<vmem>>, vector<4x8xf32>
    %c190 = arith.constant 190 : index
    %c0_111 = arith.constant 0 : index
    %108 = vector.load %arg10[%c190, %c0_111] : memref<208x8xf32, #tpu.memory_space<vmem>>, vector<4x8xf32>
    tpu.vector_store %arg10[%c190, %c0_111], %107 {strides = array<i32>} : memref<208x8xf32, #tpu.memory_space<vmem>>, vector<4x8xf32>,
    %cst_112 = arith.constant 0.000000e+00 : f32
    %109 = vector.broadcast %cst_112 : f32 to vector<50x16xf32>
    %c0_113 = arith.constant 0 : index
    %c0_114 = arith.constant 0 : index
    %110 = vector.load %arg10[%c0_113, %c0_114] : memref<208x8xf32, #tpu.memory_space<vmem>>, vector<50x8xf32>
    %111 = arith.truncf %110 : vector<50x8xf32> to vector<50x8xbf16>
    %c0_115 = arith.constant 0 : index
    %c0_116 = arith.constant 0 : index
    %112 = vector.load %arg2[%c0_115, %c0_116] : memref<72x16xbf16, #tpu.memory_space<vmem>>, vector<8x16xbf16>
    %cst_117 = arith.constant dense<0.000000e+00> : vector<50x16xf32>
    %113 = tpu.matmul %111, %112, %cst_117 {dimension_numbers = #tpu.dot_dimension_numbers<[1], [0], [0], [1], [0, 0, 1, 1], [], []>} : vector<50x8xbf16>, vector<8x16xbf16>, vector<50x16xf32> -> vector<50x16xf32>
    %114 = arith.addf %109, %113 : vector<50x16xf32>
    %c50 = arith.constant 50 : index
    %c0_118 = arith.constant 0 : index
    %115 = vector.load %arg10[%c50, %c0_118] : memref<208x8xf32, #tpu.memory_space<vmem>>, vector<50x8xf32>
    %116 = arith.truncf %115 : vector<50x8xf32> to vector<50x8xbf16>
    %c8_119 = arith.constant 8 : index
    %c0_120 = arith.constant 0 : index
    %117 = vector.load %arg2[%c8_119, %c0_120] : memref<72x16xbf16, #tpu.memory_space<vmem>>, vector<8x16xbf16>
    %cst_121 = arith.constant dense<0.000000e+00> : vector<50x16xf32>
    %118 = tpu.matmul %116, %117, %cst_121 {dimension_numbers = #tpu.dot_dimension_numbers<[1], [0], [0], [1], [0, 0, 1, 1], [], []>} : vector<50x8xbf16>, vector<8x16xbf16>, vector<50x16xf32> -> vector<50x16xf32>
    %119 = arith.addf %114, %118 : vector<50x16xf32>
    %c1_122 = arith.constant 1 : index
    %c0_123 = arith.constant 0 : index
    %120 = vector.load %arg10[%c1_122, %c0_123] : memref<208x8xf32, #tpu.memory_space<vmem>>, vector<50x8xf32>
    %121 = arith.truncf %120 : vector<50x8xf32> to vector<50x8xbf16>
    %c16_124 = arith.constant 16 : index
    %c0_125 = arith.constant 0 : index
    %122 = vector.load %arg2[%c16_124, %c0_125] : memref<72x16xbf16, #tpu.memory_space<vmem>>, vector<8x16xbf16>
    %cst_126 = arith.constant dense<0.000000e+00> : vector<50x16xf32>
    %123 = tpu.matmul %121, %122, %cst_126 {dimension_numbers = #tpu.dot_dimension_numbers<[1], [0], [0], [1], [0, 0, 1, 1], [], []>} : vector<50x8xbf16>, vector<8x16xbf16>, vector<50x16xf32> -> vector<50x16xf32>
    %124 = arith.addf %119, %123 : vector<50x16xf32>
    %c100_127 = arith.constant 100 : index
    %c0_128 = arith.constant 0 : index
    %125 = vector.load %arg10[%c100_127, %c0_128] : memref<208x8xf32, #tpu.memory_space<vmem>>, vector<50x8xf32>
    %126 = arith.truncf %125 : vector<50x8xf32> to vector<50x8xbf16>
    %c24_129 = arith.constant 24 : index
    %c0_130 = arith.constant 0 : index
    %127 = vector.load %arg2[%c24_129, %c0_130] : memref<72x16xbf16, #tpu.memory_space<vmem>>, vector<8x16xbf16>
    %cst_131 = arith.constant dense<0.000000e+00> : vector<50x16xf32>
    %128 = tpu.matmul %126, %127, %cst_131 {dimension_numbers = #tpu.dot_dimension_numbers<[1], [0], [0], [1], [0, 0, 1, 1], [], []>} : vector<50x8xbf16>, vector<8x16xbf16>, vector<50x16xf32> -> vector<50x16xf32>
    %129 = arith.addf %124, %128 : vector<50x16xf32>
    %c150_132 = arith.constant 150 : index
    %c0_133 = arith.constant 0 : index
    %130 = vector.load %arg10[%c150_132, %c0_133] : memref<208x8xf32, #tpu.memory_space<vmem>>, vector<50x8xf32>
    %131 = arith.truncf %130 : vector<50x8xf32> to vector<50x8xbf16>
    %c32_134 = arith.constant 32 : index
    %c0_135 = arith.constant 0 : index
    %132 = vector.load %arg2[%c32_134, %c0_135] : memref<72x16xbf16, #tpu.memory_space<vmem>>, vector<8x16xbf16>
    %cst_136 = arith.constant dense<0.000000e+00> : vector<50x16xf32>
    %133 = tpu.matmul %131, %132, %cst_136 {dimension_numbers = #tpu.dot_dimension_numbers<[1], [0], [0], [1], [0, 0, 1, 1], [], []>} : vector<50x8xbf16>, vector<8x16xbf16>, vector<50x16xf32> -> vector<50x16xf32>
    %134 = arith.addf %129, %133 : vector<50x16xf32>
    %c101_137 = arith.constant 101 : index
    %c0_138 = arith.constant 0 : index
    %135 = vector.load %arg10[%c101_137, %c0_138] : memref<208x8xf32, #tpu.memory_space<vmem>>, vector<50x8xf32>
    %136 = arith.truncf %135 : vector<50x8xf32> to vector<50x8xbf16>
    %c40 = arith.constant 40 : index
    %c0_139 = arith.constant 0 : index
    %137 = vector.load %arg2[%c40, %c0_139] : memref<72x16xbf16, #tpu.memory_space<vmem>>, vector<8x16xbf16>
    %cst_140 = arith.constant dense<0.000000e+00> : vector<50x16xf32>
    %138 = tpu.matmul %136, %137, %cst_140 {dimension_numbers = #tpu.dot_dimension_numbers<[1], [0], [0], [1], [0, 0, 1, 1], [], []>} : vector<50x8xbf16>, vector<8x16xbf16>, vector<50x16xf32> -> vector<50x16xf32>
    %139 = arith.addf %134, %138 : vector<50x16xf32>
    %c5 = arith.constant 5 : index
    %c0_141 = arith.constant 0 : index
    %140 = vector.load %arg10[%c5, %c0_141] : memref<208x8xf32, #tpu.memory_space<vmem>>, vector<50x8xf32>
    %141 = arith.truncf %140 : vector<50x8xf32> to vector<50x8xbf16>
    %c48 = arith.constant 48 : index
    %c0_142 = arith.constant 0 : index
    %142 = vector.load %arg2[%c48, %c0_142] : memref<72x16xbf16, #tpu.memory_space<vmem>>, vector<8x16xbf16>
    %cst_143 = arith.constant dense<0.000000e+00> : vector<50x16xf32>
    %143 = tpu.matmul %141, %142, %cst_143 {dimension_numbers = #tpu.dot_dimension_numbers<[1], [0], [0], [1], [0, 0, 1, 1], [], []>} : vector<50x8xbf16>, vector<8x16xbf16>, vector<50x16xf32> -> vector<50x16xf32>
    %144 = arith.addf %139, %143 : vector<50x16xf32>
    %c55_144 = arith.constant 55 : index
    %c0_145 = arith.constant 0 : index
    %145 = vector.load %arg10[%c55_144, %c0_145] : memref<208x8xf32, #tpu.memory_space<vmem>>, vector<50x8xf32>
    %146 = arith.truncf %145 : vector<50x8xf32> to vector<50x8xbf16>
    %c56 = arith.constant 56 : index
    %c0_146 = arith.constant 0 : index
    %147 = vector.load %arg2[%c56, %c0_146] : memref<72x16xbf16, #tpu.memory_space<vmem>>, vector<8x16xbf16>
    %cst_147 = arith.constant dense<0.000000e+00> : vector<50x16xf32>
    %148 = tpu.matmul %146, %147, %cst_147 {dimension_numbers = #tpu.dot_dimension_numbers<[1], [0], [0], [1], [0, 0, 1, 1], [], []>} : vector<50x8xbf16>, vector<8x16xbf16>, vector<50x16xf32> -> vector<50x16xf32>
    %149 = arith.addf %144, %148 : vector<50x16xf32>
    %c6_148 = arith.constant 6 : index
    %c0_149 = arith.constant 0 : index
    %150 = vector.load %arg10[%c6_148, %c0_149] : memref<208x8xf32, #tpu.memory_space<vmem>>, vector<50x8xf32>
    %151 = arith.truncf %150 : vector<50x8xf32> to vector<50x8xbf16>
    %c64_150 = arith.constant 64 : index
    %c0_151 = arith.constant 0 : index
    %152 = vector.load %arg2[%c64_150, %c0_151] : memref<72x16xbf16, #tpu.memory_space<vmem>>, vector<8x16xbf16>
    %cst_152 = arith.constant dense<0.000000e+00> : vector<50x16xf32>
    %153 = tpu.matmul %151, %152, %cst_152 {dimension_numbers = #tpu.dot_dimension_numbers<[1], [0], [0], [1], [0, 0, 1, 1], [], []>} : vector<50x8xbf16>, vector<8x16xbf16>, vector<50x16xf32> -> vector<50x16xf32>
    %154 = arith.addf %149, %153 : vector<50x16xf32>
    %c0_153 = arith.constant 0 : index
    %c0_154 = arith.constant 0 : index
    %155 = vector.load %arg5[%c0_153, %c0_154] : memref<1x16xf32, #tpu.memory_space<vmem>>, vector<1x16xf32>
    %156 = vector.broadcast %155 : vector<1x16xf32> to vector<50x16xf32>
    %157 = arith.addf %154, %156 : vector<50x16xf32>
    %cst_155 = arith.constant 0.000000e+00 : f32
    %158 = vector.broadcast %cst_155 : f32 to vector<50x16xf32>
    %159 = arith.maximumf %157, %158 : vector<50x16xf32>
    %c0_156 = arith.constant 0 : index
    %c0_157 = arith.constant 0 : index
    %160 = vector.load %arg8[%c0_156, %c0_157] : memref<50x16xf32, #tpu.memory_space<vmem>>, vector<50x16xf32>
    tpu.vector_store %arg8[%c0_156, %c0_157], %159 {strides = array<i32>} : memref<50x16xf32, #tpu.memory_space<vmem>>, vector<50x16xf32>,
    %cst_158 = arith.constant 0.000000e+00 : f32
    %161 = vector.broadcast %cst_158 : f32 to vector<80x16xf32>
    %c0_159 = arith.constant 0 : index
    %c0_160 = arith.constant 0 : index
    %162 = vector.load %arg11[%c0_159, %c0_160] : memref<80x16xf32, #tpu.memory_space<vmem>>, vector<80x16xf32>
    tpu.vector_store %arg11[%c0_159, %c0_160], %161 {strides = array<i32>} : memref<80x16xf32, #tpu.memory_space<vmem>>, vector<80x16xf32>,
    %c6_161 = arith.constant 6 : index
    %c0_162 = arith.constant 0 : index
    %163 = tpu.strided_load %arg8[%c6_161, %c0_162] {strides = array<i32: 2, 1>} : memref<50x16xf32, #tpu.memory_space<vmem>>, vector<2x16xf32>
    %c4_163 = arith.constant 4 : index
    %c0_164 = arith.constant 0 : index
    %164 = vector.load %arg11[%c4_163, %c0_164] : memref<80x16xf32, #tpu.memory_space<vmem>>, vector<2x16xf32>
    tpu.vector_store %arg11[%c4_163, %c0_164], %163 {strides = array<i32>} : memref<80x16xf32, #tpu.memory_space<vmem>>, vector<2x16xf32>,
    %c16_165 = arith.constant 16 : index
    %c0_166 = arith.constant 0 : index
    %165 = tpu.strided_load %arg8[%c16_165, %c0_166] {strides = array<i32: 2, 1>} : memref<50x16xf32, #tpu.memory_space<vmem>>, vector<2x16xf32>
    %c7 = arith.constant 7 : index
    %c0_167 = arith.constant 0 : index
    %166 = vector.load %arg11[%c7, %c0_167] : memref<80x16xf32, #tpu.memory_space<vmem>>, vector<2x16xf32>
    tpu.vector_store %arg11[%c7, %c0_167], %165 {strides = array<i32>} : memref<80x16xf32, #tpu.memory_space<vmem>>, vector<2x16xf32>,
    %c31_168 = arith.constant 31 : index
    %c0_169 = arith.constant 0 : index
    %167 = tpu.strided_load %arg8[%c31_168, %c0_169] {strides = array<i32: 2, 1>} : memref<50x16xf32, #tpu.memory_space<vmem>>, vector<2x16xf32>
    %c13 = arith.constant 13 : index
    %c0_170 = arith.constant 0 : index
    %168 = vector.load %arg11[%c13, %c0_170] : memref<80x16xf32, #tpu.memory_space<vmem>>, vector<2x16xf32>
    tpu.vector_store %arg11[%c13, %c0_170], %167 {strides = array<i32>} : memref<80x16xf32, #tpu.memory_space<vmem>>, vector<2x16xf32>,
    %c41_171 = arith.constant 41 : index
    %c0_172 = arith.constant 0 : index
    %169 = tpu.strided_load %arg8[%c41_171, %c0_172] {strides = array<i32: 2, 1>} : memref<50x16xf32, #tpu.memory_space<vmem>>, vector<2x16xf32>
    %c16_173 = arith.constant 16 : index
    %c0_174 = arith.constant 0 : index
    %170 = vector.load %arg11[%c16_173, %c0_174] : memref<80x16xf32, #tpu.memory_space<vmem>>, vector<2x16xf32>
    tpu.vector_store %arg11[%c16_173, %c0_174], %169 {strides = array<i32>} : memref<80x16xf32, #tpu.memory_space<vmem>>, vector<2x16xf32>,
    %c5_175 = arith.constant 5 : index
    %c0_176 = arith.constant 0 : index
    %171 = tpu.strided_load %arg8[%c5_175, %c0_176] {strides = array<i32: 2, 1>} : memref<50x16xf32, #tpu.memory_space<vmem>>, vector<2x16xf32>
    %c21_177 = arith.constant 21 : index
    %c0_178 = arith.constant 0 : index
    %172 = vector.load %arg11[%c21_177, %c0_178] : memref<80x16xf32, #tpu.memory_space<vmem>>, vector<2x16xf32>
    tpu.vector_store %arg11[%c21_177, %c0_178], %171 {strides = array<i32>} : memref<80x16xf32, #tpu.memory_space<vmem>>, vector<2x16xf32>,
    %c15 = arith.constant 15 : index
    %c0_179 = arith.constant 0 : index
    %173 = tpu.strided_load %arg8[%c15, %c0_179] {strides = array<i32: 2, 1>} : memref<50x16xf32, #tpu.memory_space<vmem>>, vector<2x16xf32>
    %c24_180 = arith.constant 24 : index
    %c0_181 = arith.constant 0 : index
    %174 = vector.load %arg11[%c24_180, %c0_181] : memref<80x16xf32, #tpu.memory_space<vmem>>, vector<2x16xf32>
    tpu.vector_store %arg11[%c24_180, %c0_181], %173 {strides = array<i32>} : memref<80x16xf32, #tpu.memory_space<vmem>>, vector<2x16xf32>,
    %c30 = arith.constant 30 : index
    %c0_182 = arith.constant 0 : index
    %175 = tpu.strided_load %arg8[%c30, %c0_182] {strides = array<i32: 2, 1>} : memref<50x16xf32, #tpu.memory_space<vmem>>, vector<2x16xf32>
    %c30_183 = arith.constant 30 : index
    %c0_184 = arith.constant 0 : index
    %176 = vector.load %arg11[%c30_183, %c0_184] : memref<80x16xf32, #tpu.memory_space<vmem>>, vector<2x16xf32>
    tpu.vector_store %arg11[%c30_183, %c0_184], %175 {strides = array<i32>} : memref<80x16xf32, #tpu.memory_space<vmem>>, vector<2x16xf32>,
    %c40_185 = arith.constant 40 : index
    %c0_186 = arith.constant 0 : index
    %177 = tpu.strided_load %arg8[%c40_185, %c0_186] {strides = array<i32: 2, 1>} : memref<50x16xf32, #tpu.memory_space<vmem>>, vector<2x16xf32>
    %c33 = arith.constant 33 : index
    %c0_187 = arith.constant 0 : index
    %178 = vector.load %arg11[%c33, %c0_187] : memref<80x16xf32, #tpu.memory_space<vmem>>, vector<2x16xf32>
    tpu.vector_store %arg11[%c33, %c0_187], %177 {strides = array<i32>} : memref<80x16xf32, #tpu.memory_space<vmem>>, vector<2x16xf32>,
    %c1_188 = arith.constant 1 : index
    %c0_189 = arith.constant 0 : index
    %179 = tpu.strided_load %arg8[%c1_188, %c0_189] {strides = array<i32: 2, 1>} : memref<50x16xf32, #tpu.memory_space<vmem>>, vector<2x16xf32>
    %c37_190 = arith.constant 37 : index
    %c0_191 = arith.constant 0 : index
    %180 = vector.load %arg11[%c37_190, %c0_191] : memref<80x16xf32, #tpu.memory_space<vmem>>, vector<2x16xf32>
    tpu.vector_store %arg11[%c37_190, %c0_191], %179 {strides = array<i32>} : memref<80x16xf32, #tpu.memory_space<vmem>>, vector<2x16xf32>,
    %c11_192 = arith.constant 11 : index
    %c0_193 = arith.constant 0 : index
    %181 = tpu.strided_load %arg8[%c11_192, %c0_193] {strides = array<i32: 2, 1>} : memref<50x16xf32, #tpu.memory_space<vmem>>, vector<2x16xf32>
    %c40_194 = arith.constant 40 : index
    %c0_195 = arith.constant 0 : index
    %182 = vector.load %arg11[%c40_194, %c0_195] : memref<80x16xf32, #tpu.memory_space<vmem>>, vector<2x16xf32>
    tpu.vector_store %arg11[%c40_194, %c0_195], %181 {strides = array<i32>} : memref<80x16xf32, #tpu.memory_space<vmem>>, vector<2x16xf32>,
    %c26 = arith.constant 26 : index
    %c0_196 = arith.constant 0 : index
    %183 = tpu.strided_load %arg8[%c26, %c0_196] {strides = array<i32: 2, 1>} : memref<50x16xf32, #tpu.memory_space<vmem>>, vector<2x16xf32>
    %c46_197 = arith.constant 46 : index
    %c0_198 = arith.constant 0 : index
    %184 = vector.load %arg11[%c46_197, %c0_198] : memref<80x16xf32, #tpu.memory_space<vmem>>, vector<2x16xf32>
    tpu.vector_store %arg11[%c46_197, %c0_198], %183 {strides = array<i32>} : memref<80x16xf32, #tpu.memory_space<vmem>>, vector<2x16xf32>,
    %c36_199 = arith.constant 36 : index
    %c0_200 = arith.constant 0 : index
    %185 = tpu.strided_load %arg8[%c36_199, %c0_200] {strides = array<i32: 2, 1>} : memref<50x16xf32, #tpu.memory_space<vmem>>, vector<2x16xf32>
    %c49 = arith.constant 49 : index
    %c0_201 = arith.constant 0 : index
    %186 = vector.load %arg11[%c49, %c0_201] : memref<80x16xf32, #tpu.memory_space<vmem>>, vector<2x16xf32>
    tpu.vector_store %arg11[%c49, %c0_201], %185 {strides = array<i32>} : memref<80x16xf32, #tpu.memory_space<vmem>>, vector<2x16xf32>,
    %c0_202 = arith.constant 0 : index
    %c0_203 = arith.constant 0 : index
    %187 = tpu.strided_load %arg8[%c0_202, %c0_203] {strides = array<i32: 2, 1>} : memref<50x16xf32, #tpu.memory_space<vmem>>, vector<2x16xf32>
    %c54_204 = arith.constant 54 : index
    %c0_205 = arith.constant 0 : index
    %188 = vector.load %arg11[%c54_204, %c0_205] : memref<80x16xf32, #tpu.memory_space<vmem>>, vector<2x16xf32>
    tpu.vector_store %arg11[%c54_204, %c0_205], %187 {strides = array<i32>} : memref<80x16xf32, #tpu.memory_space<vmem>>, vector<2x16xf32>,
    %c10_206 = arith.constant 10 : index
    %c0_207 = arith.constant 0 : index
    %189 = tpu.strided_load %arg8[%c10_206, %c0_207] {strides = array<i32: 2, 1>} : memref<50x16xf32, #tpu.memory_space<vmem>>, vector<2x16xf32>
    %c57 = arith.constant 57 : index
    %c0_208 = arith.constant 0 : index
    %190 = vector.load %arg11[%c57, %c0_208] : memref<80x16xf32, #tpu.memory_space<vmem>>, vector<2x16xf32>
    tpu.vector_store %arg11[%c57, %c0_208], %189 {strides = array<i32>} : memref<80x16xf32, #tpu.memory_space<vmem>>, vector<2x16xf32>,
    %c25 = arith.constant 25 : index
    %c0_209 = arith.constant 0 : index
    %191 = tpu.strided_load %arg8[%c25, %c0_209] {strides = array<i32: 2, 1>} : memref<50x16xf32, #tpu.memory_space<vmem>>, vector<2x16xf32>
    %c63_210 = arith.constant 63 : index
    %c0_211 = arith.constant 0 : index
    %192 = vector.load %arg11[%c63_210, %c0_211] : memref<80x16xf32, #tpu.memory_space<vmem>>, vector<2x16xf32>
    tpu.vector_store %arg11[%c63_210, %c0_211], %191 {strides = array<i32>} : memref<80x16xf32, #tpu.memory_space<vmem>>, vector<2x16xf32>,
    %c35 = arith.constant 35 : index
    %c0_212 = arith.constant 0 : index
    %193 = tpu.strided_load %arg8[%c35, %c0_212] {strides = array<i32: 2, 1>} : memref<50x16xf32, #tpu.memory_space<vmem>>, vector<2x16xf32>
    %c66 = arith.constant 66 : index
    %c0_213 = arith.constant 0 : index
    %194 = vector.load %arg11[%c66, %c0_213] : memref<80x16xf32, #tpu.memory_space<vmem>>, vector<2x16xf32>
    tpu.vector_store %arg11[%c66, %c0_213], %193 {strides = array<i32>} : memref<80x16xf32, #tpu.memory_space<vmem>>, vector<2x16xf32>,
    %cst_214 = arith.constant 0.000000e+00 : f32
    %195 = vector.broadcast %cst_214 : f32 to vector<18x32xf32>
    %c0_215 = arith.constant 0 : index
    %c0_216 = arith.constant 0 : index
    %196 = vector.load %arg11[%c0_215, %c0_216] : memref<80x16xf32, #tpu.memory_space<vmem>>, vector<18x16xf32>
    %197 = arith.truncf %196 : vector<18x16xf32> to vector<18x16xbf16>
    %c0_217 = arith.constant 0 : index
    %c0_218 = arith.constant 0 : index
    %198 = vector.load %arg3[%c0_217, %c0_218] : memref<144x32xbf16, #tpu.memory_space<vmem>>, vector<16x32xbf16>
    %cst_219 = arith.constant dense<0.000000e+00> : vector<18x32xf32>
    %199 = tpu.matmul %197, %198, %cst_219 {dimension_numbers = #tpu.dot_dimension_numbers<[1], [0], [0], [1], [0, 0, 1, 1], [], []>} : vector<18x16xbf16>, vector<16x32xbf16>, vector<18x32xf32> -> vector<18x32xf32>
    %200 = arith.addf %195, %199 : vector<18x32xf32>
    %c18_220 = arith.constant 18 : index
    %c0_221 = arith.constant 0 : index
    %201 = vector.load %arg11[%c18_220, %c0_221] : memref<80x16xf32, #tpu.memory_space<vmem>>, vector<18x16xf32>
    %202 = arith.truncf %201 : vector<18x16xf32> to vector<18x16xbf16>
    %c16_222 = arith.constant 16 : index
    %c0_223 = arith.constant 0 : index
    %203 = vector.load %arg3[%c16_222, %c0_223] : memref<144x32xbf16, #tpu.memory_space<vmem>>, vector<16x32xbf16>
    %cst_224 = arith.constant dense<0.000000e+00> : vector<18x32xf32>
    %204 = tpu.matmul %202, %203, %cst_224 {dimension_numbers = #tpu.dot_dimension_numbers<[1], [0], [0], [1], [0, 0, 1, 1], [], []>} : vector<18x16xbf16>, vector<16x32xbf16>, vector<18x32xf32> -> vector<18x32xf32>
    %205 = arith.addf %200, %204 : vector<18x32xf32>
    %c1_225 = arith.constant 1 : index
    %c0_226 = arith.constant 0 : index
    %206 = vector.load %arg11[%c1_225, %c0_226] : memref<80x16xf32, #tpu.memory_space<vmem>>, vector<18x16xf32>
    %207 = arith.truncf %206 : vector<18x16xf32> to vector<18x16xbf16>
    %c32_227 = arith.constant 32 : index
    %c0_228 = arith.constant 0 : index
    %208 = vector.load %arg3[%c32_227, %c0_228] : memref<144x32xbf16, #tpu.memory_space<vmem>>, vector<16x32xbf16>
    %cst_229 = arith.constant dense<0.000000e+00> : vector<18x32xf32>
    %209 = tpu.matmul %207, %208, %cst_229 {dimension_numbers = #tpu.dot_dimension_numbers<[1], [0], [0], [1], [0, 0, 1, 1], [], []>} : vector<18x16xbf16>, vector<16x32xbf16>, vector<18x32xf32> -> vector<18x32xf32>
    %210 = arith.addf %205, %209 : vector<18x32xf32>
    %c36_230 = arith.constant 36 : index
    %c0_231 = arith.constant 0 : index
    %211 = vector.load %arg11[%c36_230, %c0_231] : memref<80x16xf32, #tpu.memory_space<vmem>>, vector<18x16xf32>
    %212 = arith.truncf %211 : vector<18x16xf32> to vector<18x16xbf16>
    %c48_232 = arith.constant 48 : index
    %c0_233 = arith.constant 0 : index
    %213 = vector.load %arg3[%c48_232, %c0_233] : memref<144x32xbf16, #tpu.memory_space<vmem>>, vector<16x32xbf16>
    %cst_234 = arith.constant dense<0.000000e+00> : vector<18x32xf32>
    %214 = tpu.matmul %212, %213, %cst_234 {dimension_numbers = #tpu.dot_dimension_numbers<[1], [0], [0], [1], [0, 0, 1, 1], [], []>} : vector<18x16xbf16>, vector<16x32xbf16>, vector<18x32xf32> -> vector<18x32xf32>
    %215 = arith.addf %210, %214 : vector<18x32xf32>
    %c54_235 = arith.constant 54 : index
    %c0_236 = arith.constant 0 : index
    %216 = vector.load %arg11[%c54_235, %c0_236] : memref<80x16xf32, #tpu.memory_space<vmem>>, vector<18x16xf32>
    %217 = arith.truncf %216 : vector<18x16xf32> to vector<18x16xbf16>
    %c64_237 = arith.constant 64 : index
    %c0_238 = arith.constant 0 : index
    %218 = vector.load %arg3[%c64_237, %c0_238] : memref<144x32xbf16, #tpu.memory_space<vmem>>, vector<16x32xbf16>
    %cst_239 = arith.constant dense<0.000000e+00> : vector<18x32xf32>
    %219 = tpu.matmul %217, %218, %cst_239 {dimension_numbers = #tpu.dot_dimension_numbers<[1], [0], [0], [1], [0, 0, 1, 1], [], []>} : vector<18x16xbf16>, vector<16x32xbf16>, vector<18x32xf32> -> vector<18x32xf32>
    %220 = arith.addf %215, %219 : vector<18x32xf32>
    %c37_240 = arith.constant 37 : index
    %c0_241 = arith.constant 0 : index
    %221 = vector.load %arg11[%c37_240, %c0_241] : memref<80x16xf32, #tpu.memory_space<vmem>>, vector<18x16xf32>
    %222 = arith.truncf %221 : vector<18x16xf32> to vector<18x16xbf16>
    %c80_242 = arith.constant 80 : index
    %c0_243 = arith.constant 0 : index
    %223 = vector.load %arg3[%c80_242, %c0_243] : memref<144x32xbf16, #tpu.memory_space<vmem>>, vector<16x32xbf16>
    %cst_244 = arith.constant dense<0.000000e+00> : vector<18x32xf32>
    %224 = tpu.matmul %222, %223, %cst_244 {dimension_numbers = #tpu.dot_dimension_numbers<[1], [0], [0], [1], [0, 0, 1, 1], [], []>} : vector<18x16xbf16>, vector<16x32xbf16>, vector<18x32xf32> -> vector<18x32xf32>
    %225 = arith.addf %220, %224 : vector<18x32xf32>
    %c3 = arith.constant 3 : index
    %c0_245 = arith.constant 0 : index
    %226 = vector.load %arg11[%c3, %c0_245] : memref<80x16xf32, #tpu.memory_space<vmem>>, vector<18x16xf32>
    %227 = arith.truncf %226 : vector<18x16xf32> to vector<18x16xbf16>
    %c96 = arith.constant 96 : index
    %c0_246 = arith.constant 0 : index
    %228 = vector.load %arg3[%c96, %c0_246] : memref<144x32xbf16, #tpu.memory_space<vmem>>, vector<16x32xbf16>
    %cst_247 = arith.constant dense<0.000000e+00> : vector<18x32xf32>
    %229 = tpu.matmul %227, %228, %cst_247 {dimension_numbers = #tpu.dot_dimension_numbers<[1], [0], [0], [1], [0, 0, 1, 1], [], []>} : vector<18x16xbf16>, vector<16x32xbf16>, vector<18x32xf32> -> vector<18x32xf32>
    %230 = arith.addf %225, %229 : vector<18x32xf32>
    %c21_248 = arith.constant 21 : index
    %c0_249 = arith.constant 0 : index
    %231 = vector.load %arg11[%c21_248, %c0_249] : memref<80x16xf32, #tpu.memory_space<vmem>>, vector<18x16xf32>
    %232 = arith.truncf %231 : vector<18x16xf32> to vector<18x16xbf16>
    %c112 = arith.constant 112 : index
    %c0_250 = arith.constant 0 : index
    %233 = vector.load %arg3[%c112, %c0_250] : memref<144x32xbf16, #tpu.memory_space<vmem>>, vector<16x32xbf16>
    %cst_251 = arith.constant dense<0.000000e+00> : vector<18x32xf32>
    %234 = tpu.matmul %232, %233, %cst_251 {dimension_numbers = #tpu.dot_dimension_numbers<[1], [0], [0], [1], [0, 0, 1, 1], [], []>} : vector<18x16xbf16>, vector<16x32xbf16>, vector<18x32xf32> -> vector<18x32xf32>
    %235 = arith.addf %230, %234 : vector<18x32xf32>
    %c4_252 = arith.constant 4 : index
    %c0_253 = arith.constant 0 : index
    %236 = vector.load %arg11[%c4_252, %c0_253] : memref<80x16xf32, #tpu.memory_space<vmem>>, vector<18x16xf32>
    %237 = arith.truncf %236 : vector<18x16xf32> to vector<18x16xbf16>
    %c128 = arith.constant 128 : index
    %c0_254 = arith.constant 0 : index
    %238 = vector.load %arg3[%c128, %c0_254] : memref<144x32xbf16, #tpu.memory_space<vmem>>, vector<16x32xbf16>
    %cst_255 = arith.constant dense<0.000000e+00> : vector<18x32xf32>
    %239 = tpu.matmul %237, %238, %cst_255 {dimension_numbers = #tpu.dot_dimension_numbers<[1], [0], [0], [1], [0, 0, 1, 1], [], []>} : vector<18x16xbf16>, vector<16x32xbf16>, vector<18x32xf32> -> vector<18x32xf32>
    %240 = arith.addf %235, %239 : vector<18x32xf32>
    %c0_256 = arith.constant 0 : index
    %c0_257 = arith.constant 0 : index
    %241 = vector.load %arg6[%c0_256, %c0_257] : memref<1x32xf32, #tpu.memory_space<vmem>>, vector<1x32xf32>
    %242 = vector.broadcast %241 : vector<1x32xf32> to vector<18x32xf32>
    %243 = arith.addf %240, %242 : vector<18x32xf32>
    %cst_258 = arith.constant 0.000000e+00 : f32
    %244 = vector.broadcast %cst_258 : f32 to vector<18x32xf32>
    %245 = arith.maximumf %243, %244 : vector<18x32xf32>
    %c0_259 = arith.constant 0 : index
    %c0_260 = arith.constant 0 : index
    %246 = vector.load %arg9[%c0_259, %c0_260] : memref<18x32xf32, #tpu.memory_space<vmem>>, vector<18x32xf32>
    tpu.vector_store %arg9[%c0_259, %c0_260], %245 {strides = array<i32>} : memref<18x32xf32, #tpu.memory_space<vmem>>, vector<18x32xf32>,
    return
  }
}

</mosaic_0001>

<bundles_post_ra>
// kernel: _forward_impl.1
= control target key start
LH: loop header
LB: loop body
LE: loop exit
PB: predicated region body
PF: predicated region fallthrough
CT: control target
= control target key end

     0   :  { %vm187_vm0 = vcmask 1041408   ;;  %vm127_vm1 = vcmask 1046528   ;;  %v5433_v0 = vmov 0.0   ;;  %vm5434_vm2 = vmmov 0   ;;  %s7131_s1 = inlined_call_operand.vmem [shape: bf16[36,8], index: 1, kind: input, shape index: {}]   ;;  %s7132_s0 = inlined_call_operand.vmem [shape: bf16[664,4], index: 0, kind: input, shape index: {}]   ;;  %s7133_s2 = inlined_call_operand.vmem [shape: bf16[72,16], index: 2, kind: input, shape index: {}]   ;;  %s7134_s4 = inlined_call_operand.vmem [shape: f32[1,8], index: 4, kind: input, shape index: {}]   ;;  %s7135_s7 = inlined_call_operand.vmem [shape: f32[162,8], index: 7, kind: output, shape index: {0}]   ;;  %s7136_s3 = inlined_call_operand.vmem [shape: bf16[144,32], index: 3, kind: input, shape index: {}]   ;;  %s7137_s5 = inlined_call_operand.vmem [shape: f32[1,16], index: 5, kind: input, shape index: {}]   ;;  %s7138_s8 = inlined_call_operand.vmem [shape: f32[50,16], index: 8, kind: output, shape index: {1}]   ;;  %s7139_s6 = inlined_call_operand.vmem [shape: f32[1,32], index: 6, kind: input, shape index: {}]   ;;  %s7140_s9 = inlined_call_operand.vmem [shape: f32[18,32], index: 9, kind: output, shape index: {2}]  }
   0x1   :  { %4782 = vmatprep.subr.bf16.mxu0 %v5433_v0  ;;  %4828 = vmatprep.subr.bf16.mxu1 %v5433_v0  ;;  %v5351_v1 = vld [vmem:[%s7131_s1] ss:$0 sps:$4 sm:$0xcc]   ;;  %v5353_v2 = vld [vmem:[%s7132_s0 + $0x58] sm:$0xff]   ;;  %v5352_v6 = vld [vmem:[%s7132_s0 + $0x50] sm:$0xfe]  }
   0x2   :  { %v51_v3 = vld [vmem:[%s7131_s1] sm:$0x3]  ;;  %4784 = vmatprep.mubr.msk.bf16.mxu0 %vm5434_vm2, %v5433_v0  ;;  %4830 = vmatprep.mubr.msk.bf16.mxu1 %vm5434_vm2, %v5433_v0  ;;  %v152_v4 = vrot.slane %v5351_v1, 2  ;;  %v129_v7 = vrot.slane %v5353_v2, 1  ;;  %vm153_vm3 = vcmask 31744   ;;  %v128_v11 = vrot.slane %v5352_v6, 1 }
   0x3   :  { %v398_v5 = vsel %vm187_vm0, %v51_v3, 0  ;;  %v5354_v9 = vld [vmem:[%s7132_s0] sm:$0xff]   ;;  %v5356_v16 = vld [vmem:[%s7132_s0 + $0x8] sm:$0xff]   ;;  %v5358_v20 = vld [vmem:[%s7132_s0 + $0x10] sm:$0xff]   ;;  %vm525_vm4 = vsmask.f32 7424 }
   0x4   :  { %4829 = vmatpush3.bf16.msra.mxu1 %v398_v5  ;;  %v189_v8 = vsel %vm187_vm0, %v152_v4, 0  ;;  %v521_v10 = vld [vmem:[%s7131_s1 + $0x4] sm:$0x3]  ;;  %v130_v14 = vsel %vm127_vm1, %v128_v11, %v129_v7  ;;  %v5357_v18 = vld [vmem:[%s7132_s0 + $0x68] sm:$0xff]   ;;  %v528_v19 = vshll.u32 %v5354_v9, 16  ;;  %v532_v21 = vshll.u32 %v5356_v16, 16 }
   0x5   :  { %4920 = vmatprep.subr.bf16.mxu1 %v5433_v0  ;;  %4783 = vmatpush3.bf16.msra.mxu0 %v189_v8  ;;  %v637_v12 = vsel %vm187_vm0, %v521_v10, 0  ;;  %v5355_v13 = vld [vmem:[%s7132_s0 + $0x60] sm:$0xff]   ;;  %v539_v22 = vshll.u32 %v5358_v20, 16  ;;  %v526_v23 = vshrl.u32 %v5354_v9, 16  ;;  %v133_v24 = vrot.slane %v5357_v18, 1  ;;  %v5360_v27 = vld [vmem:[%s7132_s0 + $0x18] sm:$0xff]  }
   0x6   :  { %4874 = vmatprep.subr.bf16.mxu0 %v5433_v0  ;;  %v131_v15 = vrot.slane %v5355_v13, 1  ;;  %v530_v25 = vrot.slane %v528_v19, 1  ;;  %v536_v26 = vshrl.u32 %v5356_v16, 16  ;;  %v543_v28 = vshrl.u32 %v5358_v20, 16  ;;  %v5359_v32 = vld [vmem:[%s7132_s0 + $0x70] sm:$0xff]   ;;  %v5362_v44 = vld [vmem:[%s7132_s0 + $0x20] sm:$0xff]  }
   0x7   :  { %4831 = vmatmul.mubr.msk.bf16.vlgmr.msra.gmra.mxu1 %vm153_vm3, %v5354_v9  ;;  %v534_v29 = vrot.slane %v532_v21, 1  ;;  %v541_v30 = vrot.slane %v539_v22, 1  ;;  %v546_v33 = vshll.u32 %v5360_v27, 16  ;;  %v135_v38 = vrot.slane %v5359_v32, 1  ;;  %v5361_v46 = vld [vmem:[%s7132_s0 + $0x78] sm:$0xff]   ;;  %v5364_v50 = vld [vmem:[%s7132_s0 + $0x28] sm:$0xff]  }
   0x8   :  { %4834 = vmatprep.mubr.msk.bf16.mxu1 %vm5434_vm2, %v5433_v0  ;;  %4785 = vmatmul.mubr.msk.bf16.vlgmr.msra.gmra.mxu0 %vm153_vm3, %v130_v14  ;;  %v132_v17 = vsel %vm127_vm1, %v129_v7, %v131_v15  ;;  %v134_v31 = vsel %vm127_vm1, %v131_v15, %v133_v24  ;;  %v531_v34 = vor.u32 %v530_v25, %v526_v23  ;;  %v5374_v39 = vld [vmem:[%s7131_s1 + $0x4] ss:$0 sps:$4 sm:$0xcc]   ;;  %v550_v48 = vshrl.u32 %v5360_v27, 16  ;;  %v5366_v51 = vld [vmem:[%s7132_s0 + $0x30] sm:$0xff]   ;;  %v5590_v57 = vld [vmem:[%s7132_s0 + $0x38] sm:$0xff]  }
   0x9   :  { %4875 = vmatpush3.bf16.msra.mxu0 %v637_v12  ;;  %4788 = vmatprep.mubr.msk.bf16.mxu0 %vm5434_vm2, %v5433_v0  ;;  %v538_v35 = vor.u32 %v536_v26, %v534_v29  ;;  %v545_v36 = vor.u32 %v543_v28, %v541_v30  ;;  %v548_v37 = vrot.slane %v546_v33, 1  ;;  %v880_v43 = vrot.slane %v5374_v39, 2  ;;  %v5598_v63 = vld [vmem:[%s7132_s0 + $0x40] sm:$0xff]   ;;  %v5612_v8 = vld [vmem:[%s7132_s0 + $0x48] sm:$0xff]  }
   0xa   :  { %4966 = vmatprep.subr.bf16.mxu0 %v5433_v0  ;;  %v5558_v40 = vsel %vm525_vm4, %v531_v34, %v534_v29  ;;  %v136_v45 = vsel %vm127_vm1, %v133_v24, %v135_v38  ;;  %v553_v49 = vshll.u32 %v5362_v44, 16  ;;  %v137_v54 = vrot.slane %v5361_v46, 1  ;;  %v5363_v5 = vld [vmem:[%s7132_s0 + $0x80] sm:$0xff]   ;;  %v5365_v23 = vld [vmem:[%s7132_s0 + $0x88] sm:$0xff]   ;;  %v5367_v34 = vld [vmem:[%s7132_s0 + $0x90] sm:$0xff]  }
   0xb   :  { %v5561_v41 = vsel %vm525_vm4, %v538_v35, %v541_v30  ;;  %v5564_v42 = vsel %vm525_vm4, %v545_v36, %v548_v37  ;;  %v915_v47 = vsel %vm187_vm0, %v880_v43, 0  ;;  %v552_v52 = vor.u32 %v550_v48, %v548_v37  ;;  %v5656_v28 = vld [vmem:[%s7132_s0 + $0xa8] sm:$0xff]   ;;  %v5369_v36 = vld [vmem:[%s7132_s0 + $0x98] sm:$0xff]   ;;  %v5678_v46 = vld [vmem:[%s7132_s0 + $0xb0] sm:$0xff]  }
   0xc   :  { %4921 = vmatpush3.bf16.msra.mxu1 %v915_v47  ;;  %v555_v53 = vrot.slane %v553_v49, 1  ;;  %v557_v55 = vshrl.u32 %v5362_v44, 16  ;;  %v560_v56 = vshll.u32 %v5364_v50, 16  ;;  %v564_v59 = vshrl.u32 %v5364_v50, 16 }
   0xd   :  { %5012 = vmatprep.subr.bf16.mxu1 %v5433_v0  ;;  %v567_v60 = vshll.u32 %v5366_v51, 16  ;;  %v571_v2 = vshrl.u32 %v5366_v51, 16  ;;  %v574_v3 = vshll.u32 %v5590_v57, 16  ;;  %v138_v4 = vsel %vm127_vm1, %v135_v38, %v137_v54 }
   0xe   :  { %v5593_v58 = vsel %vm525_vm4, %v552_v52, %v555_v53  ;;  %v559_v61 = vor.u32 %v557_v55, %v555_v53  ;;  %v562_v62 = vrot.slane %v560_v56, 1  ;;  %v578_v11 = vshrl.u32 %v5590_v57, 16 }
   0xf   :  { %4835 = vmatmul.mubr.msk.bf16.gmra.mxu1 %vm153_vm3, %v5356_v16  ;;  %v569_v1 = vrot.slane %v567_v60, 1  ;;  %v576_v10 = vrot.slane %v574_v3, 1  ;;  %v581_v12 = vshll.u32 %v5598_v63, 16  ;;  %v585_v14 = vshrl.u32 %v5598_v63, 16 }
  0x10   :  { %4838 = vmatprep.mubr.msk.bf16.mxu1 %vm5434_vm2, %v5433_v0  ;;  %4789 = vmatmul.mubr.msk.bf16.gmra.mxu0 %vm153_vm3, %v132_v17  ;;  %v5606_v6 = vsel %vm525_vm4, %v559_v61, %v562_v62  ;;  %v566_v7 = vor.u32 %v564_v59, %v562_v62  ;;  %v588_v18 = vshll.u32 %v5612_v8, 16  ;;  %v139_v19 = vrot.slane %v5363_v5, 1 }
  0x11   :  { %4792 = vmatprep.mubr.msk.bf16.mxu0 %vm5434_vm2, %v5433_v0  ;;  %v573_v9 = vor.u32 %v571_v2, %v569_v1  ;;  %v580_v16 = vor.u32 %v578_v11, %v576_v10  ;;  %v583_v17 = vrot.slane %v581_v12, 1  ;;  %v141_v26 = vrot.slane %v5365_v23, 1 }
  0x12   :  { %v5619_v13 = vsel %vm525_vm4, %v566_v7, %v569_v1  ;;  %v5632_v22 = vrot.slane %v588_v18, 1  ;;  %v140_v25 = vsel %vm127_vm1, %v137_v54, %v139_v19  ;;  %v1350_v32 = vshll.u32 %v5656_v28, 16  ;;  %v5693_v54 = vld [vmem:[%s7132_s0 + $0xb8] sm:$0xff]  }
  0x13   :  { %v5624_v15 = vsel %vm525_vm4, %v573_v9, %v576_v10  ;;  %v587_v21 = vor.u32 %v585_v14, %v583_v17  ;;  %v142_v33 = vsel %vm127_vm1, %v139_v19, %v141_v26  ;;  %vm1337_vm5 = vsmask.f32 5376  ;;  %v5735_v14 = vld [vmem:[%s7132_s0 + $0xc8] sm:$0xff]  }
  0x14   :  { %v1352_v39 = vrot.slane %v1350_v32, 3  ;;  %v145_v48 = vrot.slane %v5369_v36, 1  ;;  %v1356_v49 = vshrl.u32 %v5678_v46, 16  ;;  %v1365_v59 = vshrl.u32 %v5693_v54, 16  ;;  %v5381_v32 = vld [vmem:[%s7132_s0 + $0xd0] sm:$0xff]  }
  0x15   :  { %v5639_v24 = vsel %vm525_vm4, %v587_v21, %v5632_v22  ;;  %v1368_v60 = vshll.u32 %v5693_v54, 16  ;;  %v1383_v18 = vshrl.u32 %v5735_v14, 16  ;;  %v1386_v19 = vshll.u32 %v5735_v14, 16  ;;  %v5387_v21 = vld [vmem:[%s7131_s1 + $0x8] ss:$0 sps:$4 sm:$0xcc]  }
  0x16   :  { %v1358_v52 = vrot.slane %v1356_v49, 2  ;;  %v1367_v62 = vrot.slane %v1365_v59, 2  ;;  %vm855_vm6 = vcmask 1045504   ;;  %v865_v59 = vrot.slane %v5735_v14, 2 }
  0x17   :  { %4839 = vmatmul.mubr.msk.bf16.gmra.mxu1 %vm153_vm3, %v5358_v20  ;;  %v5630_v20 = vsel %vm525_vm4, %v580_v16, %v583_v17  ;;  %v1370_v1 = vrot.slane %v1368_v60, 3  ;;  %v5373_v17 = vld [vmem:[%s7132_s0 + $0x50] ss:$0 sps:$4 sm:$0x11]   ;;  %v1385_v23 = vrot.slane %v1383_v18, 2  ;;  %v867_v60 = vrot.slane %v5381_v32, 2 }
  0x18   :  { %4842 = vmatprep.mubr.msk.bf16.mxu1 %vm5434_vm2, %v5433_v0  ;;  %4793 = vmatmul.mubr.msk.bf16.gmra.mxu0 %vm153_vm3, %v134_v31  ;;  %v1347_v31 = vshrl.u32 %v5656_v28, 16  ;;  %v5389_v18 = vld [vmem:[%s7132_s0 + $0xf8] sm:$0xff]   ;;  %vm1133_vm7 = vcmask 1044480   ;;  %vm2031_vm8 = vsmask.f32 6400  ;;  %vm2563_vm9 = vcmask 64512  }
  0x19   :  { %4796 = vmatprep.mubr.msk.bf16.mxu0 %vm5434_vm2, %v5433_v0  ;;  %v1371_v2 = vor.u32 %v1370_v1, %v1367_v62  ;;  %2586 = vst.msk [vmem:[#allocation2] sm:$0xff] %vm2563_vm9, %v5433_v0  ;;  %2587 = vst.msk [vmem:[#allocation2 + $0x8] sm:$0xff] %vm2563_vm9, %v5433_v0  ;;  %vm2744_vm10 = vcmask 1043456   ;;  %vm2614_vm11 = vcmask 60416   ;;  %vm2584_vm12 = vcmask 58368  }
  0x1a   :  { %v1349_v38 = vrot.slane %v1347_v31, 2  ;;  %v1439_v31 = vrot.slane %v5387_v21, 2  ;;  %2588 = vst.msk [vmem:[#allocation2 + $0x10] sm:$0xff] %vm2563_vm9, %v5433_v0  ;;  %2589 = vst.msk [vmem:[#allocation2 + $0x18] sm:$0xff] %vm2563_vm9, %v5433_v0  ;;  %vm3598_vm13 = vcmask 130048   ;;  %vm3605_vm14 = vcmask 123904  }
  0x1b   :  { %2590 = vst.msk [vmem:[#allocation2 + $0x20] sm:$0xff] %vm2563_vm9, %v5433_v0  ;;  %2591 = vst.msk [vmem:[#allocation2 + $0x28] sm:$0xff] %vm2563_vm9, %v5433_v0  ;;  %vm4304_vm15 = vcmask 254976  }
  0x1c   :  { %v1474_v36 = vsel %vm187_vm0, %v1439_v31, 0  ;;  %2592 = vst.msk [vmem:[#allocation2 + $0x30] sm:$0xff] %vm2563_vm9, %v5433_v0  ;;  %2593 = vst.msk [vmem:[#allocation2 + $0x38] sm:$0xff] %vm2563_vm9, %v5433_v0 }
  0x1d   :  { %2594 = vst.msk [vmem:[#allocation2 + $0x40] sm:$0xff] %vm2563_vm9, %v5433_v0  ;;  %2595 = vst.msk [vmem:[#allocation2 + $0x48] sm:$0xff] %vm2563_vm9, %v5433_v0 }
  0x1e   :  { %2596 = vst.msk [vmem:[#allocation2 + $0x50] sm:$0xff] %vm2563_vm9, %v5433_v0  ;;  %2597 = vst.msk [vmem:[#allocation2 + $0x58] sm:$0xff] %vm2563_vm9, %v5433_v0 }
  0x1f   :  { %4843 = vmatmul.mubr.msk.bf16.gmra.mxu1 %vm153_vm3, %v5360_v27  ;;  %v5651_v27 = vld [vmem:[%s7132_s0 + $0xa0] sm:$0xfc]   ;;  %2598 = vst.msk [vmem:[#allocation2 + $0x60] sm:$0xff] %vm2563_vm9, %v5433_v0  ;;  %2599 = vst.msk [vmem:[#allocation2 + $0x68] sm:$0xff] %vm2563_vm9, %v5433_v0 }
  0x20   :  { %4846 = vmatprep.mubr.msk.bf16.mxu1 %vm5434_vm2, %v5433_v0  ;;  %4797 = vmatmul.mubr.msk.bf16.gmra.mxu0 %vm153_vm3, %v136_v45  ;;  %v1339_v29 = vshrl.u32 %v5651_v27, 16  ;;  %v1342_v30 = vshll.u32 %v5651_v27, 16  ;;  %v143_v45 = vrot.slane %v5367_v34, 1  ;;  %v1392_v34 = vshrl.u32 %v5381_v32, 16  ;;  %2600 = vst.msk [vmem:[#allocation2 + $0x70] sm:$0xff] %vm2563_vm9, %v5433_v0  ;;  %2601 = vst.msk [vmem:[#allocation2 + $0x78] sm:$0xff] %vm2563_vm9, %v5433_v0 }
  0x21   :  { %4800 = vmatprep.mubr.msk.bf16.mxu0 %vm5434_vm2, %v5433_v0  ;;  %2602 = vst.msk [vmem:[#allocation2 + $0x80] sm:$0xff] %vm2563_vm9, %v5433_v0  ;;  %2603 = vst.msk [vmem:[#allocation2 + $0x88] sm:$0xff] %vm2563_vm9, %v5433_v0 }
  0x22   :  { %v1341_v35 = vrot.slane %v1339_v29, 2  ;;  %v1344_v37 = vrot.slane %v1342_v30, 3  ;;  %v146_v61 = vsel %vm127_vm1, %v143_v45, %v145_v48  ;;  %v857_v29 = vrot.slane %v5656_v28, 2  ;;  %2604 = vst.msk [vmem:[#allocation2 + $0x90] sm:$0xff] %vm2563_vm9, %v5433_v0  ;;  %2605 = vst.msk [vmem:[#allocation2 + $0x98] sm:$0xff] %vm2563_vm9, %v5433_v0 }
  0x23   :  { %2606 = vst.msk [vmem:[#allocation2 + $0xa0] sm:$0xff] %vm2563_vm9, %v5433_v0  ;;  %2607 = vst.msk [vmem:[#allocation2 + $0xa8] sm:$0xff] %vm2563_vm9, %v5433_v0 }
  0x24   :  { %v1345_v43 = vor.u32 %v1344_v37, %v1341_v35  ;;  %v1395_v35 = vshll.u32 %v5381_v32, 16  ;;  %v1394_v37 = vrot.slane %v1392_v34, 2  ;;  %2608 = vst.msk [vmem:[#allocation2 + $0xb0] sm:$0xff] %vm2563_vm9, %v5433_v0  ;;  %2609 = vst.msk [vmem:[#allocation2 + $0xb8] sm:$0xff] %vm2563_vm9, %v5433_v0 }
  0x25   :  { %2610 = vst.msk [vmem:[#allocation2 + $0xc0] sm:$0xff] %vm2563_vm9, %v5433_v0 }
  0x26   :  { %3607 = vst.msk [vmem:[#allocation3] sm:$0xff] %vm3598_vm13, %v5433_v0  ;;  %3608 = vst.msk [vmem:[#allocation3 + $0x8] sm:$0xff] %vm3598_vm13, %v5433_v0 }
  0x27   :  { %4847 = vmatmul.mubr.msk.bf16.gmra.mxu1 %vm153_vm3, %v5362_v44  ;;  %v1353_v44 = vor.u32 %v1352_v39, %v1349_v38  ;;  %v1397_v38 = vrot.slane %v1395_v35, 3  ;;  %v5392_v35 = vld [vmem:[%s7132_s0 + $0x110] sm:$0xff]   ;;  %3609 = vst.msk [vmem:[#allocation3 + $0x10] sm:$0xff] %vm3598_vm13, %v5433_v0  ;;  %3610 = vst.msk [vmem:[#allocation3 + $0x18] sm:$0xff] %vm3598_vm13, %v5433_v0 }
  0x28   :  { %4850 = vmatprep.mubr.msk.bf16.mxu1 %vm5434_vm2, %v5433_v0  ;;  %4801 = vmatmul.mubr.msk.bf16.gmra.mxu0 %vm153_vm3, %v138_v4  ;;  %v5717_v4 = vld [vmem:[%s7132_s0 + $0xc0] sm:$0xff]   ;;  %3611 = vst.msk [vmem:[#allocation3 + $0x20] sm:$0xff] %vm3598_vm13, %v5433_v0  ;;  %3612 = vst.msk [vmem:[#allocation3 + $0x28] sm:$0xff] %vm3598_vm13, %v5433_v0 }
  0x29   :  { %4804 = vmatprep.mubr.msk.bf16.mxu0 %vm5434_vm2, %v5433_v0  ;;  %v5681_v47 = vsel %vm1337_vm5, %v1345_v43, %v1353_v44  ;;  %v1377_v7 = vshll.u32 %v5717_v4, 16  ;;  %v859_v43 = vrot.slane %v5678_v46, 2  ;;  %3613 = vst.msk [vmem:[#allocation3 + $0x30] sm:$0xff] %vm3598_vm13, %v5433_v0  ;;  %3614 = vst.msk [vmem:[#allocation3 + $0x38] sm:$0xff] %vm3598_vm13, %v5433_v0 }
  0x2a   :  { %3615 = vst.msk [vmem:[#allocation3 + $0x40] sm:$0xff] %vm3598_vm13, %v5433_v0 }
  0x2b   :  { %v1379_v11 = vrot.slane %v1377_v7, 3  ;;  %v592_v7 = vshrl.u32 %v5612_v8, 16 }
  0x2f   :  { %4851 = vmatmul.mubr.msk.bf16.gmra.mxu1 %vm153_vm3, %v5364_v50  ;;  %v1359_v50 = vshll.u32 %v5678_v46, 16  ;;  %v860_v46 = vsel %vm855_vm6, %v857_v29, %v859_v43 }
  0x30   :  { %4854 = vmatprep.mubr.msk.bf16.mxu1 %vm5434_vm2, %v5433_v0  ;;  %4805 = vmatmul.mubr.msk.bf16.gmra.mxu0 %vm153_vm3, %v140_v25  ;;  %v1388_v25 = vrot.slane %v1386_v19, 3 }
  0x31   :  { %4808 = vmatprep.mubr.msk.bf16.mxu0 %vm5434_vm2, %v5433_v0  ;;  %v1361_v53 = vrot.slane %v1359_v50, 3 }
  0x32   :  { %v1389_v30 = vor.u32 %v1388_v25, %v1385_v23  ;;  %v1135_v23 = vrot.slane %v5389_v18, 3  ;;  %v1638_v25 = vld [vmem:[%s7131_s1 + $0xc] sm:$0x3] }
  0x33   :  { %v1362_v55 = vor.u32 %v1361_v53, %v1358_v52  ;;  %v861_v52 = vrot.slane %v5693_v54, 2  ;;  %v863_v54 = vrot.slane %v5717_v4, 2  ;;  %v1813_v31 = vsel %vm187_vm0, %v1638_v25, 0 }
  0x35   :  { %v5699_v56 = vsel %vm1337_vm5, %v1353_v44, %v1362_v55  ;;  %v5720_v5 = vsel %vm1337_vm5, %v1362_v55, %v1371_v2  ;;  %v1398_v44 = vor.u32 %v1397_v38, %v1394_v37 }
  0x37   :  { %4855 = vmatmul.mubr.msk.bf16.gmra.mxu1 %vm153_vm3, %v5366_v51  ;;  %v144_v51 = vsel %vm127_vm1, %v141_v26, %v143_v45  ;;  %v856_v26 = vrot.slane %v5651_v27, 2  ;;  %v1079_v27 = vld [vmem:[%s7131_s1 + $0x8] sm:$0x3]  ;;  %v5382_v45 = vld [vmem:[%s7132_s0 + $0xd8] sm:$0xff]  }
  0x38   :  { %4858 = vmatprep.mubr.msk.bf16.mxu1 %vm5434_vm2, %v5433_v0  ;;  %4809 = vmatmul.mubr.msk.bf16.gmra.mxu0 %vm153_vm3, %v142_v33  ;;  %v1189_v39 = vsel %vm187_vm0, %v1079_v27, 0  ;;  %v1401_v49 = vshrl.u32 %v5382_v45, 16  ;;  %v1404_v50 = vshll.u32 %v5382_v45, 16 }
  0x39   :  { %4812 = vmatprep.mubr.msk.bf16.mxu0 %vm5434_vm2, %v5433_v0  ;;  %v858_v28 = vsel %vm855_vm6, %v856_v26, %v857_v29 }
  0x3f   :  { %4859 = vmatmul.mubr.msk.bf16.gmra.mxu1 %vm153_vm3, %v5590_v57  ;;  %v5371_v57 = vld [vmem:[%s7132_s0 + $0xa0] ss:$0 sps:$4 sm:$0x33]  }
  0x40   :  { %4862 = vmatprep.mubr.msk.bf16.mxu1 %vm5434_vm2, %v5433_v0  ;;  %4813 = vmatmul.mubr.msk.bf16.gmra.mxu0 %vm153_vm3, %v144_v51  ;;  %v147_v3 = vrot.slane %v5371_v57, 1  ;;  %v1406_v51 = vrot.slane %v1404_v50, 3  ;;  %v862_v57 = vsel %vm855_vm6, %v859_v43, %v861_v52  ;;  %v5393_v50 = vld [vmem:[%s7132_s0 + $0x118] sm:$0xff]  }
  0x41   :  { %4816 = vmatprep.mubr.msk.bf16.mxu0 %vm5434_vm2, %v5433_v0 }
  0x42   :  { %v148_v9 = vsel %vm127_vm1, %v145_v48, %v147_v3  ;;  %v5781_v48 = vsel %vm1337_vm5, %v1389_v30, %v1398_v44 }
  0x47   :  { %4863 = vmatmul.mubr.msk.bf16.gmra.mxu1 %vm153_vm3, %v5598_v63  ;;  %v1374_v63 = vshrl.u32 %v5717_v4, 16 }
  0x48   :  { %4866 = vmatprep.mubr.msk.bf16.mxu1 %vm5434_vm2, %v5433_v0  ;;  %4817 = vmatmul.mubr.msk.bf16.gmra.mxu0 %vm153_vm3, %v146_v61  ;;  %v868_v61 = vsel %vm855_vm6, %v865_v59, %v867_v60 }
  0x49   :  { %4820 = vmatprep.mubr.msk.bf16.mxu0 %vm5434_vm2, %v5433_v0  ;;  %v1376_v10 = vrot.slane %v1374_v63, 2  ;;  %v5386_v63 = vld [vmem:[%s7132_s0 + $0xf0] ss:$0 sps:$4 sm:$0x77]  }
  0x4b   :  { %v1380_v12 = vor.u32 %v1379_v11, %v1376_v10  ;;  %v594_v10 = vor.u32 %v592_v7, %v5632_v22  ;;  %v5400_v22 = vld [vmem:[%s7131_s1 + $0xc] ss:$0 sps:$4 sm:$0xcc]  }
  0x4c   :  { %v2133_v19 = vrot.slane %v5400_v22, 2 }
  0x4d   :  { %v5738_v16 = vsel %vm1337_vm5, %v1371_v2, %v1380_v12  ;;  %v5760_v33 = vsel %vm1337_vm5, %v1380_v12, %v1389_v30  ;;  %v5851_v2 = vld [vmem:[%s7132_s0 + $0xe8] sm:$0xff]   ;;  %v5390_v30 = vld [vmem:[%s7132_s0 + $0x100] sm:$0xff]  }
  0x4e   :  { %v2168_v26 = vsel %vm187_vm0, %v2133_v19, 0  ;;  %v1137_v32 = vrot.slane %v5390_v30, 3 }
  0x4f   :  { %4867 = vmatmul.mubr.msk.bf16.gmra.mxu1 %vm153_vm3, %v5612_v8 }
  0x50   :  { %4870 = vmatprep.mubr.msk.bf16.mxu1 %vm5434_vm2, %v5433_v0  ;;  %4821 = vmatmul.mubr.msk.bf16.gmra.mxu0 %vm153_vm3, %v148_v9  ;;  %v1138_v27 = vsel %vm1133_vm7, %v1135_v23, %v1137_v32 }
  0x51   :  { %4824 = vmatprep.mubr.msk.bf16.mxu0 %vm5434_vm2, %v5433_v0 }
  0x57   :  { %4871 = vmatmul.mubr.msk.bf16.gmra.mxu1 %vm153_vm3, %v5373_v17  ;;  %v5388_v17 = vld [vmem:[%s7132_s0 + $0xf0] sm:$0xf8]  }
  0x58   :  { %4922 = vmatprep.mubr.msk.bf16.mxu1 %vm5434_vm2, %v5433_v0  ;;  %4825 = vmatmul.mubr.msk.bf16.gmra.mxu0 %vm153_vm3, %v147_v3  ;;  %v873_v3 = vrot.slane %v5851_v2, 2  ;;  %v1134_v21 = vrot.slane %v5388_v17, 3 }
  0x59   :  { %4876 = vmatprep.mubr.msk.bf16.mxu0 %vm5434_vm2, %v5433_v0 }
  0x5a   :  { %v1136_v29 = vsel %vm1133_vm7, %v1134_v21, %v1135_v23 }
  0x5f   :  { %4923 = vmatmul.mubr.msk.bf16.vlgmr.msra.gmra.mxu1 %vm153_vm3, %v858_v28  ;;  %v5391_v28 = vld [vmem:[%s7132_s0 + $0x108] sm:$0xff]  }
  0x60   :  { %4926 = vmatprep.mubr.msk.bf16.mxu1 %vm5434_vm2, %v5433_v0  ;;  %5013 = vmatpush3.bf16.msra.mxu1 %v1474_v36 }
  0x61   :  { %4877 = vmatmul.mubr.msk.bf16.vlgmr.msra.gmra.mxu0 %vm153_vm3, %v5558_v40  ;;  %5104 = vmatprep.subr.bf16.mxu1 %v5433_v0  ;;  %v1403_v40 = vrot.slane %v1401_v49, 2 }
  0x62   :  { %4967 = vmatpush3.bf16.msra.mxu0 %v1189_v39  ;;  %4880 = vmatprep.mubr.msk.bf16.mxu0 %vm5434_vm2, %v5433_v0  ;;  %v1141_v39 = vrot.slane %v5392_v35, 3  ;;  %v1422_v35 = vshll.u32 %v5851_v2, 16 }
  0x63   :  { %5058 = vmatprep.subr.bf16.mxu0 %v5433_v0  ;;  %v5789_v53 = vor.u32 %v1406_v51, %v1403_v40 }
  0x65   :  { %v5797_v55 = vsel %vm1337_vm5, %v1398_v44, %v5789_v53 }
  0x67   :  { %4927 = vmatmul.mubr.msk.bf16.gmra.mxu1 %vm153_vm3, %v860_v46 }
  0x68   :  { %4930 = vmatprep.mubr.msk.bf16.mxu1 %vm5434_vm2, %v5433_v0 }
  0x69   :  { %4881 = vmatmul.mubr.msk.bf16.gmra.mxu0 %vm153_vm3, %v5561_v41  ;;  %v864_v41 = vsel %vm855_vm6, %v861_v52, %v863_v54 }
  0x6a   :  { %4884 = vmatprep.mubr.msk.bf16.mxu0 %vm5434_vm2, %v5433_v0 }
  0x6f   :  { %4931 = vmatmul.mubr.msk.bf16.gmra.mxu1 %vm153_vm3, %v862_v57 }
  0x70   :  { %4934 = vmatprep.mubr.msk.bf16.mxu1 %vm5434_vm2, %v5433_v0 }
  0x71   :  { %4885 = vmatmul.mubr.msk.bf16.gmra.mxu0 %vm153_vm3, %v5564_v42  ;;  %v866_v42 = vsel %vm855_vm6, %v863_v54, %v865_v59 }
  0x72   :  { %4888 = vmatprep.mubr.msk.bf16.mxu0 %vm5434_vm2, %v5433_v0 }
  0x77   :  { %4935 = vmatmul.mubr.msk.bf16.gmra.mxu1 %vm153_vm3, %v864_v41  ;;  %v1143_v41 = vrot.slane %v5393_v50, 3 }
  0x78   :  { %4938 = vmatprep.mubr.msk.bf16.mxu1 %vm5434_vm2, %v5433_v0 }
  0x79   :  { %4889 = vmatmul.mubr.msk.bf16.gmra.mxu0 %vm153_vm3, %v5593_v58  ;;  %v869_v58 = vrot.slane %v5382_v45, 2 }
  0x7a   :  { %4892 = vmatprep.mubr.msk.bf16.mxu0 %vm5434_vm2, %v5433_v0 }
  0x7b   :  { %v870_v62 = vsel %vm855_vm6, %v867_v60, %v869_v58 }
  0x7f   :  { %4939 = vmatmul.mubr.msk.bf16.gmra.mxu1 %vm153_vm3, %v866_v42 }
  0x80   :  { %4942 = vmatprep.mubr.msk.bf16.mxu1 %vm5434_vm2, %v5433_v0 }
  0x81   :  { %4893 = vmatmul.mubr.msk.bf16.gmra.mxu0 %vm153_vm3, %v5606_v6  ;;  %v5837_v6 = vld [vmem:[%s7132_s0 + $0xe0] sm:$0xff]  }
  0x82   :  { %4896 = vmatprep.mubr.msk.bf16.mxu0 %vm5434_vm2, %v5433_v0  ;;  %v871_v1 = vrot.slane %v5837_v6, 2  ;;  %v1413_v22 = vshll.u32 %v5837_v6, 16 }
  0x84   :  { %v874_v4 = vsel %vm855_vm6, %v871_v1, %v873_v3 }
  0x87   :  { %4943 = vmatmul.mubr.msk.bf16.gmra.mxu1 %vm153_vm3, %v868_v61 }
  0x88   :  { %4946 = vmatprep.mubr.msk.bf16.mxu1 %vm5434_vm2, %v5433_v0 }
  0x89   :  { %4897 = vmatmul.mubr.msk.bf16.gmra.mxu0 %vm153_vm3, %v5619_v13  ;;  %v872_v13 = vsel %vm855_vm6, %v869_v58, %v871_v1 }
  0x8a   :  { %4900 = vmatprep.mubr.msk.bf16.mxu0 %vm5434_vm2, %v5433_v0 }
  0x8f   :  { %4947 = vmatmul.mubr.msk.bf16.gmra.mxu1 %vm153_vm3, %v870_v62  ;;  %v5394_v62 = vld [vmem:[%s7132_s0 + $0x120] sm:$0xff]  }
  0x90   :  { %4950 = vmatprep.mubr.msk.bf16.mxu1 %vm5434_vm2, %v5433_v0 }
  0x91   :  { %4901 = vmatmul.mubr.msk.bf16.gmra.mxu0 %vm153_vm3, %v5624_v15  ;;  %v5385_v15 = vld [vmem:[%s7132_s0 + $0x50] ss:$0 sps:$4 sm:$0x33]  }
  0x92   :  { %4904 = vmatprep.mubr.msk.bf16.mxu0 %vm5434_vm2, %v5433_v0  ;;  %v596_v9 = vshll.u32 %v5385_v15, 16  ;;  %v600_v14 = vshrl.u32 %v5385_v15, 16 }
  0x94   :  { %v598_v11 = vrot.slane %v596_v9, 1 }
  0x96   :  { %v599_v8 = vsel %vm525_vm4, %v594_v10, %v598_v11 }
  0x97   :  { %4951 = vmatmul.mubr.msk.bf16.gmra.mxu1 %vm153_vm3, %v872_v13 }
  0x98   :  { %4954 = vmatprep.mubr.msk.bf16.mxu1 %vm5434_vm2, %v5433_v0 }
  0x99   :  { %4905 = vmatmul.mubr.msk.bf16.gmra.mxu0 %vm153_vm3, %v5630_v20  ;;  %v875_v20 = vrot.slane %v5386_v63, 2  ;;  %v1145_v63 = vrot.slane %v5394_v62, 3 }
  0x9a   :  { %4908 = vmatprep.mubr.msk.bf16.mxu0 %vm5434_vm2, %v5433_v0 }
  0x9b   :  { %v876_v12 = vsel %vm855_vm6, %v873_v3, %v875_v20 }
  0x9f   :  { %4955 = vmatmul.mubr.msk.bf16.gmra.mxu1 %vm153_vm3, %v874_v4 }
  0xa0   :  { %4958 = vmatprep.mubr.msk.bf16.mxu1 %vm5434_vm2, %v5433_v0 }
  0xa1   :  { %4909 = vmatmul.mubr.msk.bf16.gmra.mxu0 %vm153_vm3, %v5639_v24  ;;  %v602_v24 = vor.u32 %v600_v14, %v598_v11 }
  0xa2   :  { %4912 = vmatprep.mubr.msk.bf16.mxu0 %vm5434_vm2, %v5433_v0 }
  0xa7   :  { %4959 = vmatmul.mubr.msk.bf16.gmra.mxu1 %vm153_vm3, %v876_v12  ;;  %v5395_v12 = vld [vmem:[%s7132_s0 + $0x128] sm:$0xff]  }
  0xa8   :  { %4962 = vmatprep.mubr.msk.bf16.mxu1 %vm5434_vm2, %v5433_v0  ;;  %v1147_v21 = vrot.slane %v5395_v12, 3 }
  0xa9   :  { %4913 = vmatmul.mubr.msk.bf16.gmra.mxu0 %vm153_vm3, %v599_v8 }
  0xaa   :  { %4916 = vmatprep.mubr.msk.bf16.mxu0 %vm5434_vm2, %v5433_v0 }
  0xaf   :  { %4963 = vmatmul.mubr.msk.bf16.gmra.mxu1 %vm153_vm3, %v875_v20 }
  0xb0   :  { %5014 = vmatprep.mubr.msk.bf16.mxu1 %vm5434_vm2, %v5433_v0 }
  0xb1   :  { %4917 = vmatmul.mubr.msk.bf16.gmra.mxu0 %vm153_vm3, %v602_v24  ;;  %v1410_v24 = vshrl.u32 %v5837_v6, 16  ;;  %v1148_v6 = vsel %vm1133_vm7, %v1145_v63, %v1147_v21 }
  0xb2   :  { %4968 = vmatprep.mubr.msk.bf16.mxu0 %vm5434_vm2, %v5433_v0 }
  0xb7   :  { %5015 = vmatmul.mubr.msk.bf16.vlgmr.msra.gmra.mxu1 %vm153_vm3, %v5681_v47  ;;  %v1139_v47 = vrot.slane %v5391_v28, 3 }
  0xb8   :  { %5018 = vmatprep.mubr.msk.bf16.mxu1 %vm5434_vm2, %v5433_v0  ;;  %5105 = vmatpush3.bf16.msra.mxu1 %v2168_v26  ;;  %v1415_v26 = vrot.slane %v1413_v22, 3 }
  0xb9   :  { %4969 = vmatmul.mubr.msk.bf16.vlgmr.msra.gmra.mxu0 %vm153_vm3, %v1136_v29  ;;  %v1140_v34 = vsel %vm1133_vm7, %v1137_v32, %v1139_v47  ;;  %v5396_v32 = vld [vmem:[%s7132_s0 + $0x130] sm:$0xff]  }
  0xba   :  { %5059 = vmatpush3.bf16.msra.mxu0 %v1813_v31  ;;  %4972 = vmatprep.mubr.msk.bf16.mxu0 %vm5434_vm2, %v5433_v0 }
  0xbb   :  { %5150 = vmatprep.subr.bf16.mxu0 %v5433_v0 }
  0xbf   :  { %5019 = vmatmul.mubr.msk.bf16.gmra.mxu1 %vm153_vm3, %v5699_v56 }
  0xc0   :  { %5022 = vmatprep.mubr.msk.bf16.mxu1 %vm5434_vm2, %v5433_v0 }
  0xc1   :  { %4973 = vmatmul.mubr.msk.bf16.gmra.mxu0 %vm153_vm3, %v1138_v27 }
  0xc2   :  { %4976 = vmatprep.mubr.msk.bf16.mxu0 %vm5434_vm2, %v5433_v0 }
  0xc7   :  { %v434_v36 = vpop.f32.mrf.mxu1  ;;  %5023 = vmatmul.mubr.msk.bf16.gmra.mxu1 %vm153_vm3, %v5720_v5  ;;  %v1142_v5 = vsel %vm1133_vm7, %v1139_v47, %v1141_v39 }
  0xc8   :  { %5026 = vmatprep.mubr.msk.bf16.mxu1 %vm5434_vm2, %v5433_v0  ;;  %v225_v56 = vpop.f32.mrf.mxu0 }
  0xc9   :  { %4977 = vmatmul.mubr.msk.bf16.gmra.mxu0 %vm153_vm3, %v1140_v34  ;;  %v4832_v37 = vpop.f32.mrf.mxu1  ;;  %v5937_v38 = vadd.f32 %v434_v36, %v225_v56  ;;  %v1419_v34 = vshrl.u32 %v5851_v2, 16  ;;  %v5399_v2 = vld [vmem:[%s7132_s0 + $0xf0] ss:$0 sps:$4 sm:$0xff]  }
  0xca   :  { %4980 = vmatprep.mubr.msk.bf16.mxu0 %vm5434_vm2, %v5433_v0  ;;  %v4786_v43 = vpop.f32.mrf.mxu0 }
  0xcb   :  { %v437_v44 = vpop.f32.mrf.mxu1 }
  0xcc   :  { %v228_v45 = vpop.f32.mrf.mxu0 }
  0xcd   :  { %v4833_v46 = vpop.f32.mrf.mxu1  ;;  %v5941_v49 = vadd.f32 %v437_v44, %v228_v45  ;;  %v1421_v45 = vrot.slane %v1419_v34, 2 }
  0xce   :  { %v4787_v40 = vpop.f32.mrf.mxu0  ;;  %v1424_v46 = vrot.slane %v1422_v35, 3 }
  0xcf   :  { %v442_v51 = vpop.f32.mrf.mxu1  ;;  %5027 = vmatmul.mubr.msk.bf16.gmra.mxu1 %vm153_vm3, %v5738_v16  ;;  %v1144_v16 = vsel %vm1133_vm7, %v1141_v39, %v1143_v41  ;;  %v1149_v39 = vrot.slane %v5396_v32, 3 }
  0xd0   :  { %5030 = vmatprep.mubr.msk.bf16.mxu1 %vm5434_vm2, %v5433_v0  ;;  %v233_v52 = vpop.f32.mrf.mxu0 }
  0xd1   :  { %4981 = vmatmul.mubr.msk.bf16.gmra.mxu0 %vm153_vm3, %v1142_v5  ;;  %v4836_v57 = vpop.f32.mrf.mxu1  ;;  %v5952_v54 = vadd.f32 %v442_v51, %v233_v52  ;;  %v1150_v51 = vsel %vm1133_vm7, %v1147_v21, %v1149_v39  ;;  %v5397_v52 = vld [vmem:[%s7132_s0 + $0x138] sm:$0xff]  }
  0xd2   :  { %4984 = vmatprep.mubr.msk.bf16.mxu0 %vm5434_vm2, %v5433_v0  ;;  %v4790_v59 = vpop.f32.mrf.mxu0  ;;  %v1151_v62 = vrot.slane %v5397_v52, 3 }
  0xd3   :  { %v445_v42 = vpop.f32.mrf.mxu1  ;;  %v1428_v59 = vshrl.u32 %v5399_v2, 16 }
  0xd4   :  { %v236_v60 = vpop.f32.mrf.mxu0 }
  0xd5   :  { %v4837_v61 = vpop.f32.mrf.mxu1  ;;  %v5956_v58 = vadd.f32 %v445_v42, %v236_v60  ;;  %v1431_v42 = vshll.u32 %v5399_v2, 16 }
  0xd6   :  { %v4791_v1 = vpop.f32.mrf.mxu0 }
  0xd7   :  { %v450_v13 = vpop.f32.mrf.mxu1  ;;  %5031 = vmatmul.mubr.msk.bf16.gmra.mxu1 %vm153_vm3, %v5760_v33  ;;  %v1146_v33 = vsel %vm1133_vm7, %v1143_v41, %v1145_v63  ;;  %v1433_v63 = vrot.slane %v1431_v42, 3 }
  0xd8   :  { %5034 = vmatprep.mubr.msk.bf16.mxu1 %vm5434_vm2, %v5433_v0  ;;  %v241_v3 = vpop.f32.mrf.mxu0 }
  0xd9   :  { %4985 = vmatmul.mubr.msk.bf16.gmra.mxu0 %vm153_vm3, %v1144_v16  ;;  %v4840_v15 = vpop.f32.mrf.mxu1  ;;  %v5967_v4 = vadd.f32 %v450_v13, %v241_v3 }
  0xda   :  { %4988 = vmatprep.mubr.msk.bf16.mxu0 %vm5434_vm2, %v5433_v0  ;;  %v4794_v7 = vpop.f32.mrf.mxu0  ;;  %v1430_v15 = vrot.slane %v1428_v59, 2 }
  0xdb   :  { %v453_v9 = vpop.f32.mrf.mxu1 }
  0xdc   :  { %v244_v20 = vpop.f32.mrf.mxu0 }
  0xdd   :  { %v4841_v10 = vpop.f32.mrf.mxu1  ;;  %v5971_v11 = vadd.f32 %v453_v9, %v244_v20 }
  0xde   :  { %v4795_v8 = vpop.f32.mrf.mxu0  ;;  %v1152_v10 = vsel %vm1133_vm7, %v1149_v39, %v1151_v62 }
  0xdf   :  { %v458_v14 = vpop.f32.mrf.mxu1  ;;  %5035 = vmatmul.mubr.msk.bf16.gmra.mxu1 %vm153_vm3, %v5781_v48  ;;  %v1412_v48 = vrot.slane %v1410_v24, 2 }
  0xe0   :  { %5038 = vmatprep.mubr.msk.bf16.mxu1 %vm5434_vm2, %v5433_v0  ;;  %v249_v17 = vpop.f32.mrf.mxu0 }
  0xe1   :  { %4989 = vmatmul.mubr.msk.bf16.gmra.mxu0 %vm153_vm3, %v1146_v33  ;;  %v4844_v18 = vpop.f32.mrf.mxu1  ;;  %v5984_v19 = vadd.f32 %v458_v14, %v249_v17  ;;  %v1416_v47 = vor.u32 %v1415_v26, %v1412_v48  ;;  %v5398_v33 = vld [vmem:[%s7132_s0 + $0x140] ss:$0 sps:$4 sm:$0xff]   ;;  %v1434_v14 = vor.u32 %v1433_v63, %v1430_v15  ;;  %v6045_v48 = vld [vmem:[%s7132_s0 + $0x8] sm:$0xf] }
  0xe2   :  { %4992 = vmatprep.mubr.msk.bf16.mxu0 %vm5434_vm2, %v5433_v0  ;;  %v4798_v23 = vpop.f32.mrf.mxu0  ;;  %v1153_v18 = vrot.slane %v5398_v33, 3 }
  0xe3   :  { %v461_v25 = vpop.f32.mrf.mxu1  ;;  %v1417_v44 = vsel %vm1337_vm5, %v5789_v53, %v1416_v47  ;;  %v1425_v53 = vor.u32 %v1424_v46, %v1421_v45  ;;  %v6069_v46 = vld [vmem:[%s7132_s0 + $0xc] sm:$0xff]  }
  0xe4   :  { %v252_v29 = vpop.f32.mrf.mxu0 }
  0xe5   :  { %v4845_v30 = vpop.f32.mrf.mxu1  ;;  %v5988_v31 = vadd.f32 %v461_v25, %v252_v29  ;;  %v1426_v3 = vsel %vm1337_vm5, %v1416_v47, %v1425_v53  ;;  %v1617_v25 = vld [vmem:[%s7132_s0 + $0x4] sm:$0xf]  ;;  %v1435_v26 = vsel %vm1337_vm5, %v1425_v53, %v1434_v14  ;;  %v5403_v29 = vld [vmem:[%s7132_s0 + $0x54] sm:$0xfe]  }
  0xe6   :  { %v4799_v27 = vpop.f32.mrf.mxu0  ;;  %v5404_v30 = vld [vmem:[%s7132_s0 + $0x5c] sm:$0xff]   ;;  %v4433_v47 = vcombine.low %v1617_v25, %v6045_v48  ;;  %v5406_v53 = vld [vmem:[%s7132_s0 + $0x64] sm:$0xff]  }
  0xe7   :  { %v466_v28 = vpop.f32.mrf.mxu1  ;;  %5039 = vmatmul.mubr.msk.bf16.gmra.mxu1 %vm153_vm3, %v5797_v55  ;;  %v2041_v39 = vshrl.u32 %v5404_v30, 16 }
  0xe8   :  { %5042 = vmatprep.mubr.msk.bf16.mxu1 %vm5434_vm2, %v5433_v0  ;;  %v257_v36 = vpop.f32.mrf.mxu0  ;;  %v1695_v2 = vshll.u32 %v4433_v47, 16 }
  0xe9   :  { %4993 = vmatmul.mubr.msk.bf16.gmra.mxu0 %vm153_vm3, %v1148_v6  ;;  %v4848_v56 = vpop.f32.mrf.mxu1  ;;  %v6001_v37 = vadd.f32 %v466_v28, %v257_v36  ;;  %v1154_v28 = vsel %vm1133_vm7, %v1151_v62, %v1153_v18  ;;  %v2033_v36 = vshrl.u32 %v5403_v29, 16 }
  0xea   :  { %4996 = vmatprep.mubr.msk.bf16.mxu0 %vm5434_vm2, %v5433_v0  ;;  %v4802_v43 = vpop.f32.mrf.mxu0  ;;  %v2036_v56 = vshll.u32 %v5403_v29, 16  ;;  %v1697_v62 = vrot.slane %v1695_v2, 1  ;;  %v5408_v29 = vld [vmem:[%s7132_s0 + $0x6c] sm:$0xff]  }
  0xeb   :  { %v469_v55 = vpop.f32.mrf.mxu1  ;;  %v2044_v43 = vshll.u32 %v5404_v30, 16 }
  0xec   :  { %v260_v5 = vpop.f32.mrf.mxu0  ;;  %v2038_v52 = vrot.slane %v2036_v56, 2 }
  0xed   :  { %v4849_v50 = vpop.f32.mrf.mxu1  ;;  %v6010_v40 = vadd.f32 %v469_v55, %v260_v5 }
  0xee   :  { %v4803_v57 = vpop.f32.mrf.mxu0 }
  0xef   :  { %v474_v41 = vpop.f32.mrf.mxu1  ;;  %5043 = vmatmul.mubr.msk.bf16.gmra.mxu1 %vm153_vm3, %v1417_v44  ;;  %v2043_v57 = vrot.slane %v2041_v39, 1 }
  0xf0   :  { %5046 = vmatprep.mubr.msk.bf16.mxu1 %vm5434_vm2, %v5433_v0  ;;  %v265_v60 = vpop.f32.mrf.mxu0 }
  0xf1   :  { %4997 = vmatmul.mubr.msk.bf16.gmra.mxu0 %vm153_vm3, %v1150_v51  ;;  %v4852_v61 = vpop.f32.mrf.mxu1  ;;  %v6020_v16 = vadd.f32 %v474_v41, %v265_v60  ;;  %v2035_v51 = vrot.slane %v2033_v36, 1  ;;  %v2046_v41 = vrot.slane %v2044_v43, 2  ;;  %v2059_v43 = vshrl.u32 %v5408_v29, 16 }
  0xf2   :  { %5000 = vmatprep.mubr.msk.bf16.mxu0 %vm5434_vm2, %v5433_v0  ;;  %v4806_v1 = vpop.f32.mrf.mxu0  ;;  %v1693_v61 = vshrl.u32 %v4433_v47, 16  ;;  %v1704_v47 = vshrl.u32 %v6069_v46, 16 }
  0xf3   :  { %v477_v13 = vpop.f32.mrf.mxu1  ;;  %v1700_v1 = vshll.u32 %v6069_v46, 16  ;;  %v2039_v15 = vor.u32 %v2038_v52, %v2035_v51  ;;  %v2047_v63 = vor.u32 %v2046_v41, %v2043_v57  ;;  %v6114_v52 = vld [vmem:[%s7132_s0 + $0x1c] sm:$0xff]  }
  0xf4   :  { %v268_v7 = vpop.f32.mrf.mxu0 }
  0xf5   :  { %v4853_v9 = vpop.f32.mrf.mxu1  ;;  %v6025_v20 = vadd.f32 %v477_v13, %v268_v7  ;;  %v2050_v7 = vshrl.u32 %v5406_v53, 16 }
  0xf6   :  { %v4807_v12 = vpop.f32.mrf.mxu0  ;;  %v2053_v9 = vshll.u32 %v5406_v53, 16 }
  0xf7   :  { %v482_v8 = vpop.f32.mrf.mxu1  ;;  %5047 = vmatmul.mubr.msk.bf16.gmra.mxu1 %vm153_vm3, %v1426_v3  ;;  %v2052_v25 = vrot.slane %v2050_v7, 1  ;;  %v1716_v7 = vshll.u32 %v6114_v52, 16 }
  0xf8   :  { %5050 = vmatprep.mubr.msk.bf16.mxu1 %vm5434_vm2, %v5433_v0  ;;  %v273_v24 = vpop.f32.mrf.mxu0 }
  0xf9   :  { %5001 = vmatmul.mubr.msk.bf16.gmra.mxu0 %vm153_vm3, %v1152_v10  ;;  %v4856_v22 = vpop.f32.mrf.mxu1  ;;  %v6035_v17 = vadd.f32 %v482_v8, %v273_v24  ;;  %v1698_v8 = vor.u32 %v1697_v62, %v1693_v61  ;;  %v1702_v24 = vrot.slane %v1700_v1, 1  ;;  %v5410_v61 = vld [vmem:[%s7132_s0 + $0x74] sm:$0xff]  }
  0xfa   :  { %5004 = vmatprep.mubr.msk.bf16.mxu0 %vm5434_vm2, %v5433_v0  ;;  %v4810_v21 = vpop.f32.mrf.mxu0 }
  0xfb   :  { %v485_v23 = vpop.f32.mrf.mxu1 }
  0xfc   :  { %v276_v6 = vpop.f32.mrf.mxu0 }
  0xfd   :  { %v4857_v32 = vpop.f32.mrf.mxu1  ;;  %v6054_v27 = vadd.f32 %v485_v23, %v276_v6  ;;  %v2048_v23 = vsel %vm2031_vm8, %v2039_v15, %v2047_v63 }
  0xfe   :  { %v4811_v34 = vpop.f32.mrf.mxu0 }
  0xff   :  { %v490_v35 = vpop.f32.mrf.mxu1  ;;  %5051 = vmatmul.mubr.msk.bf16.gmra.mxu1 %vm153_vm3, %v1435_v26  ;;  %v2055_v26 = vrot.slane %v2053_v9, 2 }
 0x100   :  { %5054 = vmatprep.mubr.msk.bf16.mxu1 %vm5434_vm2, %v5433_v0  ;;  %v281_v55 = vpop.f32.mrf.mxu0 }
 0x101   :  { %5005 = vmatmul.mubr.msk.bf16.gmra.mxu0 %vm153_vm3, %v1154_v28  ;;  %v4860_v44 = vpop.f32.mrf.mxu1  ;;  %v6062_v45 = vadd.f32 %v490_v35, %v281_v55  ;;  %v1703_v28 = vsel %vm525_vm4, %v1698_v8, %v1702_v24  ;;  %v2056_v39 = vor.u32 %v2055_v26, %v2052_v25  ;;  %v2062_v55 = vshll.u32 %v5408_v29, 16  ;;  %v6136_v25 = vld [vmem:[%s7132_s0 + $0x24] sm:$0xff]  }
 0x102   :  { %5008 = vmatprep.mubr.msk.bf16.mxu0 %vm5434_vm2, %v5433_v0  ;;  %v4814_v5 = vpop.f32.mrf.mxu0  ;;  %v2071_v8 = vshll.u32 %v5410_v61, 16 }
 0x103   :  { %v493_v50 = vpop.f32.mrf.mxu1  ;;  %v2057_v53 = vsel %vm2031_vm8, %v2047_v63, %v2056_v39 }
 0x104   :  { %v284_v59 = vpop.f32.mrf.mxu0 }
 0x105   :  { %v4861_v42 = vpop.f32.mrf.mxu1  ;;  %v6074_v60 = vadd.f32 %v493_v50, %v284_v59  ;;  %v1706_v50 = vor.u32 %v1704_v47, %v1702_v24  ;;  %v2061_v59 = vrot.slane %v2059_v43, 1  ;;  %v5412_v47 = vld [vmem:[%s7132_s0 + $0x7c] sm:$0xff]   ;;  %v1724_v43 = vshll.u32 %v6136_v25, 16 }
 0x106   :  { %v4815_v13 = vpop.f32.mrf.mxu0  ;;  %v2064_v42 = vrot.slane %v2062_v55, 2 }
 0x107   :  { %v498_v3 = vpop.f32.mrf.mxu1  ;;  %5055 = vmatmul.mubr.msk.bf16.gmra.mxu1 %vm153_vm3, %v1434_v14  ;;  %v6088_v14 = vld [vmem:[%s7132_s0 + $0x14] sm:$0xff]  }
 0x108   :  { %5106 = vmatprep.mubr.msk.bf16.mxu1 %vm5434_vm2, %v5433_v0  ;;  %v289_v10 = vpop.f32.mrf.mxu0  ;;  %v1708_v34 = vshll.u32 %v6088_v14, 16  ;;  %v1712_v15 = vshrl.u32 %v6088_v14, 16  ;;  %v2065_v63 = vor.u32 %v2064_v42, %v2061_v59  ;;  %v1726_v59 = vrot.slane %v1724_v43, 1  ;;  %v6155_v42 = vld [vmem:[%s7132_s0 + $0x2c] sm:$0xff]  }
 0x109   :  { %5009 = vmatmul.mubr.msk.bf16.gmra.mxu0 %vm153_vm3, %v1153_v18  ;;  %v4864_v33 = vpop.f32.mrf.mxu1  ;;  %v6081_v12 = vadd.f32 %v498_v3, %v289_v10  ;;  %v2312_v18 = vld [vmem:[%s7131_s1 + $0x10] sm:$0x3] }
 0x10a   :  { %5060 = vmatprep.mubr.msk.bf16.mxu0 %vm5434_vm2, %v5433_v0  ;;  %v4818_v22 = vpop.f32.mrf.mxu0  ;;  %v2371_v56 = vsel %vm187_vm0, %v2312_v18, 0  ;;  %v1710_v51 = vrot.slane %v1708_v34, 1  ;;  %v2068_v33 = vshrl.u32 %v5410_v61, 16  ;;  %vm4301_vm0 = vcmask 261120  }
 0x10b   :  { %v501_v21 = vpop.f32.mrf.mxu1 }
 0x10c   :  { %v292_v30 = vpop.f32.mrf.mxu0  ;;  %v1711_v3 = vsel %vm525_vm4, %v1706_v50, %v1710_v51  ;;  %v1714_v18 = vor.u32 %v1712_v15, %v1710_v51  ;;  %v2080_v50 = vshll.u32 %v5412_v47, 16 }
 0x10d   :  { %v4865_v6 = vpop.f32.mrf.mxu1  ;;  %v6097_v32 = vadd.f32 %v501_v21, %v292_v30  ;;  %v2066_v30 = vsel %vm2031_vm8, %v2056_v39, %v2065_v63 }
 0x10e   :  { %v4819_v35 = vpop.f32.mrf.mxu0  ;;  %v2070_v6 = vrot.slane %v2068_v33, 1 }
 0x10f   :  { %v506_v36 = vpop.f32.mrf.mxu1  ;;  %5107 = vmatmul.mubr.msk.bf16.vlgmr.msra.gmra.mxu1 %vm153_vm3, %v2048_v23  ;;  %v1718_v23 = vrot.slane %v1716_v7, 1  ;;  %v2082_v7 = vrot.slane %v2080_v50, 2 }
 0x110   :  { %5110 = vmatprep.mubr.msk.bf16.mxu1 %vm5434_vm2, %v5433_v0  ;;  %v297_v44 = vpop.f32.mrf.mxu0 }
 0x111   :  { %5061 = vmatmul.mubr.msk.bf16.vlgmr.msra.gmra.mxu0 %vm153_vm3, %v1703_v28  ;;  %v4868_v2 = vpop.f32.mrf.mxu1  ;;  %v6107_v5 = vadd.f32 %v506_v36, %v297_v44  ;;  %v2073_v28 = vrot.slane %v2071_v8, 2  ;;  %v1719_v36 = vsel %vm525_vm4, %v1714_v18, %v1718_v23 }
 0x112   :  { %5151 = vmatpush3.bf16.msra.mxu0 %v2371_v56  ;;  %5064 = vmatprep.mubr.msk.bf16.mxu0 %vm5434_vm2, %v5433_v0  ;;  %v4822_v57 = vpop.f32.mrf.mxu0  ;;  %v1720_v56 = vshrl.u32 %v6114_v52, 16  ;;  %v2077_v2 = vshrl.u32 %v5412_v47, 16 }
 0x113   :  { %v509_v41 = vpop.f32.mrf.mxu1  ;;  %v2074_v39 = vor.u32 %v2073_v28, %v2070_v6 }
 0x114   :  { %v300_v62 = vpop.f32.mrf.mxu0  ;;  %v2079_v15 = vrot.slane %v2077_v2, 1 }
 0x115   :  { %v4869_v1 = vpop.f32.mrf.mxu1  ;;  %v6120_v13 = vadd.f32 %v509_v41, %v300_v62 }
 0x116   :  { %v4823_v9 = vpop.f32.mrf.mxu0 }
 0x117   :  { %v514_v10 = vpop.f32.mrf.mxu1  ;;  %5111 = vmatmul.mubr.msk.bf16.gmra.mxu1 %vm153_vm3, %v2057_v53  ;;  %v1722_v53 = vor.u32 %v1720_v56, %v1718_v23 }
 0x118   :  { %5114 = vmatprep.mubr.msk.bf16.mxu1 %vm5434_vm2, %v5433_v0  ;;  %v305_v24 = vpop.f32.mrf.mxu0 }
 0x119   :  { %5065 = vmatmul.mubr.msk.bf16.gmra.mxu0 %vm153_vm3, %v1711_v3  ;;  %v4872_v22 = vpop.f32.mrf.mxu1  ;;  %v6129_v21 = vadd.f32 %v514_v10, %v305_v24  ;;  %v2075_v3 = vsel %vm2031_vm8, %v2065_v63, %v2074_v39  ;;  %v1727_v8 = vsel %vm525_vm4, %v1722_v53, %v1726_v59  ;;  %v1728_v24 = vshrl.u32 %v6136_v25, 16 }
 0x11a   :  { %5068 = vmatprep.mubr.msk.bf16.mxu0 %vm5434_vm2, %v5433_v0  ;;  %v4826_v26 = vpop.f32.mrf.mxu0  ;;  %v1732_v22 = vshll.u32 %v6155_v42, 16  ;;  %v1736_v53 = vshrl.u32 %v6155_v42, 16 }
 0x11b   :  { %v517_v29 = vpop.f32.mrf.mxu1  ;;  %v2083_v26 = vor.u32 %v2082_v7, %v2079_v15  ;;  %v1730_v47 = vor.u32 %v1728_v24, %v1726_v59 }
 0x11c   :  { %v308_v34 = vpop.f32.mrf.mxu0 }
 0x11d   :  { %v4873_v35 = vpop.f32.mrf.mxu1  ;;  %v1734_v34 = vrot.slane %v1732_v22, 1 }
 0x11e   :  { %v4827_v55 = vpop.f32.mrf.mxu0  ;;  %v6179_v35 = vld [vmem:[%s7132_s0 + $0x34] sm:$0xff]  }
 0x11f   :  { %v951_v44 = vpop.f32.mrf.mxu1  ;;  %5115 = vmatmul.mubr.msk.bf16.gmra.mxu1 %vm153_vm3, %v2066_v30  ;;  %v2084_v55 = vsel %vm2031_vm8, %v2074_v39, %v2083_v26  ;;  %v1740_v59 = vshll.u32 %v6179_v35, 16 }
 0x120   :  { %5118 = vmatprep.mubr.msk.bf16.mxu1 %vm5434_vm2, %v5433_v0 }
 0x121   :  { %v673_v51 = vpop.f32.mrf.mxu0  ;;  %5069 = vmatmul.mubr.msk.bf16.gmra.mxu0 %vm153_vm3, %v1719_v36  ;;  %v4924_v57 = vpop.f32.mrf.mxu1 }
 0x122   :  { %v759_v41 = vadd.f32 %v673_v51, %v5937_v38  ;;  %5072 = vmatprep.mubr.msk.bf16.mxu0 %vm5434_vm2, %v5433_v0  ;;  %v5414_v38 = vld [vmem:[%s7132_s0 + $0x84] sm:$0xff]  }
 0x123   :  { %v4878_v61 = vpop.f32.mrf.mxu0  ;;  %v954_v62 = vpop.f32.mrf.mxu1  ;;  %v2086_v29 = vshrl.u32 %v5414_v38, 16  ;;  %v2089_v30 = vshll.u32 %v5414_v38, 16 }
 0x124   :  { %v6157_v1 = vadd.f32 %v951_v44, %v759_v41  ;;  %v1735_v41 = vsel %vm525_vm4, %v1730_v47, %v1734_v34 }
 0x125   :  { %v676_v9 = vpop.f32.mrf.mxu0  ;;  %v4925_v10 = vpop.f32.mrf.mxu1  ;;  %v2088_v44 = vrot.slane %v2086_v29, 1  ;;  %v2091_v2 = vrot.slane %v2089_v30, 2 }
 0x126   :  { %v760_v33 = vadd.f32 %v676_v9, %v5941_v49  ;;  %v1738_v10 = vor.u32 %v1736_v53, %v1734_v34  ;;  %v1744_v34 = vshrl.u32 %v6179_v35, 16  ;;  %v6227_v53 = vld [vmem:[%s7132_s0 + $0x44] sm:$0xff]  }
 0x127   :  { %v4879_v18 = vpop.f32.mrf.mxu0  ;;  %v959_v23 = vpop.f32.mrf.mxu1  ;;  %5119 = vmatmul.mubr.msk.bf16.gmra.mxu1 %vm153_vm3, %v2075_v3  ;;  %v2092_v3 = vor.u32 %v2091_v2, %v2088_v44 }
 0x128   :  { %v6168_v63 = vadd.f32 %v954_v62, %v760_v33  ;;  %5122 = vmatprep.mubr.msk.bf16.mxu1 %vm5434_vm2, %v5433_v0  ;;  %v1742_v33 = vrot.slane %v1740_v59, 1 }
 0x129   :  { %v681_v6 = vpop.f32.mrf.mxu0  ;;  %5073 = vmatmul.mubr.msk.bf16.gmra.mxu0 %vm153_vm3, %v1727_v8  ;;  %v4928_v49 = vpop.f32.mrf.mxu1  ;;  %v6203_v8 = vld [vmem:[%s7132_s0 + $0x3c] sm:$0xff]  }
 0x12a   :  { %v761_v28 = vadd.f32 %v681_v6, %v5952_v54  ;;  %5076 = vmatprep.mubr.msk.bf16.mxu0 %vm5434_vm2, %v5433_v0  ;;  %v5416_v54 = vld [vmem:[%s7132_s0 + $0x8c] sm:$0xff]   ;;  %v1743_v47 = vsel %vm525_vm4, %v1738_v10, %v1742_v33 }
 0x12b   :  { %v4882_v36 = vpop.f32.mrf.mxu0  ;;  %v962_v56 = vpop.f32.mrf.mxu1  ;;  %v2095_v15 = vshrl.u32 %v5416_v54, 16  ;;  %v2098_v7 = vshll.u32 %v5416_v54, 16 }
 0x12c   :  { %v6181_v43 = vadd.f32 %v959_v23, %v761_v28  ;;  %v2093_v23 = vsel %vm2031_vm8, %v2083_v26, %v2092_v3  ;;  %v1748_v36 = vshll.u32 %v6203_v8, 16 }
 0x12d   :  { %v684_v50 = vpop.f32.mrf.mxu0  ;;  %v4929_v51 = vpop.f32.mrf.mxu1  ;;  %v2097_v29 = vrot.slane %v2095_v15, 1  ;;  %v2100_v30 = vrot.slane %v2098_v7, 2 }
 0x12e   :  { %v762_v57 = vadd.f32 %v684_v50, %v5956_v58 }
 0x12f   :  { %v4883_v61 = vpop.f32.mrf.mxu0  ;;  %v967_v62 = vpop.f32.mrf.mxu1  ;;  %5123 = vmatmul.mubr.msk.bf16.gmra.mxu1 %vm153_vm3, %v2084_v55  ;;  %v2101_v44 = vor.u32 %v2100_v30, %v2097_v29 }
 0x130   :  { %v6192_v39 = vadd.f32 %v962_v56, %v762_v57  ;;  %5126 = vmatprep.mubr.msk.bf16.mxu1 %vm5434_vm2, %v5433_v0  ;;  %v1746_v57 = vor.u32 %v1744_v34, %v1742_v33 }
 0x131   :  { %v689_v38 = vpop.f32.mrf.mxu0  ;;  %5077 = vmatmul.mubr.msk.bf16.gmra.mxu0 %vm153_vm3, %v1735_v41  ;;  %v4932_v58 = vpop.f32.mrf.mxu1  ;;  %v1750_v41 = vrot.slane %v1748_v36, 1  ;;  %v2102_v15 = vsel %vm2031_vm8, %v2092_v3, %v2101_v44  ;;  %v6251_v36 = vld [vmem:[%s7132_s0 + $0x4c] sm:$0xff]  }
 0x132   :  { %v763_v9 = vadd.f32 %v689_v38, %v5967_v4  ;;  %5080 = vmatprep.mubr.msk.bf16.mxu0 %vm5434_vm2, %v5433_v0  ;;  %v5418_v4 = vld [vmem:[%s7132_s0 + $0x94] sm:$0xff]  }
 0x133   :  { %v4886_v24 = vpop.f32.mrf.mxu0  ;;  %v970_v22 = vpop.f32.mrf.mxu1  ;;  %v2104_v2 = vshrl.u32 %v5418_v4, 16  ;;  %v2107_v54 = vshll.u32 %v5418_v4, 16  ;;  %v1751_v33 = vsel %vm525_vm4, %v1746_v57, %v1750_v41 }
 0x134   :  { %v6205_v18 = vadd.f32 %v967_v62, %v763_v9  ;;  %v1752_v24 = vshrl.u32 %v6203_v8, 16 }
 0x135   :  { %v692_v6 = vpop.f32.mrf.mxu0  ;;  %v4933_v49 = vpop.f32.mrf.mxu1  ;;  %v2106_v7 = vrot.slane %v2104_v2, 1  ;;  %v2109_v38 = vrot.slane %v2107_v54, 2 }
 0x136   :  { %v764_v28 = vadd.f32 %v692_v6, %v5971_v11 }
 0x137   :  { %v4887_v56 = vpop.f32.mrf.mxu0  ;;  %v975_v55 = vpop.f32.mrf.mxu1  ;;  %5127 = vmatmul.mubr.msk.bf16.gmra.mxu1 %vm153_vm3, %v2093_v23  ;;  %v2110_v30 = vor.u32 %v2109_v38, %v2106_v7 }
 0x138   :  { %v6216_v26 = vadd.f32 %v970_v22, %v764_v28  ;;  %5130 = vmatprep.mubr.msk.bf16.mxu1 %vm5434_vm2, %v5433_v0  ;;  %v1756_v22 = vshll.u32 %v6227_v53, 16 }
 0x139   :  { %v697_v50 = vpop.f32.mrf.mxu0  ;;  %5081 = vmatmul.mubr.msk.bf16.gmra.mxu0 %vm153_vm3, %v1743_v47  ;;  %v4936_v11 = vpop.f32.mrf.mxu1  ;;  %v1754_v47 = vor.u32 %v1752_v24, %v1750_v41  ;;  %v2111_v54 = vsel %vm2031_vm8, %v2101_v44, %v2110_v30 }
 0x13a   :  { %v765_v51 = vadd.f32 %v697_v50, %v5984_v19  ;;  %5084 = vmatprep.mubr.msk.bf16.mxu0 %vm5434_vm2, %v5433_v0  ;;  %v5420_v19 = vld [vmem:[%s7132_s0 + $0x9c] sm:$0xff]   ;;  %v1758_v34 = vrot.slane %v1756_v22, 1 }
 0x13b   :  { %v4890_v59 = vpop.f32.mrf.mxu0  ;;  %v978_v61 = vpop.f32.mrf.mxu1  ;;  %v2113_v4 = vshrl.u32 %v5420_v19, 16  ;;  %v2116_v6 = vshll.u32 %v5420_v19, 16 }
 0x13c   :  { %v6229_v62 = vadd.f32 %v975_v55, %v765_v51  ;;  %v1759_v59 = vsel %vm525_vm4, %v1754_v47, %v1758_v34 }
 0x13d   :  { %v700_v58 = vpop.f32.mrf.mxu0  ;;  %v4937_v9 = vpop.f32.mrf.mxu1  ;;  %v2115_v50 = vrot.slane %v2113_v4, 1  ;;  %v2118_v11 = vrot.slane %v2116_v6, 2 }
 0x13e   :  { %v766_v10 = vadd.f32 %v700_v58, %v5988_v31 }
 0x13f   :  { %v4891_v23 = vpop.f32.mrf.mxu0  ;;  %v983_v29 = vpop.f32.mrf.mxu1  ;;  %5131 = vmatmul.mubr.msk.bf16.gmra.mxu1 %vm153_vm3, %v2102_v15  ;;  %v1764_v15 = vshll.u32 %v6251_v36, 16  ;;  %v2119_v19 = vor.u32 %v2118_v11, %v2115_v50 }
 0x140   :  { %v6240_v3 = vadd.f32 %v978_v61, %v766_v10  ;;  %5134 = vmatprep.mubr.msk.bf16.mxu1 %vm5434_vm2, %v5433_v0  ;;  %v1760_v61 = vshrl.u32 %v6227_v53, 16  ;;  %v6275_v23 = vld [vmem:[%s7132_s0 + $0x54] ss:$0 sps:$4 sm:$0x33]  }
 0x141   :  { %v705_v49 = vpop.f32.mrf.mxu0  ;;  %5085 = vmatmul.mubr.msk.bf16.gmra.mxu0 %vm153_vm3, %v1751_v33  ;;  %v4940_v31 = vpop.f32.mrf.mxu1  ;;  %v1766_v22 = vrot.slane %v1764_v15, 1 }
 0x142   :  { %v767_v28 = vadd.f32 %v705_v49, %v6001_v37  ;;  %5088 = vmatprep.mubr.msk.bf16.mxu0 %vm5434_vm2, %v5433_v0  ;;  %v5422_v37 = vld [vmem:[%s7132_s0 + $0xa4] ss:$0 sps:$4 sm:$0x77]   ;;  %v1762_v24 = vor.u32 %v1760_v61, %v1758_v34  ;;  %v2120_v49 = vsel %vm2031_vm8, %v2110_v30, %v2119_v19 }
 0x143   :  { %v4894_v56 = vpop.f32.mrf.mxu0  ;;  %v986_v55 = vpop.f32.mrf.mxu1  ;;  %v2122_v58 = vshrl.u32 %v5422_v37, 16  ;;  %v2125_v9 = vshll.u32 %v5422_v37, 16 }
 0x144   :  { %v6253_v2 = vadd.f32 %v983_v29, %v767_v28  ;;  %v1767_v34 = vsel %vm525_vm4, %v1762_v24, %v1766_v22 }
 0x145   :  { %v708_v51 = vpop.f32.mrf.mxu0  ;;  %v4941_v57 = vpop.f32.mrf.mxu1  ;;  %v2124_v31 = vrot.slane %v2122_v58, 1  ;;  %v2127_v28 = vrot.slane %v2125_v9, 2 }
 0x146   :  { %v768_v41 = vadd.f32 %v708_v51, %v6010_v40 }
 0x147   :  { %v4895_v7 = vpop.f32.mrf.mxu0  ;;  %v991_v38 = vpop.f32.mrf.mxu1  ;;  %5135 = vmatmul.mubr.msk.bf16.gmra.mxu1 %vm153_vm3, %v2111_v54  ;;  %v1772_v54 = vshll.u32 %v6275_v23, 16  ;;  %v2128_v30 = vor.u32 %v2127_v28, %v2124_v31  ;;  %v2311_v31 = vld [vmem:[%s7132_s0 + $0x4] sm:$0xe] }
 0x148   :  { %v6264_v44 = vadd.f32 %v986_v55, %v768_v41  ;;  %5138 = vmatprep.mubr.msk.bf16.mxu1 %vm5434_vm2, %v5433_v0  ;;  %v1768_v55 = vshrl.u32 %v6251_v36, 16 }
 0x149   :  { %v713_v10 = vpop.f32.mrf.mxu0  ;;  %5089 = vmatmul.mubr.msk.bf16.gmra.mxu0 %vm153_vm3, %v1759_v59  ;;  %v4944_v40 = vpop.f32.mrf.mxu1  ;;  %v1774_v59 = vrot.slane %v1772_v54, 1 }
 0x14a   :  { %v769_v33 = vadd.f32 %v713_v10, %v6020_v16  ;;  %5092 = vmatprep.mubr.msk.bf16.mxu0 %vm5434_vm2, %v5433_v0  ;;  %v1770_v41 = vor.u32 %v1768_v55, %v1766_v22  ;;  %v4478_v55 = vcombine.low %v2311_v31, %v6045_v48 }
 0x14b   :  { %v4898_v29 = vpop.f32.mrf.mxu0  ;;  %v994_v4 = vpop.f32.mrf.mxu1 }
 0x14c   :  { %v6277_v6 = vadd.f32 %v991_v38, %v769_v33  ;;  %v2129_v38 = vsel %vm2031_vm8, %v2119_v19, %v2128_v30  ;;  %v1775_v40 = vsel %vm525_vm4, %v1770_v41, %v1774_v59  ;;  %v1776_v19 = vshrl.u32 %v6275_v23, 16 }
 0x14d   :  { %v716_v47 = vpop.f32.mrf.mxu0  ;;  %v4945_v16 = vpop.f32.mrf.mxu1 }
 0x14e   :  { %v770_v56 = vadd.f32 %v716_v47, %v6025_v20 }
 0x14f   :  { %v4899_v50 = vpop.f32.mrf.mxu0  ;;  %v999_v11 = vpop.f32.mrf.mxu1  ;;  %5139 = vmatmul.mubr.msk.bf16.gmra.mxu1 %vm153_vm3, %v2120_v49 }
 0x150   :  { %v6285_v37 = vadd.f32 %v994_v4, %v770_v56  ;;  %5142 = vmatprep.mubr.msk.bf16.mxu1 %vm5434_vm2, %v5433_v0  ;;  %v1778_v56 = vor.u32 %v1776_v19, %v1774_v59 }
 0x151   :  { %v721_v51 = vpop.f32.mrf.mxu0  ;;  %5093 = vmatmul.mubr.msk.bf16.gmra.mxu0 %vm153_vm3, %v1767_v34  ;;  %v4948_v20 = vpop.f32.mrf.mxu1 }
 0x152   :  { %v771_v57 = vadd.f32 %v721_v51, %v6035_v17  ;;  %5096 = vmatprep.mubr.msk.bf16.mxu0 %vm5434_vm2, %v5433_v0 }
 0x153   :  { %v4902_v61 = vpop.f32.mrf.mxu0  ;;  %v1002_v15 = vpop.f32.mrf.mxu1 }
 0x154   :  { %v6293_v7 = vadd.f32 %v999_v11, %v771_v57  ;;  %v2316_v57 = vrot.slane %v4478_v55, 1 }
 0x155   :  { %v724_v58 = vpop.f32.mrf.mxu0  ;;  %v4949_v9 = vpop.f32.mrf.mxu1 }
 0x156   :  { %v772_v10 = vadd.f32 %v724_v58, %v6054_v27 }
 0x157   :  { %v4903_v33 = vpop.f32.mrf.mxu0  ;;  %v1007_v24 = vpop.f32.mrf.mxu1  ;;  %5143 = vmatmul.mubr.msk.bf16.gmra.mxu1 %vm153_vm3, %v2129_v38 }
 0x158   :  { %v6299_v17 = vadd.f32 %v1002_v15, %v772_v10  ;;  %5146 = vmatprep.mubr.msk.bf16.mxu1 %vm5434_vm2, %v5433_v0  ;;  %v2319_v33 = vrot.slane %v6088_v14, 1 }
 0x159   :  { %v729_v22 = vpop.f32.mrf.mxu0  ;;  %5097 = vmatmul.mubr.msk.bf16.gmra.mxu0 %vm153_vm3, %v1775_v40  ;;  %v4952_v29 = vpop.f32.mrf.mxu1 }
 0x15a   :  { %v773_v4 = vadd.f32 %v729_v22, %v6062_v45  ;;  %5100 = vmatprep.mubr.msk.bf16.mxu0 %vm5434_vm2, %v5433_v0 }
 0x15b   :  { %v4906_v27 = vpop.f32.mrf.mxu0  ;;  %v1010_v49 = vpop.f32.mrf.mxu1 }
 0x15c   :  { %v6311_v28 = vadd.f32 %v1007_v24, %v773_v4 }
 0x15d   :  { %v732_v47 = vpop.f32.mrf.mxu0  ;;  %v4953_v16 = vpop.f32.mrf.mxu1 }
 0x15e   :  { %v774_v34 = vadd.f32 %v732_v47, %v6074_v60  ;;  %v2317_v60 = vrot.slane %v6069_v46, 1 }
 0x15f   :  { %v4907_v54 = vpop.f32.mrf.mxu0  ;;  %v1015_v45 = vpop.f32.mrf.mxu1  ;;  %5147 = vmatmul.mubr.msk.bf16.gmra.mxu1 %vm153_vm3, %v2128_v30 }
 0x160   :  { %v6316_v50 = vadd.f32 %v1010_v49, %v774_v34  ;;  %v2318_v38 = vsel %vm127_vm1, %v2316_v57, %v2317_v60  ;;  %v2320_v27 = vsel %vm127_vm1, %v2317_v60, %v2319_v33 }
 0x161   :  { %v737_v11 = vpop.f32.mrf.mxu0  ;;  %5101 = vmatmul.mubr.msk.bf16.gmra.mxu0 %vm153_vm3, %v1778_v56  ;;  %v4956_v51 = vpop.f32.mrf.mxu1  ;;  %v2321_v56 = vrot.slane %v6114_v52, 1  ;;  %v2323_v52 = vrot.slane %v6136_v25, 1 }
 0x162   :  { %v775_v20 = vadd.f32 %v737_v11, %v6081_v12  ;;  %5152 = vmatprep.mubr.msk.bf16.mxu0 %vm5434_vm2, %v5433_v0 }
 0x163   :  { %v4910_v41 = vpop.f32.mrf.mxu0  ;;  %v1018_v48 = vpop.f32.mrf.mxu1  ;;  %v2322_v11 = vsel %vm127_vm1, %v2319_v33, %v2321_v56  ;;  %v2325_v33 = vrot.slane %v6155_v42, 1 }
 0x164   :  { %v6323_v59 = vadd.f32 %v1015_v45, %v775_v20 }
 0x165   :  { %v740_v61 = vpop.f32.mrf.mxu0  ;;  %v4957_v30 = vpop.f32.mrf.mxu1 }
 0x166   :  { %v776_v15 = vadd.f32 %v740_v61, %v6097_v32 }
 0x167   :  { %v4911_v58 = vpop.f32.mrf.mxu0  ;;  %v1023_v9 = vpop.f32.mrf.mxu1 }
 0x168   :  { %v6327_v10 = vadd.f32 %v1018_v48, %v776_v15  ;;  %v2324_v58 = vsel %vm127_vm1, %v2321_v56, %v2323_v52 }
 0x169   :  { %v745_v12 = vpop.f32.mrf.mxu0  ;;  %5153 = vmatmul.mubr.msk.bf16.vlgmr.msra.gmra.mxu0 %vm153_vm3, %v2318_v38  ;;  %v4960_v40 = vpop.f32.mrf.mxu1 }
 0x16a   :  { %v777_v46 = vadd.f32 %v745_v12, %v6107_v5  ;;  %5156 = vmatprep.mubr.msk.bf16.mxu0 %vm5434_vm2, %v5433_v0 }
 0x16b   :  { %v4914_v24 = vpop.f32.mrf.mxu0  ;;  %v1026_v22 = vpop.f32.mrf.mxu1 }
 0x16c   :  { %v6334_v32 = vadd.f32 %v1023_v9, %v777_v46 }
 0x16d   :  { %v748_v29 = vpop.f32.mrf.mxu0  ;;  %v4961_v19 = vpop.f32.mrf.mxu1 }
 0x16e   :  { %v778_v4 = vadd.f32 %v748_v29, %v6120_v13 }
 0x16f   :  { %v4915_v49 = vpop.f32.mrf.mxu0  ;;  %v1031_v31 = vpop.f32.mrf.mxu1 }
 0x170   :  { %v6338_v47 = vadd.f32 %v1026_v22, %v778_v4 }
 0x171   :  { %v753_v5 = vpop.f32.mrf.mxu0  ;;  %5157 = vmatmul.mubr.msk.bf16.gmra.mxu0 %vm153_vm3, %v2320_v27  ;;  %v4964_v16 = vpop.f32.mrf.mxu1  ;;  %v2326_v27 = vsel %vm127_vm1, %v2323_v52, %v2325_v33 }
 0x172   :  { %v779_v14 = vadd.f32 %v753_v5, %v6129_v21  ;;  %5160 = vmatprep.mubr.msk.bf16.mxu0 %vm5434_vm2, %v5433_v0 }
 0x173   :  { %v4918_v34 = vpop.f32.mrf.mxu0  ;;  %v1034_v55 = vpop.f32.mrf.mxu1 }
 0x174   :  { %v6345_v13 = vadd.f32 %v1031_v31, %v779_v14  ;;  %v2327_v14 = vrot.slane %v6179_v35, 1 }
 0x175   :  { %v756_v54 = vpop.f32.mrf.mxu0  ;;  %v4965_v45 = vpop.f32.mrf.mxu1 }
 0x177   :  { %v4919_v51 = vpop.f32.mrf.mxu0  ;;  %v1510_v20 = vpop.f32.mrf.mxu1 }
 0x179   :  { %v1225_v57 = vpop.f32.mrf.mxu0  ;;  %5161 = vmatmul.mubr.msk.bf16.gmra.mxu0 %vm153_vm3, %v2322_v11  ;;  %v5016_v60 = vpop.f32.mrf.mxu1  ;;  %v2328_v11 = vsel %vm127_vm1, %v2325_v33, %v2327_v14 }
 0x17a   :  { %v1311_v21 = vadd.f32 %v1225_v57, %v6157_v1  ;;  %5164 = vmatprep.mubr.msk.bf16.mxu0 %vm5434_vm2, %v5433_v0 }
 0x17b   :  { %v4970_v41 = vpop.f32.mrf.mxu0  ;;  %v1513_v48 = vpop.f32.mrf.mxu1 }
 0x17c   :  { %v6353_v61 = vadd.f32 %v1510_v20, %v1311_v21  ;;  %v2329_v21 = vrot.slane %v6203_v8, 1 }
 0x17d   :  { %v1228_v30 = vpop.f32.mrf.mxu0  ;;  %v5017_v15 = vpop.f32.mrf.mxu1 }
 0x17e   :  { %v1312_v38 = vadd.f32 %v1228_v30, %v6168_v63 }
 0x17f   :  { %v4971_v9 = vpop.f32.mrf.mxu0  ;;  %v1518_v12 = vpop.f32.mrf.mxu1 }
 0x180   :  { %v6357_v40 = vadd.f32 %v1513_v48, %v1312_v38  ;;  %v2330_v38 = vsel %vm127_vm1, %v2327_v14, %v2329_v21 }
 0x181   :  { %v1233_v1 = vpop.f32.mrf.mxu0  ;;  %5165 = vmatmul.mubr.msk.bf16.gmra.mxu0 %vm153_vm3, %v2324_v58  ;;  %v5020_v46 = vpop.f32.mrf.mxu1 }
 0x182   :  { %v1313_v25 = vadd.f32 %v1233_v1, %v6181_v43  ;;  %5168 = vmatprep.mubr.msk.bf16.mxu0 %vm5434_vm2, %v5433_v0  ;;  %v2331_v46 = vrot.slane %v6227_v53, 1 }
 0x183   :  { %v4974_v24 = vpop.f32.mrf.mxu0  ;;  %v1521_v22 = vpop.f32.mrf.mxu1 }
 0x184   :  { %v6364_v63 = vadd.f32 %v1518_v12, %v1313_v25 }
 0x185   :  { %v1236_v29 = vpop.f32.mrf.mxu0  ;;  %v5021_v19 = vpop.f32.mrf.mxu1 }
 0x186   :  { %v1314_v4 = vadd.f32 %v1236_v29, %v6192_v39  ;;  %v2332_v19 = vsel %vm127_vm1, %v2329_v21, %v2331_v46 }
 0x187   :  { %v4975_v49 = vpop.f32.mrf.mxu0  ;;  %v1526_v31 = vpop.f32.mrf.mxu1 }
 0x188   :  { %v6368_v5 = vadd.f32 %v1521_v22, %v1314_v4 }
 0x189   :  { %v1241_v43 = vpop.f32.mrf.mxu0  ;;  %5169 = vmatmul.mubr.msk.bf16.gmra.mxu0 %vm153_vm3, %v2326_v27  ;;  %v5024_v16 = vpop.f32.mrf.mxu1 }
 0x18a   :  { %v1315_v42 = vadd.f32 %v1241_v43, %v6205_v18  ;;  %5172 = vmatprep.mubr.msk.bf16.mxu0 %vm5434_vm2, %v5433_v0  ;;  %v2333_v43 = vrot.slane %v6251_v36, 1 }
 0x18b   :  { %v4978_v56 = vpop.f32.mrf.mxu0  ;;  %v1529_v34 = vpop.f32.mrf.mxu1 }
 0x18c   :  { %v6375_v39 = vadd.f32 %v1526_v31, %v1315_v42 }
 0x18d   :  { %v1244_v55 = vpop.f32.mrf.mxu0  ;;  %v5025_v54 = vpop.f32.mrf.mxu1 }
 0x18e   :  { %v1316_v45 = vadd.f32 %v1244_v55, %v6216_v26  ;;  %v2334_v55 = vsel %vm127_vm1, %v2331_v46, %v2333_v43 }
 0x18f   :  { %v4979_v51 = vpop.f32.mrf.mxu0  ;;  %v1534_v20 = vpop.f32.mrf.mxu1 }
 0x190   :  { %v6379_v57 = vadd.f32 %v1529_v34, %v1316_v45 }
 0x191   :  { %v1249_v18 = vpop.f32.mrf.mxu0  ;;  %5173 = vmatmul.mubr.msk.bf16.gmra.mxu0 %vm153_vm3, %v2328_v11  ;;  %v5028_v60 = vpop.f32.mrf.mxu1 }
 0x192   :  { %v1317_v35 = vadd.f32 %v1249_v18, %v6229_v62  ;;  %5176 = vmatprep.mubr.msk.bf16.mxu0 %vm5434_vm2, %v5433_v0 }
 0x193   :  { %v4982_v52 = vpop.f32.mrf.mxu0  ;;  %v1537_v41 = vpop.f32.mrf.mxu1 }
 0x194   :  { %v6386_v26 = vadd.f32 %v1534_v20, %v1317_v35  ;;  %v2335_v20 = vrot.slane %v6275_v23, 1 }
 0x195   :  { %v1252_v48 = vpop.f32.mrf.mxu0  ;;  %v5029_v30 = vpop.f32.mrf.mxu1 }
 0x196   :  { %v1318_v15 = vadd.f32 %v1252_v48, %v6240_v3 }
 0x197   :  { %v4983_v58 = vpop.f32.mrf.mxu0  ;;  %v1542_v9 = vpop.f32.mrf.mxu1 }
 0x198   :  { %v6390_v12 = vadd.f32 %v1537_v41, %v1318_v15  ;;  %v2336_v41 = vsel %vm127_vm1, %v2333_v43, %v2335_v20 }
 0x199   :  { %v1257_v62 = vpop.f32.mrf.mxu0  ;;  %5177 = vmatmul.mubr.msk.bf16.gmra.mxu0 %vm153_vm3, %v2330_v38  ;;  %v5032_v1 = vpop.f32.mrf.mxu1 }
 0x19a   :  { %v1319_v8 = vadd.f32 %v1257_v62, %v6253_v2  ;;  %5180 = vmatprep.mubr.msk.bf16.mxu0 %vm5434_vm2, %v5433_v0 }
 0x19b   :  { %v4986_v25 = vpop.f32.mrf.mxu0  ;;  %v1545_v33 = vpop.f32.mrf.mxu1 }
 0x19c   :  { %v6397_v3 = vadd.f32 %v1542_v9, %v1319_v8 }
 0x19d   :  { %v1260_v24 = vpop.f32.mrf.mxu0  ;;  %v5033_v22 = vpop.f32.mrf.mxu1 }
 0x19e   :  { %v1320_v29 = vadd.f32 %v1260_v24, %v6264_v44 }
 0x19f   :  { %v4987_v4 = vpop.f32.mrf.mxu0  ;;  %v1550_v27 = vpop.f32.mrf.mxu1 }
 0x1a0   :  { %v6401_v49 = vadd.f32 %v1545_v33, %v1320_v29 }
 0x1a1   :  { %v1265_v2 = vpop.f32.mrf.mxu0  ;;  %5181 = vmatmul.mubr.msk.bf16.gmra.mxu0 %vm153_vm3, %v2332_v19  ;;  %v5036_v31 = vpop.f32.mrf.mxu1 }
 0x1a2   :  { %v1321_v53 = vadd.f32 %v1265_v2, %v6277_v6  ;;  %5184 = vmatprep.mubr.msk.bf16.mxu0 %vm5434_vm2, %v5433_v0 }
 0x1a3   :  { %v4990_v16 = vpop.f32.mrf.mxu0  ;;  %v1553_v42 = vpop.f32.mrf.mxu1 }
 0x1a4   :  { %v6408_v44 = vadd.f32 %v1550_v27, %v1321_v53 }
 0x1a5   :  { %v1268_v14 = vpop.f32.mrf.mxu0  ;;  %v5037_v56 = vpop.f32.mrf.mxu1 }
 0x1a6   :  { %v1322_v34 = vadd.f32 %v1268_v14, %v6285_v37 }
 0x1a7   :  { %v4991_v54 = vpop.f32.mrf.mxu0  ;;  %v1558_v45 = vpop.f32.mrf.mxu1 }
 0x1a8   :  { %v6412_v11 = vadd.f32 %v1553_v42, %v1322_v34 }
 0x1a9   :  { %v1273_v6 = vpop.f32.mrf.mxu0  ;;  %5185 = vmatmul.mubr.msk.bf16.gmra.mxu0 %vm153_vm3, %v2334_v55  ;;  %v5040_v51 = vpop.f32.mrf.mxu1 }
 0x1aa   :  { %v1323_v36 = vadd.f32 %v1273_v6, %v6293_v7  ;;  %5188 = vmatprep.mubr.msk.bf16.mxu0 %vm5434_vm2, %v5433_v0 }
 0x1ab   :  { %v4994_v18 = vpop.f32.mrf.mxu0  ;;  %v1561_v60 = vpop.f32.mrf.mxu1 }
 0x1ac   :  { %v6419_v37 = vadd.f32 %v1558_v45, %v1323_v36 }
 0x1ad   :  { %v1276_v35 = vpop.f32.mrf.mxu0  ;;  %v5041_v21 = vpop.f32.mrf.mxu1 }
 0x1ae   :  { %v1324_v52 = vadd.f32 %v1276_v35, %v6299_v17 }
 0x1af   :  { %v4995_v48 = vpop.f32.mrf.mxu0  ;;  %v1566_v30 = vpop.f32.mrf.mxu1 }
 0x1b0   :  { %v6473_v23 = vadd.f32 %v1561_v60, %v1324_v52 }
 0x1b1   :  { %v1281_v7 = vpop.f32.mrf.mxu0  ;;  %5189 = vmatmul.mubr.msk.bf16.gmra.mxu0 %vm153_vm3, %v2336_v41  ;;  %v5044_v17 = vpop.f32.mrf.mxu1 }
 0x1b2   :  { %v1325_v15 = vadd.f32 %v1281_v7, %v6311_v28  ;;  %5192 = vmatprep.mubr.msk.bf16.mxu0 %vm5434_vm2, %v5433_v0  ;;  %v2731_v28 = vld [vmem:[%s7133_s2 + $0x4] sm:$0xf] }
 0x1b3   :  { %v4998_v38 = vpop.f32.mrf.mxu0  ;;  %v1569_v58 = vpop.f32.mrf.mxu1  ;;  %5340 = vmatprep.subr.msk.bf16.mxu1 %vm2744_vm10, %v2731_v28  ;;  %v2746_v29 = vsel %vm2744_vm10, %v2731_v28, 0 }
 0x1b4   :  { %v6479_v9 = vadd.f32 %v1566_v30, %v1325_v15  ;;  %5197 = vmatpush3.bf16.msra.mxu1 %v2746_v29 }
 0x1b5   :  { %v1284_v62 = vpop.f32.mrf.mxu0  ;;  %v5045_v1 = vpop.f32.mrf.mxu1 }
 0x1b6   :  { %v1326_v8 = vadd.f32 %v1284_v62, %v6316_v50 }
 0x1b7   :  { %v4999_v46 = vpop.f32.mrf.mxu0  ;;  %v1574_v25 = vpop.f32.mrf.mxu1 }
 0x1b8   :  { %v6482_v33 = vadd.f32 %v1569_v58, %v1326_v8 }
 0x1b9   :  { %v1289_v24 = vpop.f32.mrf.mxu0  ;;  %5193 = vmatmul.mubr.msk.bf16.gmra.mxu0 %vm153_vm3, %v2335_v20  ;;  %v5048_v22 = vpop.f32.mrf.mxu1 }
 0x1ba   :  { %v1327_v19 = vadd.f32 %v1289_v24, %v6323_v59 }
 0x1bb   :  { %v5002_v50 = vpop.f32.mrf.mxu0  ;;  %v1577_v4 = vpop.f32.mrf.mxu1 }
 0x1bc   :  { %v6491_v27 = vadd.f32 %v1574_v25, %v1327_v19 }
 0x1bd   :  { %v1292_v2 = vpop.f32.mrf.mxu0  ;;  %v5049_v31 = vpop.f32.mrf.mxu1 }
 0x1be   :  { %v1328_v53 = vadd.f32 %v1292_v2, %v6327_v10 }
 0x1bf   :  { %v5003_v43 = vpop.f32.mrf.mxu0  ;;  %v1582_v16 = vpop.f32.mrf.mxu1 }
 0x1c0   :  { %v6494_v42 = vadd.f32 %v1577_v4, %v1328_v53 }
 0x1c1   :  { %v1297_v14 = vpop.f32.mrf.mxu0  ;;  %v5052_v56 = vpop.f32.mrf.mxu1 }
 0x1c2   :  { %v1329_v34 = vadd.f32 %v1297_v14, %v6334_v32 }
 0x1c3   :  { %v5006_v55 = vpop.f32.mrf.mxu0  ;;  %v1585_v54 = vpop.f32.mrf.mxu1 }
 0x1c4   :  { %v6497_v59 = vadd.f32 %v1582_v16, %v1329_v34 }
 0x1c5   :  { %v1300_v45 = vpop.f32.mrf.mxu0  ;;  %v5053_v6 = vpop.f32.mrf.mxu1 }
 0x1c6   :  { %v1330_v51 = vadd.f32 %v1300_v45, %v6338_v47 }
 0x1c7   :  { %v5007_v36 = vpop.f32.mrf.mxu0  ;;  %v1590_v20 = vpop.f32.mrf.mxu1 }
 0x1c8   :  { %v6500_v18 = vadd.f32 %v1585_v54, %v1330_v51 }
 0x1c9   :  { %v1305_v10 = vpop.f32.mrf.mxu0  ;;  %v5056_v60 = vpop.f32.mrf.mxu1 }
 0x1ca   :  { %v1331_v35 = vadd.f32 %v1305_v10, %v6345_v13 }
 0x1cb   :  { %v5010_v21 = vpop.f32.mrf.mxu0  ;;  %v1593_v52 = vpop.f32.mrf.mxu1 }
 0x1cc   :  { %v6503_v41 = vadd.f32 %v1590_v20, %v1331_v35 }
 0x1cd   :  { %v1308_v32 = vpop.f32.mrf.mxu0  ;;  %v5057_v48 = vpop.f32.mrf.mxu1 }
 0x1cf   :  { %v5011_v30 = vpop.f32.mrf.mxu0  ;;  %v2204_v7 = vpop.f32.mrf.mxu1 }
 0x1d1   :  { %v1849_v17 = vpop.f32.mrf.mxu0  ;;  %v5108_v15 = vpop.f32.mrf.mxu1 }
 0x1d2   :  { %v1935_v47 = vadd.f32 %v1849_v17, %v6353_v61 }
 0x1d3   :  { %v5062_v38 = vpop.f32.mrf.mxu0  ;;  %v2207_v58 = vpop.f32.mrf.mxu1 }
 0x1d4   :  { %v6506_v62 = vadd.f32 %v2204_v7, %v1935_v47 }
 0x1d5   :  { %v1852_v1 = vpop.f32.mrf.mxu0  ;;  %v5109_v8 = vpop.f32.mrf.mxu1 }
 0x1d6   :  { %v1936_v13 = vadd.f32 %v1852_v1, %v6357_v40 }
 0x1d7   :  { %v5063_v46 = vpop.f32.mrf.mxu0  ;;  %v2212_v25 = vpop.f32.mrf.mxu1 }
 0x1d8   :  { %v6509_v28 = vadd.f32 %v2207_v58, %v1936_v13 }
 0x1d9   :  { %v1857_v24 = vpop.f32.mrf.mxu0  ;;  %v5112_v22 = vpop.f32.mrf.mxu1 }
 0x1da   :  { %v1937_v29 = vadd.f32 %v1857_v24, %v6364_v63 }
 0x1db   :  { %v5066_v19 = vpop.f32.mrf.mxu0  ;;  %v2215_v50 = vpop.f32.mrf.mxu1 }
 0x1dc   :  { %v6512_v4 = vadd.f32 %v2212_v25, %v1937_v29 }
 0x1dd   :  { %v1860_v61 = vpop.f32.mrf.mxu0  ;;  %v5113_v2 = vpop.f32.mrf.mxu1 }
 0x1de   :  { %v1938_v31 = vadd.f32 %v1860_v61, %v6368_v5 }
 0x1df   :  { %v5067_v53 = vpop.f32.mrf.mxu0  ;;  %v2220_v43 = vpop.f32.mrf.mxu1 }
 0x1e0   :  { %v6515_v16 = vadd.f32 %v2215_v50, %v1938_v31 }
 0x1e1   :  { %v1865_v40 = vpop.f32.mrf.mxu0  ;;  %v5116_v14 = vpop.f32.mrf.mxu1 }
 0x1e2   :  { %v1939_v56 = vadd.f32 %v1865_v40, %v6375_v39 }
 0x1e3   :  { %v5070_v34 = vpop.f32.mrf.mxu0  ;;  %v2223_v55 = vpop.f32.mrf.mxu1 }
 0x1e4   :  { %v6518_v54 = vadd.f32 %v2220_v43, %v1939_v56  ;;  %v6549_v56 = vld [vmem:[%s7133_s2] sm:$0xf] }
 0x1e5   :  { %v1868_v63 = vpop.f32.mrf.mxu0  ;;  %v5117_v45 = vpop.f32.mrf.mxu1  ;;  %5341 = vmatprep.subr.msk.bf16.mxu1 %vm2744_vm10, %v6549_v56 }
 0x1e6   :  { %v1940_v6 = vadd.f32 %v1868_v63, %v6379_v57 }
 0x1e7   :  { %v5071_v51 = vpop.f32.mrf.mxu0  ;;  %v2228_v36 = vpop.f32.mrf.mxu1 }
 0x1e8   :  { %v6521_v20 = vadd.f32 %v2223_v55, %v1940_v6 }
 0x1e9   :  { %v1873_v5 = vpop.f32.mrf.mxu0  ;;  %v5120_v10 = vpop.f32.mrf.mxu1 }
 0x1ea   :  { %v1941_v60 = vadd.f32 %v1873_v5, %v6386_v26 }
 0x1eb   :  { %v5074_v35 = vpop.f32.mrf.mxu0  ;;  %v2231_v21 = vpop.f32.mrf.mxu1 }
 0x1ec   :  { %v6524_v52 = vadd.f32 %v2228_v36, %v1941_v60 }
 0x1ed   :  { %v1876_v39 = vpop.f32.mrf.mxu0  ;;  %v5121_v32 = vpop.f32.mrf.mxu1 }
 0x1ee   :  { %v1942_v48 = vadd.f32 %v1876_v39, %v6390_v12  ;;  %v3294_v12 = vld [vmem:[%s7133_s2 + $0x18] sm:$0xf] }
 0x1ef   :  { %v5075_v30 = vpop.f32.mrf.mxu0  ;;  %v2236_v7 = vpop.f32.mrf.mxu1  ;;  %5346 = vmatprep.subr.msk.bf16.mxu0 %vm2744_vm10, %v3294_v12  ;;  %v3308_v24 = vsel %vm2744_vm10, %v3294_v12, 0 }
 0x1f0   :  { %v6527_v17 = vadd.f32 %v2231_v21, %v1942_v48  ;;  %5257 = vmatpush3.bf16.msra.mxu0 %v3308_v24 }
 0x1f1   :  { %v1881_v57 = vpop.f32.mrf.mxu0  ;;  %v5124_v15 = vpop.f32.mrf.mxu1 }
 0x1f2   :  { %v1943_v47 = vadd.f32 %v1881_v57, %v6397_v3 }
 0x1f3   :  { %v5078_v38 = vpop.f32.mrf.mxu0  ;;  %v2239_v58 = vpop.f32.mrf.mxu1 }
 0x1f4   :  { %v6530_v1 = vadd.f32 %v2236_v7, %v1943_v47 }
 0x1f5   :  { %v1884_v26 = vpop.f32.mrf.mxu0  ;;  %v5125_v8 = vpop.f32.mrf.mxu1 }
 0x1f6   :  { %v1944_v13 = vadd.f32 %v1884_v26, %v6401_v49 }
 0x1f7   :  { %v5079_v46 = vpop.f32.mrf.mxu0  ;;  %v2244_v25 = vpop.f32.mrf.mxu1 }
 0x1f8   :  { %v6538_v22 = vadd.f32 %v2239_v58, %v1944_v13 }
 0x1f9   :  { %v1889_v3 = vpop.f32.mrf.mxu0  ;;  %v5128_v29 = vpop.f32.mrf.mxu1 }
 0x1fa   :  { %v1945_v19 = vadd.f32 %v1889_v3, %v6408_v44 }
 0x1fb   :  { %v5082_v50 = vpop.f32.mrf.mxu0  ;;  %v2247_v61 = vpop.f32.mrf.mxu1 }
 0x1fc   :  { %v6541_v49 = vadd.f32 %v2244_v25, %v1945_v19 }
 0x1fd   :  { %v1892_v2 = vpop.f32.mrf.mxu0  ;;  %v5129_v31 = vpop.f32.mrf.mxu1 }
 0x1fe   :  { %v1946_v53 = vadd.f32 %v1892_v2, %v6412_v11 }
 0x1ff   :  { %v5083_v43 = vpop.f32.mrf.mxu0  ;;  %v2252_v40 = vpop.f32.mrf.mxu1 }
 0x200   :  { %v6544_v14 = vadd.f32 %v2247_v61, %v1946_v53 }
 0x201   :  { %v1897_v34 = vpop.f32.mrf.mxu0  ;;  %v5132_v55 = vpop.f32.mrf.mxu1 }
 0x202   :  { %v1947_v44 = vadd.f32 %v1897_v34, %v6419_v37  ;;  %v6565_v37 = vld [vmem:[%s7133_s2 + $0x20] sm:$0xf] }
 0x203   :  { %v5086_v63 = vpop.f32.mrf.mxu0  ;;  %v2255_v45 = vpop.f32.mrf.mxu1  ;;  %5348 = vmatprep.subr.msk.bf16.mxu0 %vm2744_vm10, %v6565_v37 }
 0x204   :  { %v6554_v6 = vadd.f32 %v2252_v40, %v1947_v44 }
 0x205   :  { %v1900_v11 = vpop.f32.mrf.mxu0  ;;  %v5133_v51 = vpop.f32.mrf.mxu1 }
 0x206   :  { %v1948_v36 = vadd.f32 %v1900_v11, %v6473_v23 }
 0x207   :  { %v5087_v5 = vpop.f32.mrf.mxu0  ;;  %v2260_v10 = vpop.f32.mrf.mxu1 }
 0x208   :  { %v6557_v60 = vadd.f32 %v2255_v45, %v1948_v36 }
 0x209   :  { %v1905_v35 = vpop.f32.mrf.mxu0  ;;  %v5136_v21 = vpop.f32.mrf.mxu1 }
 0x20a   :  { %v1949_v39 = vadd.f32 %v1905_v35, %v6479_v9 }
 0x20b   :  { %v5090_v32 = vpop.f32.mrf.mxu0  ;;  %v2263_v48 = vpop.f32.mrf.mxu1 }
 0x20c   :  { %v6560_v30 = vadd.f32 %v2260_v10, %v1949_v39 }
 0x20d   :  { %v1908_v7 = vpop.f32.mrf.mxu0  ;;  %v5137_v57 = vpop.f32.mrf.mxu1 }
 0x20e   :  { %v1950_v23 = vadd.f32 %v1908_v7, %v6482_v33 }
 0x20f   :  { %v5091_v15 = vpop.f32.mrf.mxu0  ;;  %v2268_v47 = vpop.f32.mrf.mxu1 }
 0x210   :  { %v6570_v38 = vadd.f32 %v2263_v48, %v1950_v23 }
 0x211   :  { %v1913_v9 = vpop.f32.mrf.mxu0  ;;  %v5140_v58 = vpop.f32.mrf.mxu1 }
 0x212   :  { %v1951_v26 = vadd.f32 %v1913_v9, %v6491_v27 }
 0x213   :  { %v5094_v8 = vpop.f32.mrf.mxu0  ;;  %v2271_v13 = vpop.f32.mrf.mxu1 }
 0x214   :  { %v6573_v12 = vadd.f32 %v2268_v47, %v1951_v26 }
 0x215   :  { %v1916_v46 = vpop.f32.mrf.mxu0  ;;  %v5141_v25 = vpop.f32.mrf.mxu1 }
 0x216   :  { %v1952_v24 = vadd.f32 %v1916_v46, %v6494_v42 }
 0x217   :  { %v5095_v3 = vpop.f32.mrf.mxu0  ;;  %v2276_v29 = vpop.f32.mrf.mxu1 }
 0x218   :  { %v6576_v19 = vadd.f32 %v2271_v13, %v1952_v24 }
 0x219   :  { %v1921_v33 = vpop.f32.mrf.mxu0  ;;  %v5144_v50 = vpop.f32.mrf.mxu1 }
 0x21a   :  { %v1953_v61 = vadd.f32 %v1921_v33, %v6497_v59 }
 0x21b   :  { %v5098_v2 = vpop.f32.mrf.mxu0  ;;  %v2279_v31 = vpop.f32.mrf.mxu1 }
 0x21c   :  { %v6579_v53 = vadd.f32 %v2276_v29, %v1953_v61 }
 0x21d   :  { %v1924_v27 = vpop.f32.mrf.mxu0  ;;  %v5145_v43 = vpop.f32.mrf.mxu1 }
 0x21e   :  { %v1954_v40 = vadd.f32 %v1924_v27, %v6500_v18  ;;  %v6590_v18 = vld [vmem:[%s7134_s4] ss:$0 sm:$0xff] }
 0x21f   :  { %v5099_v34 = vpop.f32.mrf.mxu0  ;;  %v2284_v55 = vpop.f32.mrf.mxu1 }
 0x220   :  { %v6582_v44 = vadd.f32 %v2279_v31, %v1954_v40 }
 0x221   :  { %v1929_v42 = vpop.f32.mrf.mxu0  ;;  %v5148_v63 = vpop.f32.mrf.mxu1 }
 0x222   :  { %v1955_v45 = vadd.f32 %v1929_v42, %v6503_v41 }
 0x223   :  { %v5102_v11 = vpop.f32.mrf.mxu0  ;;  %v2287_v51 = vpop.f32.mrf.mxu1 }
 0x224   :  { %v6585_v36 = vadd.f32 %v2284_v55, %v1955_v45 }
 0x225   :  { %v1932_v59 = vpop.f32.mrf.mxu0  ;;  %v5149_v5 = vpop.f32.mrf.mxu1 }
 0x227   :  { %v5103_v10 = vpop.f32.mrf.mxu0 }
 0x229   :  { %v2407_v35 = vpop.f32.mrf.mxu0 }
 0x22a   :  { %v2493_v21 = vadd.f32 %v2407_v35, %v6506_v62 }
 0x22b   :  { %v5154_v39 = vpop.f32.mrf.mxu0 }
 0x22c   :  { %v2521_v32 = vadd.f32 %v6590_v18, %v2493_v21 }
 0x22d   :  { %v2410_v48 = vpop.f32.mrf.mxu0 }
 0x22e   :  { %v2542_v41 = vmax.f32 %v2521_v32, 0.0  ;;  %v2494_v7 = vadd.f32 %v2410_v48, %v6509_v28 }
 0x22f   :  { %v5155_v57 = vpop.f32.mrf.mxu0 }
 0x230   :  { %2564 = vst.msk [vmem:[%s7135_s7] sm:$0xff] %vm2563_vm9, %v2542_v41  ;;  %v2522_v23 = vadd.f32 %v6590_v18, %v2494_v7 }
 0x231   :  { %v2415_v15 = vpop.f32.mrf.mxu0 }
 0x232   :  { %v2543_v47 = vmax.f32 %v2522_v23, 0.0  ;;  %v2495_v9 = vadd.f32 %v2415_v15, %v6512_v4 }
 0x233   :  { %v5158_v62 = vpop.f32.mrf.mxu0 }
 0x234   :  { %2565 = vst.msk [vmem:[%s7135_s7 + $0x8] sm:$0xff] %vm2563_vm9, %v2543_v47  ;;  %v2523_v28 = vadd.f32 %v6590_v18, %v2495_v9 }
 0x235   :  { %v2418_v58 = vpop.f32.mrf.mxu0 }
 0x236   :  { %v2544_v26 = vmax.f32 %v2523_v28, 0.0  ;;  %v2496_v8 = vadd.f32 %v2418_v58, %v6515_v16 }
 0x237   :  { %v4507_v13 = vld [vmem:[%s7135_s7 + $0x1] ss:$2 sm:$0xf]  ;;  %v2685_v4 = vld [vmem:[%s7135_s7] ss:$2 sm:$0xf]  ;;  %v5159_v46 = vpop.f32.mrf.mxu0 }
 0x238   :  { %2566 = vst.msk [vmem:[%s7135_s7 + $0x10] sm:$0xff] %vm2563_vm9, %v2544_v26  ;;  %v2524_v25 = vadd.f32 %v6590_v18, %v2496_v8 }
 0x239   :  { %2663 = vst.msk [vmem:[#allocation2 + $0x65] sm:$0xf] %vm2614_vm11, %v4507_v13  ;;  %2686 = vst.msk [vmem:[#allocation2 + $0x96] sm:$0xf] %vm2614_vm11, %v2685_v4  ;;  %v2423_v16 = vpop.f32.mrf.mxu0 }
 0x23a   :  { %v2545_v24 = vmax.f32 %v2524_v25, 0.0  ;;  %v2497_v3 = vadd.f32 %v2423_v16, %v6518_v54 }
 0x23b   :  { %v4499_v29 = vld [vmem:[%s7135_s7 + $0x9] ss:$2 sm:$0xf]  ;;  %v5162_v33 = vpop.f32.mrf.mxu0 }
 0x23c   :  { %2567 = vst.msk [vmem:[%s7135_s7 + $0x18] sm:$0xff] %vm2563_vm9, %v2545_v24  ;;  %v2525_v50 = vadd.f32 %v6590_v18, %v2497_v3 }
 0x23d   :  { %2639 = vst.msk [vmem:[#allocation2 + $0x37] sm:$0xf] %vm2614_vm11, %v4499_v29  ;;  %v2426_v61 = vpop.f32.mrf.mxu0 }
 0x23e   :  { %v2546_v2 = vmax.f32 %v2525_v50, 0.0  ;;  %v2498_v31 = vadd.f32 %v2426_v61, %v6521_v20 }
 0x23f   :  { %v4491_v54 = vld [vmem:[%s7135_s7 + $0xa] ss:$2 sm:$0xf]  ;;  %v5163_v27 = vpop.f32.mrf.mxu0 }
 0x240   :  { %2568 = vst.msk [vmem:[%s7135_s7 + $0x20] sm:$0xff] %vm2563_vm9, %v2546_v2  ;;  %v2526_v43 = vadd.f32 %v6590_v18, %v2498_v31 }
 0x241   :  { %2615 = vst.msk [vmem:[#allocation2 + $0x6] sm:$0xf] %vm2614_vm11, %v4491_v54  ;;  %v2431_v40 = vpop.f32.mrf.mxu0 }
 0x242   :  { %v2547_v34 = vmax.f32 %v2526_v43, 0.0  ;;  %v2499_v55 = vadd.f32 %v2431_v40, %v6524_v52 }
 0x243   :  { %v4508_v20 = vld [vmem:[%s7135_s7 + $0x13] ss:$2 sm:$0xf]  ;;  %v4515_v42 = vld [vmem:[%s7135_s7 + $0x12] ss:$2 sm:$0xf]  ;;  %v5166_v63 = vpop.f32.mrf.mxu0 }
 0x244   :  { %2569 = vst.msk [vmem:[%s7135_s7 + $0x28] sm:$0xff] %vm2563_vm9, %v2547_v34  ;;  %v2527_v45 = vadd.f32 %v6590_v18, %v2499_v55  ;;  %v2720_v16 = vld [vmem:[#allocation2 + $0x32] sm:$0xff] }
 0x245   :  { %2666 = vst.msk [vmem:[#allocation2 + $0x6a] sm:$0xf] %vm2614_vm11, %v4508_v20  ;;  %2689 = vst.msk [vmem:[#allocation2 + $0x9b] sm:$0xf] %vm2614_vm11, %v4515_v42  ;;  %v2434_v52 = vpop.f32.mrf.mxu0 }
 0x246   :  { %v2548_v11 = vmax.f32 %v2527_v45, 0.0  ;;  %v2500_v51 = vadd.f32 %v2434_v52, %v6527_v17 }
 0x247   :  { %v4492_v59 = vld [vmem:[%s7135_s7 + $0x1c] ss:$2 sm:$0xf]  ;;  %v4500_v5 = vld [vmem:[%s7135_s7 + $0x1b] ss:$2 sm:$0xf]  ;;  %v5167_v10 = vpop.f32.mrf.mxu0 }
 0x248   :  { %2570 = vst.msk [vmem:[%s7135_s7 + $0x30] sm:$0xff] %vm2563_vm9, %v2548_v11  ;;  %v2528_v35 = vadd.f32 %v6590_v18, %v2500_v51 }
 0x249   :  { %2618 = vst.msk [vmem:[#allocation2 + $0xb] sm:$0xf] %vm2614_vm11, %v4492_v59  ;;  %2642 = vst.msk [vmem:[#allocation2 + $0x3c] sm:$0xf] %vm2614_vm11, %v4500_v5  ;;  %v2439_v17 = vpop.f32.mrf.mxu0 }
 0x24a   :  { %v2549_v21 = vmax.f32 %v2528_v35, 0.0  ;;  %v2501_v39 = vadd.f32 %v2439_v17, %v6530_v1 }
 0x24b   :  { %v4509_v32 = vld [vmem:[%s7135_s7 + $0x25] ss:$2 sm:$0xf]  ;;  %v4516_v48 = vld [vmem:[%s7135_s7 + $0x24] ss:$2 sm:$0xf]  ;;  %v5170_v41 = vpop.f32.mrf.mxu0 }
 0x24c   :  { %2571 = vst.msk [vmem:[%s7135_s7 + $0x38] sm:$0xff] %vm2563_vm9, %v2549_v21  ;;  %v2529_v7 = vadd.f32 %v6590_v18, %v2501_v39 }
 0x24d   :  { %2669 = vst.msk [vmem:[#allocation2 + $0x6f] sm:$0xf] %vm2614_vm11, %v4509_v32  ;;  %2692 = vst.msk [vmem:[#allocation2 + $0xa0] sm:$0xf] %vm2614_vm11, %v4516_v48  ;;  %v2442_v1 = vpop.f32.mrf.mxu0 }
 0x24e   :  { %v2550_v57 = vmax.f32 %v2529_v7, 0.0  ;;  %v2502_v23 = vadd.f32 %v2442_v1, %v6538_v22 }
 0x24f   :  { %v4493_v15 = vld [vmem:[%s7135_s7 + $0x2e] ss:$2 sm:$0xf]  ;;  %v4501_v47 = vld [vmem:[%s7135_s7 + $0x2d] ss:$2 sm:$0xf]  ;;  %v5171_v9 = vpop.f32.mrf.mxu0 }
 0x250   :  { %2572 = vst.msk [vmem:[%s7135_s7 + $0x40] sm:$0xff] %vm2563_vm9, %v2550_v57  ;;  %v2530_v62 = vadd.f32 %v6590_v18, %v2502_v23  ;;  %v3283_v50 = vld [vmem:[#allocation2 + $0x5] sm:$0xff] }
 0x251   :  { %2621 = vst.msk [vmem:[#allocation2 + $0x10] sm:$0xf] %vm2614_vm11, %v4493_v15  ;;  %2645 = vst.msk [vmem:[#allocation2 + $0x41] sm:$0xf] %vm2614_vm11, %v4501_v47  ;;  %v2447_v22 = vpop.f32.mrf.mxu0 }
 0x252   :  { %v2551_v28 = vmax.f32 %v2530_v62, 0.0  ;;  %v2503_v58 = vadd.f32 %v2447_v22, %v6541_v49 }
 0x253   :  { %v4510_v26 = vld [vmem:[%s7135_s7 + $0x37] ss:$2 sm:$0xf]  ;;  %v4517_v8 = vld [vmem:[%s7135_s7 + $0x36] ss:$2 sm:$0xf]  ;;  %v5174_v13 = vpop.f32.mrf.mxu0 }
 0x254   :  { %2573 = vst.msk [vmem:[%s7135_s7 + $0x48] sm:$0xff] %vm2563_vm9, %v2551_v28  ;;  %v2531_v4 = vadd.f32 %v6590_v18, %v2503_v58  ;;  %v2825_v13 = vsel %vm2744_vm10, %v6549_v56, 0 }
 0x255   :  { %2672 = vst.msk [vmem:[#allocation2 + $0x74] sm:$0xf] %vm2614_vm11, %v4510_v26  ;;  %2695 = vst.msk [vmem:[#allocation2 + $0xa5] sm:$0xf] %vm2614_vm11, %v4517_v8  ;;  %v2450_v49 = vpop.f32.mrf.mxu0 }
 0x256   :  { %v2552_v46 = vmax.f32 %v2531_v4, 0.0  ;;  %v2504_v25 = vadd.f32 %v2450_v49, %v6544_v14 }
 0x257   :  { %v4494_v24 = vld [vmem:[%s7135_s7 + $0x40] ss:$2 sm:$0xf]  ;;  %v4502_v3 = vld [vmem:[%s7135_s7 + $0x3f] ss:$2 sm:$0xf]  ;;  %v5175_v29 = vpop.f32.mrf.mxu0 }
 0x258   :  { %2574 = vst.msk [vmem:[%s7135_s7 + $0x50] sm:$0xff] %vm2563_vm9, %v2552_v46  ;;  %v2532_v14 = vadd.f32 %v6590_v18, %v2504_v25  ;;  %v2721_v33 = vld [vmem:[#allocation2 + $0x3a] sm:$0xff]  ;;  %v3284_v61 = vld [vmem:[#allocation2 + $0xd] sm:$0xff]  ;;  %v6800_v46 = vld [vmem:[%s7133_s2 + $0x8] sm:$0xf] }
 0x259   :  { %2624 = vst.msk [vmem:[#allocation2 + $0x15] sm:$0xf] %vm2614_vm11, %v4494_v24  ;;  %2648 = vst.msk [vmem:[#allocation2 + $0x46] sm:$0xf] %vm2614_vm11, %v4502_v3  ;;  %v2455_v2 = vpop.f32.mrf.mxu0  ;;  %v2727_v31 = vpack.c.bf16 %v2721_v33, %v2720_v16  ;;  %v3290_v54 = vpack.c.bf16 %v3284_v61, %v3283_v50 }
 0x25a   :  { %v2553_v27 = vmax.f32 %v2532_v14, 0.0  ;;  %v2505_v43 = vadd.f32 %v2455_v2, %v6554_v6 }
 0x25b   :  { %5198 = vmatprep.mubr.msk.bf16.mxu1 %vm2563_vm9, %v2727_v31  ;;  %5258 = vmatprep.mubr.msk.bf16.mxu0 %vm2563_vm9, %v3290_v54  ;;  %v5178_v40 = vpop.f32.mrf.mxu0 }
 0x25c   :  { %2575 = vst.msk [vmem:[%s7135_s7 + $0x58] sm:$0xff] %vm2563_vm9, %v2553_v27  ;;  %v2533_v34 = vadd.f32 %v6590_v18, %v2505_v43  ;;  %v3504_v27 = vsel %vm2744_vm10, %v6565_v37, 0 }
 0x25d   :  { %v2458_v55 = vpop.f32.mrf.mxu0 }
 0x25e   :  { %v2554_v20 = vmax.f32 %v2533_v34, 0.0  ;;  %v2506_v42 = vadd.f32 %v2458_v55, %v6557_v60 }
 0x25f   :  { %v4518_v6 = vld [vmem:[%s7135_s7 + $0x51] ss:$2 sm:$0xf]  ;;  %v5179_v63 = vpop.f32.mrf.mxu0 }
 0x260   :  { %2698 = vst.msk [vmem:[#allocation2 + $0xaf] sm:$0xf] %vm2614_vm11, %v4518_v6  ;;  %v2534_v45 = vadd.f32 %v6590_v18, %v2506_v42  ;;  %v2722_v28 = vld [vmem:[#allocation2 + $0x42] sm:$0xff]  ;;  %v3285_v61 = vld [vmem:[#allocation2 + $0x15] sm:$0xff] }
 0x261   :  { %2576 = vst.msk [vmem:[%s7135_s7 + $0x60] sm:$0xff] %vm2563_vm9, %v2554_v20  ;;  %v2463_v52 = vpop.f32.mrf.mxu0 }
 0x262   :  { %v2555_v11 = vmax.f32 %v2534_v45, 0.0  ;;  %v2507_v51 = vadd.f32 %v2463_v52, %v6560_v30  ;;  %v2709_v52 = vld [vmem:[#allocation2 + $0x8] sm:$0xff] }
 0x263   :  { %v4511_v60 = vld [vmem:[%s7135_s7 + $0x52] ss:$2 sm:$0xf]  ;;  %v5182_v59 = vpop.f32.mrf.mxu0 }
 0x264   :  { %2675 = vst.msk [vmem:[#allocation2 + $0x7e] sm:$0xf] %vm2614_vm11, %v4511_v60  ;;  %v2535_v5 = vadd.f32 %v6590_v18, %v2507_v51  ;;  %v3480_v60 = vld [vmem:[#allocation2 + $0xe] sm:$0xff] }
 0x265   :  { %2577 = vst.msk [vmem:[%s7135_s7 + $0x68] sm:$0xff] %vm2563_vm9, %v2555_v11  ;;  %v2466_v10 = vpop.f32.mrf.mxu0 }
 0x266   :  { %v2556_v35 = vmax.f32 %v2535_v5, 0.0  ;;  %v2508_v17 = vadd.f32 %v2466_v10, %v6570_v38 }
 0x267   :  { %v5183_v39 = vpop.f32.mrf.mxu0 }
 0x268   :  { %v4495_v30 = vld [vmem:[%s7135_s7 + $0x5b] ss:$2 sm:$0xf]  ;;  %v4503_v21 = vld [vmem:[%s7135_s7 + $0x5a] ss:$2 sm:$0xf]  ;;  %v2536_v38 = vadd.f32 %v6590_v18, %v2508_v17 }
 0x269   :  { %2627 = vst.msk [vmem:[#allocation2 + $0x1f] sm:$0xf] %vm2614_vm11, %v4495_v30  ;;  %2651 = vst.msk [vmem:[#allocation2 + $0x50] sm:$0xf] %vm2614_vm11, %v4503_v21  ;;  %v2471_v32 = vpop.f32.mrf.mxu0  ;;  %v2708_v39 = vld [vmem:[#allocation2] sm:$0xff] }
 0x26a   :  { %2578 = vst.msk [vmem:[%s7135_s7 + $0x70] sm:$0xff] %vm2563_vm9, %v2556_v35  ;;  %v2557_v48 = vmax.f32 %v2536_v38, 0.0  ;;  %v2509_v41 = vadd.f32 %v2471_v32, %v6573_v12  ;;  %v3479_v38 = vld [vmem:[#allocation2 + $0x6] sm:$0xff]  ;;  %v2715_v32 = vpack.c.bf16 %v2709_v52, %v2708_v39 }
 0x26b   :  { %v5186_v57 = vpop.f32.mrf.mxu0 }
 0x26c   :  { %v4512_v7 = vld [vmem:[%s7135_s7 + $0x64] ss:$2 sm:$0xf]  ;;  %v4519_v1 = vld [vmem:[%s7135_s7 + $0x63] ss:$2 sm:$0xf]  ;;  %v2537_v12 = vadd.f32 %v6590_v18, %v2509_v41 }
 0x26d   :  { %2678 = vst.msk [vmem:[#allocation2 + $0x83] sm:$0xf] %vm2614_vm11, %v4512_v7  ;;  %2701 = vst.msk [vmem:[#allocation2 + $0xb4] sm:$0xf] %vm2614_vm11, %v4519_v1  ;;  %v2474_v23 = vpop.f32.mrf.mxu0  ;;  %v2710_v57 = vld [vmem:[#allocation2 + $0x10] sm:$0xff] }
 0x26e   :  { %2579 = vst.msk [vmem:[%s7135_s7 + $0x78] sm:$0xff] %vm2563_vm9, %v2557_v48  ;;  %v2558_v15 = vmax.f32 %v2537_v12, 0.0  ;;  %v2510_v47 = vadd.f32 %v2474_v23, %v6576_v19  ;;  %v3486_v48 = vpack.c.bf16 %v3480_v60, %v3479_v38  ;;  %v3481_v12 = vld [vmem:[#allocation2 + $0x16] sm:$0xff] }
 0x26f   :  { %v5187_v22 = vpop.f32.mrf.mxu0 }
 0x270   :  { %2580 = vst.msk [vmem:[%s7135_s7 + $0x80] sm:$0xff] %vm2563_vm9, %v2558_v15  ;;  %v2538_v19 = vadd.f32 %v6590_v18, %v2510_v47  ;;  %v2723_v58 = vld [vmem:[#allocation2 + $0x4a] sm:$0xff]  ;;  %v2711_v41 = vld [vmem:[#allocation2 + $0x18] sm:$0xff] }
 0x271   :  { %v4496_v9 = vld [vmem:[%s7135_s7 + $0x6d] ss:$2 sm:$0xf]  ;;  %v4504_v62 = vld [vmem:[%s7135_s7 + $0x6c] ss:$2 sm:$0xf]  ;;  %v2479_v26 = vpop.f32.mrf.mxu0  ;;  %v2728_v8 = vpack.c.bf16 %v2723_v58, %v2722_v28  ;;  %v2716_v15 = vpack.c.bf16 %v2711_v41, %v2710_v57 }
 0x272   :  { %2630 = vst.msk [vmem:[#allocation2 + $0x24] sm:$0xf] %vm2614_vm11, %v4496_v9  ;;  %2654 = vst.msk [vmem:[#allocation2 + $0x55] sm:$0xf] %vm2614_vm11, %v4504_v62  ;;  %v2559_v4 = vmax.f32 %v2538_v19, 0.0  ;;  %v2511_v49 = vadd.f32 %v2479_v26, %v6579_v53  ;;  %v2916_v62 = vsel %vm2744_vm10, %v6800_v46, 0 }
 0x273   :  { %5199 = vmatmul.mubr.msk.bf16.vlgmr.msra.gmra.mxu1 %vm2563_vm9, %v2728_v8  ;;  %v5190_v24 = vpop.f32.mrf.mxu0  ;;  %v3000_v28 = vld [vmem:[%s7133_s2 + $0xc] sm:$0xf]  ;;  %v3485_v8 = vld [vmem:[#allocation2 + $0x36] sm:$0x3] }
 0x274   :  { %2581 = vst.msk [vmem:[%s7135_s7 + $0x88] sm:$0xff] %vm2563_vm9, %v2559_v4  ;;  %v2539_v56 = vadd.f32 %v6590_v18, %v2511_v49  ;;  %5207 = vmatpush3.bf16.msra.mxu1 %v2825_v13  ;;  %v2892_v13 = vld [vmem:[#allocation2 + $0x9] sm:$0xff]  ;;  %v3489_v49 = vpack.c.bf16 %v3485_v8, %v3485_v8  ;;  %v3188_v38 = vld [vmem:[#allocation2 + $0x7d] sm:$0xff]  ;;  %v3387_v8 = vld [vmem:[#allocation2 + $0x67] sm:$0x3] }
 0x275   :  { %v4513_v25 = vld [vmem:[%s7135_s7 + $0x76] ss:$2 sm:$0xf]  ;;  %v4520_v16 = vld [vmem:[%s7135_s7 + $0x75] ss:$2 sm:$0xf]  ;;  %v2482_v53 = vpop.f32.mrf.mxu0  ;;  %5342 = vmatprep.subr.msk.bf16.mxu1 %vm2744_vm10, %v6800_v46 }
 0x276   :  { %2681 = vst.msk [vmem:[#allocation2 + $0x88] sm:$0xf] %vm2614_vm11, %v4513_v25  ;;  %2704 = vst.msk [vmem:[#allocation2 + $0xb9] sm:$0xf] %vm2614_vm11, %v4520_v16  ;;  %v2560_v3 = vmax.f32 %v2539_v56, 0.0  ;;  %v2512_v29 = vadd.f32 %v2482_v53, %v6582_v44  ;;  %v2891_v46 = vld [vmem:[#allocation2 + $0x1] sm:$0xff] }
 0x277   :  { %v4497_v14 = vld [vmem:[%s7135_s7 + $0x7f] ss:$2 sm:$0xf]  ;;  %v4505_v33 = vld [vmem:[%s7135_s7 + $0x7e] ss:$2 sm:$0xf]  ;;  %v5191_v50 = vpop.f32.mrf.mxu0  ;;  %v2898_v25 = vpack.c.bf16 %v2892_v13, %v2891_v46  ;;  %v3391_v13 = vpack.c.bf16 %v3387_v8, %v3387_v8 }
 0x278   :  { %2633 = vst.msk [vmem:[#allocation2 + $0x29] sm:$0xf] %vm2614_vm11, %v4497_v14  ;;  %2657 = vst.msk [vmem:[#allocation2 + $0x5a] sm:$0xf] %vm2614_vm11, %v4505_v33  ;;  %v2540_v44 = vadd.f32 %v6590_v18, %v2512_v29  ;;  %v2894_v16 = vld [vmem:[#allocation2 + $0x19] sm:$0xff]  ;;  %v2893_v56 = vld [vmem:[#allocation2 + $0x11] sm:$0xff] }
 0x279   :  { %2582 = vst.msk [vmem:[%s7135_s7 + $0x90] sm:$0xff] %vm2563_vm9, %v2560_v3  ;;  %v3286_v2 = vld [vmem:[#allocation2 + $0x1d] sm:$0xff]  ;;  %v2487_v31 = vpop.f32.mrf.mxu0  ;;  %v2724_v11 = vld [vmem:[#allocation2 + $0x52] sm:$0xff]  ;;  %v2899_v53 = vpack.c.bf16 %v2894_v16, %v2893_v56  ;;  %v3014_v29 = vsel %vm2744_vm10, %v3000_v28, 0  ;;  %v5424_v16 = vld [vmem:[%s7136_s3 + $0x8] sm:$0xff]  }
 0x27a   :  { %v3291_v54 = vpack.c.bf16 %v3286_v2, %v3285_v61  ;;  %v2561_v43 = vmax.f32 %v2540_v44, 0.0  ;;  %v2513_v40 = vadd.f32 %v2487_v31, %v6585_v36  ;;  %v3482_v7 = vld [vmem:[#allocation2 + $0x1e] sm:$0xff]  ;;  %v3098_v33 = vld [vmem:[%s7133_s2 + $0x10] sm:$0xf] }
 0x27b   :  { %v4514_v34 = vld [vmem:[%s7135_s7 + $0x88] ss:$2 sm:$0xf]  ;;  %v4521_v55 = vld [vmem:[%s7135_s7 + $0x87] ss:$2 sm:$0xf]  ;;  %v5194_v20 = vpop.f32.mrf.mxu0  ;;  %v3487_v47 = vpack.c.bf16 %v3482_v7, %v3481_v12 }
 0x27c   :  { %5259 = vmatmul.mubr.msk.bf16.vlgmr.msra.gmra.mxu0 %vm2563_vm9, %v3291_v54  ;;  %2684 = vst.msk [vmem:[#allocation2 + $0x8d] sm:$0xf] %vm2614_vm11, %v4514_v34  ;;  %2707 = vst.msk [vmem:[#allocation2 + $0xbe] sm:$0xf] %vm2614_vm11, %v4521_v55  ;;  %v2541_v37 = vadd.f32 %v6590_v18, %v2513_v40  ;;  %v3289_v18 = vld [vmem:[#allocation2 + $0x35] sm:$0x3] }
 0x27d   :  { %2583 = vst.msk [vmem:[%s7135_s7 + $0x98] sm:$0xff] %vm2563_vm9, %v2561_v43  ;;  %5277 = vmatpush3.bf16.msra.mxu0 %v3504_v27  ;;  %v2490_v36 = vpop.f32.mrf.mxu0  ;;  %v3293_v35 = vpack.c.bf16 %v3289_v18, %v3289_v18  ;;  %v2712_v9 = vld [vmem:[#allocation2 + $0x20] sm:$0xff]  ;;  %v2990_v44 = vld [vmem:[#allocation2 + $0x6c] sm:$0xff]  ;;  %v2991_v43 = vld [vmem:[#allocation2 + $0x74] sm:$0xff]  ;;  %v3112_v55 = vsel %vm2744_vm10, %v3098_v33, 0 }
 0x27e   :  { %v2562_v42 = vmax.f32 %v2541_v37, 0.0  ;;  %v2895_v3 = vld [vmem:[#allocation2 + $0x21] sm:$0xff]  ;;  %v3196_v37 = vld [vmem:[%s7133_s2 + $0x14] sm:$0xf] }
 0x27f   :  { %v5195_v45 = vpop.f32.mrf.mxu0  ;;  %v3287_v51 = vld [vmem:[#allocation2 + $0x25] sm:$0xff]  ;;  %v2992_v54 = vld [vmem:[#allocation2 + $0x7c] sm:$0xff]  ;;  %v2995_v36 = vld [vmem:[#allocation2 + $0x94] sm:$0x3] }
 0x280   :  { %v4498_v6 = vld [vmem:[%s7135_s7 + $0x91] ss:$2 sm:$0xf]  ;;  %v4506_v63 = vld [vmem:[%s7135_s7 + $0x90] ss:$2 sm:$0xf]  ;;  %v2997_v40 = vpack.c.bf16 %v2992_v54, %v2991_v43 }
 0x281   :  { %2636 = vst.msk [vmem:[#allocation2 + $0x2e] sm:$0xf] %vm2614_vm11, %v4498_v6  ;;  %2660 = vst.msk [vmem:[#allocation2 + $0x5f] sm:$0xf] %vm2614_vm11, %v4506_v63  ;;  %v3483_v19 = vld [vmem:[#allocation2 + $0x26] sm:$0xff]  ;;  %v3088_v6 = vld [vmem:[#allocation2 + $0x9e] sm:$0xff] }
 0x282   :  { %2585 = vst.msk [vmem:[%s7135_s7 + $0xa0] sm:$0x3] %vm2584_vm12, %v2562_v42  ;;  %v2989_v2 = vld [vmem:[#allocation2 + $0x64] sm:$0xff]  ;;  %v2999_v42 = vpack.c.bf16 %v2995_v36, %v2995_v36  ;;  %v3087_v63 = vld [vmem:[#allocation2 + $0x96] sm:$0xff]  ;;  %v3090_v18 = vld [vmem:[#allocation2 + $0xae] sm:$0xff] }
 0x283   :  { %v2996_v31 = vpack.c.bf16 %v2990_v44, %v2989_v2  ;;  %v2994_v27 = vld [vmem:[#allocation2 + $0x8c] sm:$0xff]  ;;  %v2993_v34 = vld [vmem:[#allocation2 + $0x84] sm:$0xff]  ;;  %v3094_v45 = vpack.c.bf16 %v3088_v6, %v3087_v63  ;;  %v3091_v60 = vld [vmem:[#allocation2 + $0xb6] sm:$0xff] }
 0x284   :  { %v2998_v20 = vpack.c.bf16 %v2994_v27, %v2993_v34  ;;  %v3092_v52 = vld [vmem:[#allocation2 + $0xbe] sm:$0xff]  ;;  %v3191_v12 = vld [vmem:[#allocation2 + $0x95] sm:$0x3] }
 0x285   :  { %v3189_v7 = vld [vmem:[#allocation2 + $0x85] sm:$0xff]  ;;  %v6953_v44 = vld [vmem:[%s7136_s3 + $0x10] sm:$0xff]  }
 0x286   :  { %7143 = vst [vmem:[#allocation4_spill] sm:$0xff] %v6953_v44 }
 0x288   :  { %v2725_v59 = vld [vmem:[#allocation2 + $0x5a] sm:$0xff]  ;;  %v3288_v5 = vld [vmem:[#allocation2 + $0x2d] sm:$0xff]  ;;  %v2726_v10 = vld [vmem:[#allocation2 + $0x62] sm:$0x3] }
 0x289   :  { %v2729_v17 = vpack.c.bf16 %v2725_v59, %v2724_v11  ;;  %v3292_v30 = vpack.c.bf16 %v3288_v5, %v3287_v51  ;;  %v2730_v21 = vpack.c.bf16 %v2726_v10, %v2726_v10  ;;  %v2713_v1 = vld [vmem:[#allocation2 + $0x28] sm:$0xff]  ;;  %v2714_v26 = vld [vmem:[#allocation2 + $0x30] sm:$0x3]  ;;  %v3210_v59 = vsel %vm2744_vm10, %v3196_v37, 0  ;;  %v3392_v10 = vld [vmem:[%s7133_s2 + $0x1c] sm:$0xf] }
 0x28a   :  { %v3484_v23 = vld [vmem:[#allocation2 + $0x2e] sm:$0xff]  ;;  %v2717_v22 = vpack.c.bf16 %v2713_v1, %v2712_v9  ;;  %v2718_v4 = vpack.c.bf16 %v2714_v26, %v2714_v26  ;;  %v3089_v11 = vld [vmem:[#allocation2 + $0xa6] sm:$0xff]  ;;  %v3096_v5 = vpack.c.bf16 %v3092_v52, %v3091_v60  ;;  %v3406_v1 = vsel %vm2744_vm10, %v3392_v10, 0 }
 0x28b   :  { %5202 = vmatprep.mubr.msk.bf16.mxu1 %vm2563_vm9, %v2729_v17  ;;  %5262 = vmatprep.mubr.msk.bf16.mxu0 %vm2563_vm9, %v3292_v30  ;;  %v3488_v58 = vpack.c.bf16 %v3484_v23, %v3483_v19  ;;  %v2896_v24 = vld [vmem:[#allocation2 + $0x29] sm:$0xff]  ;;  %v2897_v50 = vld [vmem:[#allocation2 + $0x31] sm:$0x3]  ;;  %v3095_v51 = vpack.c.bf16 %v3090_v18, %v3089_v11  ;;  %v3382_v23 = vld [vmem:[#allocation2 + $0x3f] sm:$0xff] }
 0x28c   :  { %5203 = vmatmul.mubr.msk.bf16.gmra.mxu1 %vm2563_vm9, %v2730_v21  ;;  %5263 = vmatmul.mubr.msk.bf16.gmra.mxu0 %vm2563_vm9, %v3293_v35  ;;  %v2900_v14 = vpack.c.bf16 %v2896_v24, %v2895_v3  ;;  %v2901_v61 = vpack.c.bf16 %v2897_v50, %v2897_v50  ;;  %v3093_v35 = vld [vmem:[#allocation2 + $0xc6] sm:$0x3]  ;;  %v3186_v30 = vld [vmem:[#allocation2 + $0x6d] sm:$0xff] }
 0x28d   :  { %5208 = vmatprep.mubr.msk.bf16.mxu1 %vm2563_vm9, %v2715_v32  ;;  %5278 = vmatprep.mubr.msk.bf16.mxu0 %vm2563_vm9, %v3486_v48  ;;  %v3097_v17 = vpack.c.bf16 %v3093_v35, %v3093_v35  ;;  %v3185_v21 = vld [vmem:[#allocation2 + $0x65] sm:$0xff]  ;;  %v3190_v32 = vld [vmem:[#allocation2 + $0x8d] sm:$0xff]  ;;  %v3187_v48 = vld [vmem:[#allocation2 + $0x75] sm:$0xff] }
 0x28e   :  { %v3192_v39 = vpack.c.bf16 %v3186_v30, %v3185_v21  ;;  %v3193_v41 = vpack.c.bf16 %v3188_v38, %v3187_v48  ;;  %v3194_v57 = vpack.c.bf16 %v3190_v32, %v3189_v7  ;;  %v3383_v19 = vld [vmem:[#allocation2 + $0x47] sm:$0xff] }
 0x28f   :  { %v5425_v24 = vld [vmem:[%s7136_s3] sm:$0xff]  }
 0x290   :  { %5292 = vmatprep.subr.bf16.mxu0 %v5425_v24 }
 0x294   :  { %5209 = vmatmul.mubr.msk.bf16.vlgmr.msra.gmra.mxu1 %vm2563_vm9, %v2716_v15  ;;  %5279 = vmatmul.mubr.msk.bf16.vlgmr.msra.gmra.mxu0 %vm2563_vm9, %v3487_v47  ;;  %v3195_v15 = vpack.c.bf16 %v3191_v12, %v3191_v12  ;;  %v3381_v47 = vld [vmem:[#allocation2 + $0x37] sm:$0xff] }
 0x295   :  { %5212 = vmatprep.mubr.msk.bf16.mxu1 %vm2563_vm9, %v2717_v22  ;;  %5217 = vmatpush3.bf16.msra.mxu1 %v2916_v62  ;;  %v3388_v9 = vpack.c.bf16 %v3382_v23, %v3381_v47  ;;  %v3384_v62 = vld [vmem:[#allocation2 + $0x4f] sm:$0xff]  ;;  %v3386_v22 = vld [vmem:[#allocation2 + $0x5f] sm:$0xff] }
 0x296   :  { %5282 = vmatprep.mubr.msk.bf16.mxu0 %vm2563_vm9, %v3488_v58  ;;  %5343 = vmatprep.subr.msk.bf16.mxu1 %vm2744_vm10, %v3000_v28  ;;  %v3389_v28 = vpack.c.bf16 %v3384_v62, %v3383_v19  ;;  %v3385_v58 = vld [vmem:[#allocation2 + $0x57] sm:$0xff] }
 0x297   :  { %v3390_v26 = vpack.c.bf16 %v3386_v22, %v3385_v58  ;;  %5293 = vmatpush3.bf16.msra.mxu0 %v5425_v24 }
 0x29c   :  { %5213 = vmatmul.mubr.msk.bf16.gmra.mxu1 %vm2563_vm9, %v2718_v4  ;;  %5283 = vmatmul.mubr.msk.bf16.gmra.mxu0 %vm2563_vm9, %v3489_v49 }
 0x29d   :  { %5218 = vmatprep.mubr.msk.bf16.mxu1 %vm2563_vm9, %v2898_v25 }
 0x2a4   :  { %5219 = vmatmul.mubr.msk.bf16.vlgmr.msra.gmra.mxu1 %vm2563_vm9, %v2899_v53 }
 0x2a5   :  { %5222 = vmatprep.mubr.msk.bf16.mxu1 %vm2563_vm9, %v2900_v14  ;;  %5227 = vmatpush3.bf16.msra.mxu1 %v3014_v29 }
 0x2a6   :  { %5344 = vmatprep.subr.msk.bf16.mxu1 %vm2744_vm10, %v3098_v33 }
 0x2ac   :  { %5223 = vmatmul.mubr.msk.bf16.gmra.mxu1 %vm2563_vm9, %v2901_v61  ;;  %v6958_v61 = vld [vmem:[%s7136_s3 + $0x18] sm:$0xff]  }
 0x2ad   :  { %5228 = vmatprep.mubr.msk.bf16.mxu1 %vm2563_vm9, %v2996_v31  ;;  %7144 = vst [vmem:[#allocation5_spill] sm:$0xff] %v6958_v61  ;;  %5304 = vmatprep.subr.bf16.mxu0 %v6958_v61 }
 0x2b4   :  { %5229 = vmatmul.mubr.msk.bf16.vlgmr.msra.gmra.mxu1 %vm2563_vm9, %v2997_v40 }
 0x2b5   :  { %5232 = vmatprep.mubr.msk.bf16.mxu1 %vm2563_vm9, %v2998_v20  ;;  %5237 = vmatpush3.bf16.msra.mxu1 %v3112_v55 }
 0x2b6   :  { %5345 = vmatprep.subr.msk.bf16.mxu1 %vm2744_vm10, %v3196_v37 }
 0x2bc   :  { %5233 = vmatmul.mubr.msk.bf16.gmra.mxu1 %vm2563_vm9, %v2999_v42 }
 0x2bd   :  { %5238 = vmatprep.mubr.msk.bf16.mxu1 %vm2563_vm9, %v3094_v45 }
 0x2c4   :  { %5239 = vmatmul.mubr.msk.bf16.vlgmr.msra.gmra.mxu1 %vm2563_vm9, %v3095_v51 }
 0x2c5   :  { %5242 = vmatprep.mubr.msk.bf16.mxu1 %vm2563_vm9, %v3096_v5  ;;  %5247 = vmatpush3.bf16.msra.mxu1 %v3210_v59 }
 0x2c6   :  { %5347 = vmatprep.subr.msk.bf16.mxu1 %vm2744_vm10, %v3392_v10 }
 0x2cc   :  { %5243 = vmatmul.mubr.msk.bf16.gmra.mxu1 %vm2563_vm9, %v3097_v17 }
 0x2cd   :  { %5248 = vmatprep.mubr.msk.bf16.mxu1 %vm2563_vm9, %v3192_v39 }
 0x2d4   :  { %5249 = vmatmul.mubr.msk.bf16.vlgmr.msra.gmra.mxu1 %vm2563_vm9, %v3193_v41 }
 0x2d5   :  { %5252 = vmatprep.mubr.msk.bf16.mxu1 %vm2563_vm9, %v3194_v57  ;;  %5267 = vmatpush3.bf16.msra.mxu1 %v3406_v1 }
 0x2d6   :  { %5286 = vmatprep.subr.bf16.mxu1 %v5424_v16 }
 0x2dc   :  { %5253 = vmatmul.mubr.msk.bf16.gmra.mxu1 %vm2563_vm9, %v3195_v15 }
 0x2dd   :  { %5268 = vmatprep.mubr.msk.bf16.mxu1 %vm2563_vm9, %v3388_v9 }
 0x2e4   :  { %5269 = vmatmul.mubr.msk.bf16.vlgmr.msra.gmra.mxu1 %vm2563_vm9, %v3389_v28 }
 0x2e5   :  { %5272 = vmatprep.mubr.msk.bf16.mxu1 %vm2563_vm9, %v3390_v26  ;;  %5287 = vmatpush3.bf16.msra.mxu1 %v5424_v16 }
 0x2e6   :  { %5298 = vmatprep.subr.bf16.mxu1 %v6953_v44 }
 0x2ec   :  { %5273 = vmatmul.mubr.msk.bf16.gmra.mxu1 %vm2563_vm9, %v3391_v13 }
 0x333   :  { %v5200_v4 = vpop.f32.mrf.mxu1 }
 0x335   :  { %v2782_v46 = vpop.f32.mrf.mxu1 }
 0x337   :  { %v5201_v56 = vpop.f32.mrf.mxu1 }
 0x339   :  { %v2785_v0 = vpop.f32.mrf.mxu1 }
 0x33c   :  { %v6932_v49 = vpop.f32.mrf.mxu0 }
 0x33e   :  { %v6934_v25 = vpop.f32.mrf.mxu0 }
 0x340   :  { %v6942_v53 = vpop.f32.mrf.mxu0 }
 0x342   :  { %v6944_v3 = vpop.f32.mrf.mxu0 }
 0x34c   :  { %v5204_v29 = vpop.f32.mrf.mxu1  ;;  %v6946_v14 = vpop.f32.mrf.mxu0 }
 0x34e   :  { %v2798_v33 = vpop.f32.mrf.mxu1  ;;  %v6948_v50 = vpop.f32.mrf.mxu0 }
 0x350   :  { %v5205_v2 = vpop.f32.mrf.mxu1  ;;  %v5265_v31 = vpop.f32.mrf.mxu0 }
 0x352   :  { %v2801_v54 = vpop.f32.mrf.mxu1  ;;  %v6962_v27 = vpop.f32.mrf.mxu0 }
 0x354   :  { %v5210_v43 = vpop.f32.mrf.mxu1  ;;  %v6964_v40 = vpop.f32.mrf.mxu0 }
 0x355   :  { %v2870_v34 = vadd.f32 %v5210_v43, %v5200_v4 }
 0x356   :  { %v2861_v55 = vpop.f32.mrf.mxu1  ;;  %v6966_v20 = vpop.f32.mrf.mxu0 }
 0x357   :  { %v2862_v37 = vadd.f32 %v2861_v55, %v2782_v46 }
 0x358   :  { %v5211_v36 = vpop.f32.mrf.mxu1  ;;  %v6968_v42 = vpop.f32.mrf.mxu0 }
 0x359   :  { %v2873_v6 = vadd.f32 %v5211_v36, %v5201_v56 }
 0x35a   :  { %v2864_v63 = vpop.f32.mrf.mxu1  ;;  %v6970_v45 = vpop.f32.mrf.mxu0 }
 0x35b   :  { %v2865_v18 = vadd.f32 %v2864_v63, %v2785_v0 }
 0x35c   :  { %v5214_v52 = vpop.f32.mrf.mxu1  ;;  %v6972_v11 = vpop.f32.mrf.mxu0 }
 0x35d   :  { %v2886_v51 = vadd.f32 %v5214_v52, %v5204_v29 }
 0x35e   :  { %v2877_v60 = vpop.f32.mrf.mxu1  ;;  %v6974_v59 = vpop.f32.mrf.mxu0 }
 0x35f   :  { %v2878_v5 = vadd.f32 %v2877_v60, %v2798_v33 }
 0x360   :  { %v5215_v10 = vpop.f32.mrf.mxu1  ;;  %v5285_v35 = vpop.f32.mrf.mxu0 }
 0x362   :  { %v2880_v17 = vpop.f32.mrf.mxu1 }
 0x363   :  { %v2881_v30 = vadd.f32 %v2880_v17, %v2801_v54 }
 0x364   :  { %v5220_v21 = vpop.f32.mrf.mxu1 }
 0x365   :  { %v2984_v0 = vadd.f32 %v5220_v21, %v2870_v34 }
 0x366   :  { %v2952_v39 = vpop.f32.mrf.mxu1 }
 0x367   :  { %v2982_v33 = vadd.f32 %v2952_v39, %v2862_v37 }
 0x368   :  { %v5221_v38 = vpop.f32.mrf.mxu1 }
 0x369   :  { %v2985_v54 = vadd.f32 %v5221_v38, %v2873_v6 }
 0x36a   :  { %v2955_v32 = vpop.f32.mrf.mxu1 }
 0x36b   :  { %v2983_v63 = vadd.f32 %v2955_v32, %v2865_v18 }
 0x36c   :  { %v5224_v48 = vpop.f32.mrf.mxu1 }
 0x36d   :  { %v2988_v35 = vadd.f32 %v5224_v48, %v2886_v51 }
 0x36e   :  { %v2968_v41 = vpop.f32.mrf.mxu1 }
 0x36f   :  { %v2986_v61 = vadd.f32 %v2968_v41, %v2878_v5  ;;  %v4558_v5 = vld [vmem:[%s7137_s5] ss:$0 sm:$0xff] }
 0x370   :  { %v5225_v7 = vpop.f32.mrf.mxu1 }
 0x372   :  { %v2971_v1 = vpop.f32.mrf.mxu1 }
 0x374   :  { %v5230_v57 = vpop.f32.mrf.mxu1 }
 0x375   :  { %v3082_v2 = vadd.f32 %v5230_v57, %v2984_v0 }
 0x376   :  { %v3050_v12 = vpop.f32.mrf.mxu1 }
 0x377   :  { %v3080_v43 = vadd.f32 %v3050_v12, %v2982_v33 }
 0x378   :  { %v5231_v23 = vpop.f32.mrf.mxu1 }
 0x379   :  { %v3083_v52 = vadd.f32 %v5231_v23, %v2985_v54  ;;  %v2987_v23 = vadd.f32 %v2971_v1, %v2881_v30 }
 0x37a   :  { %v3053_v15 = vpop.f32.mrf.mxu1 }
 0x37b   :  { %v3081_v7 = vadd.f32 %v3053_v15, %v2983_v63  ;;  %v3559_v63 = vpop.f32.mrf.mxu0 }
 0x37c   :  { %v5234_v47 = vpop.f32.mrf.mxu1 }
 0x37d   :  { %v3086_v44 = vadd.f32 %v5234_v47, %v2988_v35 }
 0x37e   :  { %v3066_v9 = vpop.f32.mrf.mxu1 }
 0x37f   :  { %v3084_v6 = vadd.f32 %v3066_v9, %v2986_v61 }
 0x380   :  { %v5235_v62 = vpop.f32.mrf.mxu1 }
 0x382   :  { %v3069_v22 = vpop.f32.mrf.mxu1 }
 0x383   :  { %v3085_v61 = vadd.f32 %v3069_v22, %v2987_v23 }
 0x384   :  { %v5240_v19 = vpop.f32.mrf.mxu1 }
 0x385   :  { %v3180_v55 = vadd.f32 %v5240_v19, %v3082_v2 }
 0x386   :  { %v3148_v28 = vpop.f32.mrf.mxu1 }
 0x387   :  { %v3178_v60 = vadd.f32 %v3148_v28, %v3080_v43 }
 0x388   :  { %v5241_v58 = vpop.f32.mrf.mxu1 }
 0x389   :  { %v3181_v62 = vadd.f32 %v5241_v58, %v3083_v52 }
 0x38a   :  { %v3151_v26 = vpop.f32.mrf.mxu1 }
 0x38b   :  { %v3179_v21 = vadd.f32 %v3151_v26, %v3081_v7 }
 0x38c   :  { %v5244_v8 = vpop.f32.mrf.mxu1 }
 0x38d   :  { %v3184_v38 = vadd.f32 %v5244_v8, %v3086_v44 }
 0x38e   :  { %v3164_v13 = vpop.f32.mrf.mxu1 }
 0x38f   :  { %v3182_v51 = vadd.f32 %v3164_v13, %v3084_v6 }
 0x390   :  { %v5245_v4 = vpop.f32.mrf.mxu1 }
 0x392   :  { %v3167_v46 = vpop.f32.mrf.mxu1 }
 0x393   :  { %v3183_v1 = vadd.f32 %v3167_v46, %v3085_v61 }
 0x394   :  { %v5250_v16 = vpop.f32.mrf.mxu1 }
 0x395   :  { %v3278_v10 = vadd.f32 %v5250_v16, %v3180_v55 }
 0x396   :  { %v3246_v24 = vpop.f32.mrf.mxu1 }
 0x397   :  { %v3276_v4 = vadd.f32 %v3246_v24, %v3178_v60  ;;  %v3376_v39 = vadd.f32 %v6932_v49, %v3278_v10 }
 0x398   :  { %v5251_v56 = vpop.f32.mrf.mxu1 }
 0x399   :  { %v3279_v37 = vadd.f32 %v5251_v56, %v3181_v62  ;;  %v3374_v32 = vadd.f32 %v6934_v25, %v3276_v4 }
 0x39a   :  { %v3249_v29 = vpop.f32.mrf.mxu1 }
 0x39b   :  { %v3277_v12 = vadd.f32 %v3249_v29, %v3179_v21  ;;  %v3377_v49 = vadd.f32 %v6942_v53, %v3279_v37 }
 0x39c   :  { %v5254_v31 = vpop.f32.mrf.mxu1 }
 0x39d   :  { %v3282_v48 = vadd.f32 %v5254_v31, %v3184_v38  ;;  %v3375_v30 = vadd.f32 %v6944_v3, %v3277_v12 }
 0x39e   :  { %v3262_v36 = vpop.f32.mrf.mxu1 }
 0x39f   :  { %v3280_v44 = vadd.f32 %v3262_v36, %v3182_v51  ;;  %v3380_v26 = vadd.f32 %v6946_v14, %v3282_v48 }
 0x3a0   :  { %v5255_v17 = vpop.f32.mrf.mxu1 }
 0x3a1   :  { %v3378_v22 = vadd.f32 %v6948_v50, %v3280_v44 }
 0x3a2   :  { %v3265_v34 = vpop.f32.mrf.mxu1 }
 0x3a3   :  { %v3281_v24 = vadd.f32 %v3265_v34, %v3183_v1  ;;  %v5428_v1 = vld [vmem:[%s7136_s3 + $0x20] sm:$0xff]  }
 0x3a4   :  { %v5270_v57 = vpop.f32.mrf.mxu1 }
 0x3a5   :  { %v3474_v18 = vadd.f32 %v5270_v57, %v3376_v39  ;;  %v3379_v54 = vadd.f32 %v6962_v27, %v3281_v24 }
 0x3a6   :  { %v3442_v41 = vpop.f32.mrf.mxu1 }
 0x3a7   :  { %v3572_v15 = vadd.f32 %v6964_v40, %v3474_v18  ;;  %v3472_v47 = vadd.f32 %v3442_v41, %v3374_v32 }
 0x3a8   :  { %v5271_v9 = vpop.f32.mrf.mxu1 }
 0x3a9   :  { %v3586_v19 = vadd.f32 %v4558_v5, %v3572_v15  ;;  %v3570_v28 = vadd.f32 %v6966_v20, %v3472_v47  ;;  %v3475_v25 = vadd.f32 %v5271_v9, %v3377_v49 }
 0x3aa   :  { %v3445_v58 = vpop.f32.mrf.mxu1 }
 0x3ab   :  { %v3593_v8 = vmax.f32 %v3586_v19, 0.0  ;;  %v3584_v13 = vadd.f32 %v4558_v5, %v3570_v28  ;;  %v3573_v40 = vadd.f32 %v6968_v42, %v3475_v25  ;;  %v3473_v16 = vadd.f32 %v3445_v58, %v3375_v30 }
 0x3ac   :  { %v5274_v53 = vpop.f32.mrf.mxu1 }
 0x3ad   :  { %3601 = vst.msk [vmem:[%s7138_s8 + $0x10] sm:$0xff] %vm3598_vm13, %v3593_v8  ;;  %v3591_v20 = vmax.f32 %v3584_v13, 0.0  ;;  %v3587_v3 = vadd.f32 %v4558_v5, %v3573_v40  ;;  %v3571_v46 = vadd.f32 %v6970_v45, %v3473_v16  ;;  %v3478_v56 = vadd.f32 %v5274_v53, %v3380_v26  ;;  %v5429_v26 = vld [vmem:[%s7136_s3 + $0x28] sm:$0xff]   ;;  %v3870_v8 = vld [vmem:[#allocation3 + $0x34] sm:$0x3] }
 0x3ae   :  { %v3458_v14 = vpop.f32.mrf.mxu1  ;;  %v7145_v13 = vld [vmem:[#allocation4_spill] sm:$0xff]  ;;  %v7146_v40 = vld [vmem:[#allocation5_spill] sm:$0xff]  ;;  %v3872_v16 = vpack.c.bf16 %v3870_v8, %v3870_v8 }
 0x3af   :  { %3599 = vst.msk [vmem:[%s7138_s8] sm:$0xff] %vm3598_vm13, %v3591_v20  ;;  %v3594_v42 = vmax.f32 %v3587_v3, 0.0  ;;  %v3585_v0 = vadd.f32 %v4558_v5, %v3571_v46  ;;  %v3576_v50 = vadd.f32 %v6972_v11, %v3478_v56  ;;  %v3476_v29 = vadd.f32 %v3458_v14, %v3378_v22  ;;  %v5430_v14 = vld [vmem:[%s7136_s3 + $0x30] sm:$0xff]  }
 0x3b0   :  { %v5275_v33 = vpop.f32.mrf.mxu1 }
 0x3b1   :  { %3602 = vst.msk [vmem:[%s7138_s8 + $0x18] sm:$0xff] %vm3598_vm13, %v3594_v42  ;;  %v3592_v2 = vmax.f32 %v3585_v0, 0.0  ;;  %v3590_v45 = vadd.f32 %v4558_v5, %v3576_v50  ;;  %v3574_v31 = vadd.f32 %v6974_v59, %v3476_v29  ;;  %v5431_v0 = vld [vmem:[%s7136_s3 + $0x38] sm:$0xff]   ;;  %v3940_v50 = vld [vmem:[#allocation3 + $0x46] sm:$0x3] }
 0x3b2   :  { %v3461_v43 = vpop.f32.mrf.mxu1 }
 0x3b3   :  { %3600 = vst.msk [vmem:[%s7138_s8 + $0x8] sm:$0xff] %vm3598_vm13, %v3592_v2  ;;  %v3597_v11 = vmax.f32 %v3590_v45, 0.0  ;;  %v3588_v55 = vadd.f32 %v4558_v5, %v3574_v31  ;;  %v3477_v36 = vadd.f32 %v3461_v43, %v3379_v54  ;;  %v3942_v2 = vpack.c.bf16 %v3940_v50, %v3940_v50 }
 0x3b4   :  { %v4560_v52 = vld [vmem:[%s7138_s8 + $0x10] ss:$2 sm:$0x3] }
 0x3b5   :  { %3606 = vst.msk [vmem:[%s7138_s8 + $0x30] sm:$0x3] %vm3605_vm14, %v3597_v11  ;;  %3622 = vst.msk [vmem:[#allocation3 + $0x7] sm:$0x3] %vm3605_vm14, %v4560_v52  ;;  %v3595_v27 = vmax.f32 %v3588_v55, 0.0  ;;  %v3575_v59 = vadd.f32 %v3559_v63, %v3477_v36  ;;  %v5432_v55 = vld [vmem:[%s7136_s3 + $0x40] sm:$0xff]  }
 0x3b6   :  { %v4563_v60 = vld [vmem:[%s7138_s8 + $0x5] ss:$2 sm:$0x3]  ;;  %v4567_v10 = vld [vmem:[%s7138_s8 + $0x1] ss:$2 sm:$0x3] }
 0x3b7   :  { %v3653_v35 = vld [vmem:[%s7138_s8] ss:$2 sm:$0x3]  ;;  %3631 = vst.msk [vmem:[#allocation3 + $0x15] sm:$0x3] %vm3605_vm14, %v4563_v60  ;;  %v3589_v17 = vadd.f32 %v4558_v5, %v3575_v59 }
 0x3b8   :  { %3643 = vst.msk [vmem:[#allocation3 + $0x25] sm:$0x3] %vm3605_vm14, %v4567_v10  ;;  %v4569_v7 = vld [vmem:[%s7138_s8 + $0x1a] ss:$2 sm:$0x3] }
 0x3b9   :  { %3603 = vst.msk [vmem:[%s7138_s8 + $0x20] sm:$0xff] %vm3598_vm13, %v3595_v27  ;;  %v4572_v62 = vld [vmem:[%s7138_s8 + $0x19] ss:$2 sm:$0x3]  ;;  %v3596_v4 = vmax.f32 %v3589_v17, 0.0 }
 0x3ba   :  { %3654 = vst.msk [vmem:[#allocation3 + $0x36] sm:$0x3] %vm3605_vm14, %v3653_v35  ;;  %3649 = vst.msk [vmem:[#allocation3 + $0x2e] sm:$0x3] %vm3605_vm14, %v4569_v7  ;;  %v4080_v63 = vld [vmem:[#allocation3 + $0x13] sm:$0x3] }
 0x3bb   :  { %3660 = vst.msk [vmem:[#allocation3 + $0x3f] sm:$0x3] %vm3605_vm14, %v4572_v62  ;;  %v4559_v34 = vld [vmem:[%s7138_s8 + $0x6] ss:$2 sm:$0x3]  ;;  %v4082_v27 = vpack.c.bf16 %v4080_v63, %v4080_v63 }
 0x3bc   :  { %v4564_v21 = vld [vmem:[%s7138_s8 + $0xf] ss:$2 sm:$0x3]  ;;  %v4568_v37 = vld [vmem:[%s7138_s8 + $0xb] ss:$2 sm:$0x3] }
 0x3bd   :  { %v4571_v39 = vld [vmem:[%s7138_s8 + $0xa] ss:$2 sm:$0x3]  ;;  %3619 = vst.msk [vmem:[#allocation3 + $0x4] sm:$0x3] %vm3605_vm14, %v4559_v34 }
 0x3be   :  { %3634 = vst.msk [vmem:[#allocation3 + $0x18] sm:$0x3] %vm3605_vm14, %v4564_v21  ;;  %3646 = vst.msk [vmem:[#allocation3 + $0x28] sm:$0x3] %vm3605_vm14, %v4568_v37  ;;  %v4220_v17 = vld [vmem:[#allocation3 + $0x14] sm:$0x3] }
 0x3bf   :  { %3604 = vst.msk [vmem:[%s7138_s8 + $0x28] sm:$0xff] %vm3598_vm13, %v3596_v4  ;;  %v4150_v52 = vld [vmem:[#allocation3 + $0x25] sm:$0x3]  ;;  %v4222_v7 = vpack.c.bf16 %v4220_v17, %v4220_v17 }
 0x3c0   :  { %3657 = vst.msk [vmem:[#allocation3 + $0x39] sm:$0x3] %vm3605_vm14, %v4571_v39  ;;  %v4561_v6 = vld [vmem:[%s7138_s8 + $0x1f] ss:$2 sm:$0x3]  ;;  %v4152_v60 = vpack.c.bf16 %v4150_v52, %v4150_v52 }
 0x3c1   :  { %v4565_v38 = vld [vmem:[%s7138_s8 + $0x1e] ss:$2 sm:$0x3]  ;;  %v4570_v57 = vld [vmem:[%s7138_s8 + $0x24] ss:$2 sm:$0x3] }
 0x3c2   :  { %v4573_v12 = vld [vmem:[%s7138_s8 + $0x23] ss:$2 sm:$0x3]  ;;  %3625 = vst.msk [vmem:[#allocation3 + $0xd] sm:$0x3] %vm3605_vm14, %v4561_v6 }
 0x3c3   :  { %3637 = vst.msk [vmem:[#allocation3 + $0x1e] sm:$0x3] %vm3605_vm14, %v4565_v38  ;;  %3652 = vst.msk [vmem:[#allocation3 + $0x31] sm:$0x3] %vm3605_vm14, %v4570_v57  ;;  %v4010_v29 = vld [vmem:[#allocation3 + $0x35] sm:$0x3] }
 0x3c4   :  { %3663 = vst.msk [vmem:[#allocation3 + $0x42] sm:$0x3] %vm3605_vm14, %v4573_v12  ;;  %v3664_v23 = vld [vmem:[#allocation3] sm:$0xff]  ;;  %v4012_v31 = vpack.c.bf16 %v4010_v29, %v4010_v29 }
 0x3c5   :  { %v3671_v5 = vld [vmem:[#allocation3 + $0x12] sm:$0xff]  ;;  %v3868_v19 = vld [vmem:[#allocation3 + $0x24] sm:$0xff] }
 0x3c6   :  { %v4562_v18 = vld [vmem:[%s7138_s8 + $0x29] ss:$2 sm:$0x3]  ;;  %v4566_v32 = vld [vmem:[%s7138_s8 + $0x28] ss:$2 sm:$0x3] }
 0x3c7   :  { %3628 = vst.msk [vmem:[#allocation3 + $0x10] sm:$0x3] %vm3605_vm14, %v4562_v18  ;;  %3640 = vst.msk [vmem:[#allocation3 + $0x21] sm:$0x3] %vm3605_vm14, %v4566_v32  ;;  %v3798_v30 = vld [vmem:[#allocation3 + $0x1] sm:$0xff]  ;;  %v3938_v56 = vld [vmem:[#allocation3 + $0x36] sm:$0xff] }
 0x3c8   :  { %v4008_v20 = vld [vmem:[#allocation3 + $0x25] sm:$0xff]  ;;  %v4148_v54 = vld [vmem:[#allocation3 + $0x15] sm:$0xff] }
 0x3c9   :  { %v3665_v51 = vld [vmem:[#allocation3 + $0x8] sm:$0xff] }
 0x3ca   :  { %v3667_v48 = vpack.c.bf16 %v3665_v51, %v3664_v23  ;;  %v3869_v41 = vld [vmem:[#allocation3 + $0x2c] sm:$0xff]  ;;  %v4078_v11 = vld [vmem:[#allocation3 + $0x3] sm:$0xff] }
 0x3cb   :  { %v3871_v25 = vpack.c.bf16 %v3869_v41, %v3868_v19  ;;  %v4009_v53 = vld [vmem:[#allocation3 + $0x2d] sm:$0xff]  ;;  %v3939_v22 = vld [vmem:[#allocation3 + $0x3e] sm:$0xff] }
 0x3cc   :  { %5294 = vmatprep.mubr.msk.bf16.mxu0 %vm3598_vm13, %v3667_v48  ;;  %v4011_v46 = vpack.c.bf16 %v4009_v53, %v4008_v20  ;;  %v3941_v42 = vpack.c.bf16 %v3939_v22, %v3938_v56  ;;  %v4218_v10 = vld [vmem:[#allocation3 + $0x4] sm:$0xff] }
 0x3ce   :  { %v3672_v15 = vld [vmem:[#allocation3 + $0x1a] sm:$0xff]  ;;  %v3666_v47 = vld [vmem:[#allocation3 + $0x10] sm:$0x3]  ;;  %v3673_v49 = vld [vmem:[#allocation3 + $0x22] sm:$0x3] }
 0x3cf   :  { %v3674_v61 = vpack.c.bf16 %v3672_v15, %v3671_v5  ;;  %v3668_v44 = vpack.c.bf16 %v3666_v47, %v3666_v47  ;;  %v3675_v9 = vpack.c.bf16 %v3673_v49, %v3673_v49  ;;  %v3799_v28 = vld [vmem:[#allocation3 + $0x9] sm:$0xff]  ;;  %v3800_v24 = vld [vmem:[#allocation3 + $0x11] sm:$0x3]  ;;  %v4149_v33 = vld [vmem:[#allocation3 + $0x1d] sm:$0xff] }
 0x3d0   :  { %v3801_v58 = vpack.c.bf16 %v3799_v28, %v3798_v30  ;;  %v3802_v3 = vpack.c.bf16 %v3800_v24, %v3800_v24  ;;  %v4079_v45 = vld [vmem:[#allocation3 + $0xb] sm:$0xff]  ;;  %v4151_v43 = vpack.c.bf16 %v4149_v33, %v4148_v54 }
 0x3d1   :  { %5288 = vmatprep.mubr.msk.bf16.mxu1 %vm3598_vm13, %v3674_v61  ;;  %5295 = vmatmul.mubr.msk.bf16.vlgmr.msra.gmra.mxu0 %vm3598_vm13, %v3668_v44  ;;  %v4081_v36 = vpack.c.bf16 %v4079_v45, %v4078_v11  ;;  %v4219_v59 = vld [vmem:[#allocation3 + $0xc] sm:$0xff] }
 0x3d2   :  { %5289 = vmatmul.mubr.msk.bf16.vlgmr.msra.gmra.mxu1 %vm3598_vm13, %v3675_v9  ;;  %5306 = vmatprep.mubr.msk.bf16.mxu0 %vm3598_vm13, %v3871_v25  ;;  %v4221_v35 = vpack.c.bf16 %v4219_v59, %v4218_v10  ;;  %v4601_v54 = vld [vmem:[%s7139_s6] ss:$0 sm:$0xff] }
 0x3d3   :  { %5299 = vmatpush3.bf16.msra.mxu1 %v7145_v13  ;;  %5300 = vmatprep.mubr.msk.bf16.mxu1 %vm3598_vm13, %v3801_v58 }
 0x3d4   :  { %5305 = vmatpush3.bf16.msra.mxu0 %v7146_v40  ;;  %5310 = vmatprep.subr.bf16.mxu1 %v5428_v1 }
 0x3d5   :  { %5316 = vmatprep.subr.bf16.mxu0 %v5429_v26 }
 0x3d9   :  { %5307 = vmatmul.mubr.msk.bf16.vlgmr.msra.gmra.mxu0 %vm3598_vm13, %v3872_v16 }
 0x3da   :  { %5301 = vmatmul.mubr.msk.bf16.vlgmr.msra.gmra.mxu1 %vm3598_vm13, %v3802_v3  ;;  %5318 = vmatprep.mubr.msk.bf16.mxu0 %vm3598_vm13, %v4011_v46 }
 0x3db   :  { %5311 = vmatpush3.bf16.msra.mxu1 %v5428_v1  ;;  %5312 = vmatprep.mubr.msk.bf16.mxu1 %vm3598_vm13, %v3941_v42 }
 0x3dc   :  { %5317 = vmatpush3.bf16.msra.mxu0 %v5429_v26  ;;  %5322 = vmatprep.subr.bf16.mxu1 %v5430_v14 }
 0x3dd   :  { %5328 = vmatprep.subr.bf16.mxu0 %v5431_v0 }
 0x3e1   :  { %5319 = vmatmul.mubr.msk.bf16.vlgmr.msra.gmra.mxu0 %vm3598_vm13, %v4012_v31 }
 0x3e2   :  { %5313 = vmatmul.mubr.msk.bf16.vlgmr.msra.gmra.mxu1 %vm3598_vm13, %v3942_v2  ;;  %5330 = vmatprep.mubr.msk.bf16.mxu0 %vm3598_vm13, %v4151_v43 }
 0x3e3   :  { %5323 = vmatpush3.bf16.msra.mxu1 %v5430_v14  ;;  %5324 = vmatprep.mubr.msk.bf16.mxu1 %vm3598_vm13, %v4081_v36 }
 0x3e4   :  { %5329 = vmatpush3.bf16.msra.mxu0 %v5431_v0  ;;  %5334 = vmatprep.subr.bf16.mxu1 %v5432_v55 }
 0x3e9   :  { %5331 = vmatmul.mubr.msk.bf16.vlgmr.msra.gmra.mxu0 %vm3598_vm13, %v4152_v60 }
 0x3ea   :  { %5325 = vmatmul.mubr.msk.bf16.vlgmr.msra.gmra.mxu1 %vm3598_vm13, %v4082_v27 }
 0x3eb   :  { %5335 = vmatpush3.bf16.msra.mxu1 %v5432_v55  ;;  %5336 = vmatprep.mubr.msk.bf16.mxu1 %vm3598_vm13, %v4221_v35 }
 0x3f2   :  { %5337 = vmatmul.mubr.msk.bf16.vlgmr.msra.gmra.mxu1 %vm3598_vm13, %v4222_v7 }
 0x491   :  { %v5296_v62 = vpop.f32.mrf.mxu0 }
 0x492   :  { %v5290_v4 = vpop.f32.mrf.mxu1 }
 0x493   :  { %v3784_v34 = vpop.f32.mrf.mxu0  ;;  %v3793_v48 = vadd.f32 %v5296_v62, %v5290_v4 }
 0x494   :  { %v3724_v21 = vpop.f32.mrf.mxu1 }
 0x495   :  { %v5297_v37 = vpop.f32.mrf.mxu0  ;;  %v3785_v15 = vadd.f32 %v3784_v34, %v3724_v21 }
 0x496   :  { %v5291_v39 = vpop.f32.mrf.mxu1 }
 0x497   :  { %v3787_v6 = vpop.f32.mrf.mxu0 }
 0x498   :  { %v3727_v38 = vpop.f32.mrf.mxu1 }
 0x499   :  { %v5308_v57 = vpop.f32.mrf.mxu0  ;;  %v3788_v28 = vadd.f32 %v3787_v6, %v3727_v38 }
 0x49a   :  { %v5302_v12 = vpop.f32.mrf.mxu1 }
 0x49b   :  { %v3921_v18 = vpop.f32.mrf.mxu0  ;;  %v3867_v47 = vadd.f32 %v5302_v12, %v3793_v48 }
 0x49c   :  { %v3851_v32 = vpop.f32.mrf.mxu1 }
 0x49d   :  { %v5309_v23 = vpop.f32.mrf.mxu0  ;;  %v3865_v44 = vadd.f32 %v3851_v32, %v3785_v15  ;;  %v3937_v25 = vadd.f32 %v5308_v57, %v3867_v47 }
 0x49e   :  { %v5303_v51 = vpop.f32.mrf.mxu1 }
 0x49f   :  { %v3924_v5 = vpop.f32.mrf.mxu0  ;;  %v3935_v8 = vadd.f32 %v3921_v18, %v3865_v44 }
 0x4a0   :  { %v3854_v41 = vpop.f32.mrf.mxu1 }
 0x4a1   :  { %v5320_v49 = vpop.f32.mrf.mxu0  ;;  %v3866_v58 = vadd.f32 %v3854_v41, %v3788_v28 }
 0x4a2   :  { %v5314_v61 = vpop.f32.mrf.mxu1 }
 0x4a3   :  { %v4061_v9 = vpop.f32.mrf.mxu0  ;;  %v4007_v26 = vadd.f32 %v5314_v61, %v3937_v25  ;;  %v3936_v22 = vadd.f32 %v3924_v5, %v3866_v58 }
 0x4a4   :  { %v3991_v19 = vpop.f32.mrf.mxu1 }
 0x4a5   :  { %v5321_v30 = vpop.f32.mrf.mxu0  ;;  %v4005_v16 = vadd.f32 %v3991_v19, %v3935_v8  ;;  %v4077_v20 = vadd.f32 %v5320_v49, %v4007_v26 }
 0x4a6   :  { %v5315_v1 = vpop.f32.mrf.mxu1 }
 0x4a7   :  { %v4064_v13 = vpop.f32.mrf.mxu0  ;;  %v4075_v42 = vadd.f32 %v4061_v9, %v4005_v16 }
 0x4a8   :  { %v3994_v40 = vpop.f32.mrf.mxu1 }
 0x4a9   :  { %v5332_v24 = vpop.f32.mrf.mxu0  ;;  %v4006_v56 = vadd.f32 %v3994_v40, %v3936_v22 }
 0x4aa   :  { %v5326_v53 = vpop.f32.mrf.mxu1 }
 0x4ab   :  { %v4201_v3 = vpop.f32.mrf.mxu0  ;;  %v4147_v14 = vadd.f32 %v5326_v53, %v4077_v20  ;;  %v4076_v2 = vadd.f32 %v4064_v13, %v4006_v56 }
 0x4ac   :  { %v4131_v46 = vpop.f32.mrf.mxu1 }
 0x4ad   :  { %v5333_v0 = vpop.f32.mrf.mxu0  ;;  %v4145_v29 = vadd.f32 %v4131_v46, %v4075_v42  ;;  %v4217_v45 = vadd.f32 %v5332_v24, %v4147_v14 }
 0x4ae   :  { %v5327_v50 = vpop.f32.mrf.mxu1 }
 0x4af   :  { %v4215_v55 = vadd.f32 %v4201_v3, %v4145_v29  ;;  %v4204_v27 = vpop.f32.mrf.mxu0 }
 0x4b0   :  { %v4134_v33 = vpop.f32.mrf.mxu1 }
 0x4b1   :  { %v4146_v43 = vadd.f32 %v4134_v33, %v4076_v2 }
 0x4b2   :  { %v5338_v31 = vpop.f32.mrf.mxu1 }
 0x4b3   :  { %v4287_v11 = vadd.f32 %v5338_v31, %v4217_v45  ;;  %v4216_v35 = vadd.f32 %v4204_v27, %v4146_v43 }
 0x4b4   :  { %v4271_v36 = vpop.f32.mrf.mxu1 }
 0x4b5   :  { %v4297_v63 = vadd.f32 %v4601_v54, %v4287_v11  ;;  %v4285_v52 = vadd.f32 %v4271_v36, %v4215_v55 }
 0x4b6   :  { %v5339_v59 = vpop.f32.mrf.mxu1 }
 0x4b7   :  { %v4300_v60 = vmax.f32 %v4297_v63, 0.0  ;;  %v4295_v10 = vadd.f32 %v4601_v54, %v4285_v52 }
 0x4b8   :  { %v4274_v17 = vpop.f32.mrf.mxu1 }
 0x4b9   :  { %4305 = vst.msk [vmem:[%s7140_s9 + $0x10] sm:$0x3] %vm4304_vm15, %v4300_v60  ;;  %v4298_v7 = vmax.f32 %v4295_v10, 0.0  ;;  %v4286_v62 = vadd.f32 %v4274_v17, %v4216_v35 }
 0x4bb   :  { %4302 = vst.msk [vmem:[%s7140_s9] sm:$0xff] %vm4301_vm0, %v4298_v7  ;;  %v4296_v4 = vadd.f32 %v4601_v54, %v4286_v62 }
 0x4bd   :  { %v4299_v34 = vmax.f32 %v4296_v4, 0.0 }
 0x4bf   :  { %4303 = vst.msk [vmem:[%s7140_s9 + $0x8] sm:$0xff] %vm4301_vm0, %v4299_v34 }

</bundles_post_ra>
